<compile_context>
chip_gen: v6e
topology: v6e:2x2x1
jax: 0.10.0
libtpu: 0.0.40
codegen_flags: <defaults>
</compile_context>

<pallas_src>
import functools

import jax
import jax.numpy as jnp
from jax.experimental import pallas as pl
from jax.experimental.pallas import tpu as pltpu


_VMEM_LIMIT_FC = 32 * 1024 * 1024


def _round_up(x, m):
    return ((x + m - 1) // m) * m


def _point_tiling():
    """(max point-tile rows, vmem_limit_bytes) derived from the chip's VMEM.

    128-MiB chips (v5e/v6e): big tiles to amortize the ~0.35us grid-step cost.
    64-MiB chips (v7x) / unknown: conservative tile + limit.
    """
    vmem = None
    try:
        info = pltpu.get_tpu_info()
        vmem = getattr(info, "vmem_capacity_bytes", None)
        if vmem is None:
            vmem = getattr(info, "vmem_bytes", None)
    except Exception:
        vmem = None
    if vmem is not None and vmem >= 100 * 1024 * 1024:
        return 4096, 96 * 1024 * 1024          # v5e / v6e
    return 2048, 44 * 1024 * 1024              # v7x / unknown (fail safe)


# ----------------------------------------------------------------------------
# Kernel 1: fused point MLP  conv1 -> conv2 -> conv3 -> max over points
# ----------------------------------------------------------------------------

def _point_mlp_max_kernel(x_ref, w1_ref, b1_ref, w2_ref, b2_ref,
                          w3_ref, b3_ref, o_ref, *, relu3):
    """One (batch[*split], point-tile) grid step.

    x_ref:  (1, TILE_N, 3) f32
    w1_ref: (1, 3, 64) f32 (BN1 scale pre-folded; per-batch when STN folded)
    w2_ref: (64, 128) bf16, w3_ref: (128, 1024) bf16 (BN scale pre-folded)
    b*_ref: (1, C) f32 folded BatchNorm shifts (conv bias included)
    o_ref:  (1, 1, 1024) f32 -- doubles as the running-max accumulator.

    NOTE: o_ref's block index is constant across the point-tile axis, so the
    output block stays VMEM-resident and accumulates across it; that axis MUST
    remain the innermost "arbitrary" grid axis (do not reorder / parallelize).
    """
    t = pl.program_id(1)

    @pl.when(t == 0)
    def _():
        o_ref[...] = jnp.full(o_ref.shape, -jnp.inf, dtype=o_ref.dtype)

    x = x_ref[0]                           # (TILE_N, 3) f32
    w1 = w1_ref[0]                         # (3, 64) f32

    # Layer 1: K=3 -> three VPU broadcast FMAs (exact f32), not an MXU matmul.
    h = (x[:, 0:1] * w1[0:1, :]
         + x[:, 1:2] * w1[1:2, :]
         + x[:, 2:3] * w1[2:3, :])
    h = jnp.maximum(h + b1_ref[...], 0.0)

    # Layer 2 (bf16 MXU, f32 accumulate; BN scale folded into w2).
    h = jnp.dot(h.astype(w2_ref.dtype), w2_ref[...],
                preferred_element_type=jnp.float32)
    h = jnp.maximum(h + b2_ref[...], 0.0)

    # Layer 3 raw matmul (BN scale folded into w3); shift/ReLU hoisted past max.
    h = jnp.dot(h.astype(w3_ref.dtype), w3_ref[...],
                preferred_element_type=jnp.float32)

    o_ref[0] = jnp.maximum(o_ref[0], jnp.max(h, axis=0, keepdims=True))

    @pl.when(t == pl.num_programs(1) - 1)
    def _():
        # max(h + b) == max(h) + b and ReLU is monotone, so applying them once
        # on the (1, 1024) accumulator is exact.
        y = o_ref[0] + b3_ref[...]
        if relu3:
            y = jnp.maximum(y, 0.0)
        o_ref[0] = y


def point_mlp_max(xt, w1, sh1, w2, sh2, w3, sh3, *, relu3):
    """xt: (B, N, 3) f32.  w1: (1,3,64) shared or (B,3,64) per-batch f32 with
    BN1 scale folded in; w2: (64,128) bf16, w3: (128,1024) bf16 (scale folded).
    sh*: f32 BN shifts.  Returns (B, 1024) f32 global max feature."""
    b, n, _ = xt.shape
    max_tile, vmem_limit = _point_tiling()

    tile_n = _round_up(n, 8) if n <= max_tile else max_tile
    tiles_total = pl.cdiv(n, tile_n)

    # v7x megacore: with B==1 (or odd B) the batch "parallel" axis alone cannot
    # keep both TensorCores busy, so split the point range in two and
    # max-combine the two fully-epilogued partials afterwards (shift/ReLU
    # commute with max, so per-split epilogues compose exactly).  On 1-TC chips
    # this costs at most one extra grid step + a tiny (B,2,1024) max.
    ns = 2 if (b % 2 == 1 and tiles_total >= 2) else 1
    tps = _round_up(tiles_total, ns) // ns
    n_pad = ns * tps * tile_n
    if n_pad != n:
        # Edge-pad (duplicate the last real point): duplicates can never win
        # the max, so no in-kernel mask is needed.
        xt = jnp.pad(xt, ((0, 0), (0, n_pad - n), (0, 0)), mode="edge")

    per_batch_w1 = w1.shape[0] > 1
    if ns == 1:
        x_map = lambda g, t: (g, t, 0)
        w1_map = (lambda g, t: (g, 0, 0)) if per_batch_w1 else (lambda g, t: (0, 0, 0))
    else:
        x_map = lambda g, t: (g // ns, (g % ns) * tps + t, 0)
        w1_map = (lambda g, t: (g // ns, 0, 0)) if per_batch_w1 else (lambda g, t: (0, 0, 0))
    const2 = lambda g, t: (0, 0)

    kernel = functools.partial(_point_mlp_max_kernel, relu3=relu3)

    out = pl.pallas_call(
        kernel,
        out_shape=jax.ShapeDtypeStruct((b * ns, 1, 1024), jnp.float32),
        grid_spec=pltpu.PrefetchScalarGridSpec(
            num_scalar_prefetch=0,
            grid=(b * ns, tps),
            in_specs=[
                pl.BlockSpec((1, tile_n, 3), x_map),
                pl.BlockSpec((1, 3, 64), w1_map),
                pl.BlockSpec((1, 64), const2),
                pl.BlockSpec((64, 128), const2),
                pl.BlockSpec((1, 128), const2),
                pl.BlockSpec((128, 1024), const2),
                pl.BlockSpec((1, 1024), const2),
            ],
            out_specs=pl.BlockSpec((1, 1, 1024), lambda g, t: (g, 0, 0)),
        ),
        compiler_params=pltpu.CompilerParams(
            dimension_semantics=("parallel", "arbitrary"),
            vmem_limit_bytes=vmem_limit,
        ),
    )(xt, w1,
      sh1.reshape(1, 64), w2, sh2.reshape(1, 128), w3, sh3.reshape(1, 1024))

    out = out.reshape(b, ns, 1024)
    return out[:, 0] if ns == 1 else jnp.max(out, axis=1)


# ----------------------------------------------------------------------------
# Kernel 2: fused FC head  fc1 -> fc2 -> fc3 (+ optional log_softmax)
# ----------------------------------------------------------------------------

def _fc_head_kernel(x_ref, w1_ref, b1_ref, w2_ref, b2_ref,
                    w3_ref, b3_ref, o_ref, *, logsoftmax):
    h = jnp.dot(x_ref[...].astype(w1_ref.dtype), w1_ref[...],
                preferred_element_type=jnp.float32)
    h = jnp.maximum(h + b1_ref[...], 0.0)
    h = jnp.dot(h.astype(w2_ref.dtype), w2_ref[...],
                preferred_element_type=jnp.float32)
    h = jnp.maximum(h + b2_ref[...], 0.0)
    y = jnp.dot(h.astype(w3_ref.dtype), w3_ref[...],
                preferred_element_type=jnp.float32) + b3_ref[...]
    if logsoftmax:
        m = jnp.max(y, axis=-1, keepdims=True)
        z = y - m
        y = z - jnp.log(jnp.sum(jnp.exp(z), axis=-1, keepdims=True))
    o_ref[...] = y.astype(o_ref.dtype)


def fc_head(x, w1, b1, w2, b2, w3, b3, *, logsoftmax):
    """x: (B, 1024) f32; weights bf16 (BN scale folded); shifts/bias f32.
    Batch-tiled "parallel" grid so large B uses both TCs on v7x and the
    weights stay VMEM-resident via constant-index BlockSpecs."""
    b = x.shape[0]
    k = w3.shape[1]
    tile_b = min(256, _round_up(b, 8))
    b_pad = _round_up(b, tile_b)
    if b_pad != b:
        x = jnp.pad(x, ((0, b_pad - b), (0, 0)))

    const = lambda i: (0, 0)
    kernel = functools.partial(_fc_head_kernel, logsoftmax=logsoftmax)
    out = pl.pallas_call(
        kernel,
        out_shape=jax.ShapeDtypeStruct((b_pad, k), jnp.float32),
        grid_spec=pltpu.PrefetchScalarGridSpec(
            num_scalar_prefetch=0,
            grid=(b_pad // tile_b,),
            in_specs=[
                pl.BlockSpec((tile_b, 1024), lambda i: (i, 0)),
                pl.BlockSpec((1024, 512), const),
                pl.BlockSpec((1, 512), const),
                pl.BlockSpec((512, 256), const),
                pl.BlockSpec((1, 256), const),
                pl.BlockSpec((256, k), const),
                pl.BlockSpec((1, k), const),
            ],
            out_specs=pl.BlockSpec((tile_b, k), lambda i: (i, 0)),
        ),
        compiler_params=pltpu.CompilerParams(
            dimension_semantics=("parallel",),
            vmem_limit_bytes=_VMEM_LIMIT_FC,
        ),
    )(x, w1, b1.reshape(1, -1), w2, b2.reshape(1, -1), w3, b3.reshape(1, k))
    return out[:b]


# ----------------------------------------------------------------------------
# Parameter setup (deterministic, synthetic) + BN folding
# ----------------------------------------------------------------------------

def _init_linear(key, cin, cout):
    kw, kb = jax.random.split(key)
    bound = 1.0 / jnp.sqrt(cin)
    w = jax.random.uniform(kw, (cin, cout), jnp.float32, -bound, bound)
    b = jax.random.uniform(kb, (cout,), jnp.float32, -bound, bound)
    return {"w": w, "b": b}


def _init_bn(key, c):
    k1, k2, k3, k4 = jax.random.split(key, 4)
    return {
        "gamma": 1.0 + 0.1 * jax.random.normal(k1, (c,), jnp.float32),
        "beta": 0.1 * jax.random.normal(k2, (c,), jnp.float32),
        "mean": 0.1 * jax.random.normal(k3, (c,), jnp.float32),
        "var": jax.random.uniform(k4, (c,), jnp.float32, 0.5, 1.5),
    }


def _bn_fold(bn, bias, eps=1e-5):
    """Fold eval-mode BatchNorm + preceding bias into (scale, shift)."""
    inv = bn["gamma"] / jnp.sqrt(bn["var"] + eps)
    return inv, bn["beta"] + inv * (bias - bn["mean"])


def _prep(lin, bn, dtype=jnp.bfloat16):
    """Fold eval BN (+bias) into the layer: W <- W * scale (per output column,
    sign-safe), cast W, return (W, shift).  Kernel epilogue becomes `+ shift`."""
    scale, shift = _bn_fold(bn, lin["b"])
    return (lin["w"] * scale[None, :]).astype(dtype), shift


def init_params(key, k_classes=2):
    keys = jax.random.split(key, 32)
    ki = iter(keys)
    stn = {
        "conv1": _init_linear(next(ki), 3, 64),
        "conv2": _init_linear(next(ki), 64, 128),
        "conv3": _init_linear(next(ki), 128, 1024),
        "fc1": _init_linear(next(ki), 1024, 512),
        "fc2": _init_linear(next(ki), 512, 256),
        "fc3": _init_linear(next(ki), 256, 9),
        "bn1": _init_bn(next(ki), 64),
        "bn2": _init_bn(next(ki), 128),
        "bn3": _init_bn(next(ki), 1024),
        "bn4": _init_bn(next(ki), 512),
        "bn5": _init_bn(next(ki), 256),
    }
    feat = {
        "stn": stn,
        "conv1": _init_linear(next(ki), 3, 64),
        "conv2": _init_linear(next(ki), 64, 128),
        "conv3": _init_linear(next(ki), 128, 1024),
        "bn1": _init_bn(next(ki), 64),
        "bn2": _init_bn(next(ki), 128),
        "bn3": _init_bn(next(ki), 1024),
    }
    cls = {
        "feat": feat,
        "fc1": _init_linear(next(ki), 1024, 512),
        "fc2": _init_linear(next(ki), 512, 256),
        "fc3": _init_linear(next(ki), 256, k_classes),
        "bn1": _init_bn(next(ki), 512),
        "bn2": _init_bn(next(ki), 256),
    }
    return cls


# ----------------------------------------------------------------------------
# Forward passes (thin glue around the two fused Pallas kernels)
# ----------------------------------------------------------------------------

def stn3d_forward(xt, p):
    """xt: (B, N, 3) -> (B, 3, 3) spatial transform."""
    b = xt.shape[0]
    w1, sh1 = _prep(p["conv1"], p["bn1"], jnp.float32)   # layer 1 stays f32
    w2, sh2 = _prep(p["conv2"], p["bn2"])
    w3, sh3 = _prep(p["conv3"], p["bn3"])
    g = point_mlp_max(xt, w1.reshape(1, 3, 64), sh1, w2, sh2, w3, sh3,
                      relu3=True)

    f1, fb1 = _prep(p["fc1"], p["bn4"])
    f2, fb2 = _prep(p["fc2"], p["bn5"])
    f3w = p["fc3"]["w"].astype(jnp.bfloat16)
    f3b = p["fc3"]["b"] + jnp.eye(3, dtype=jnp.float32).reshape(-1)  # identity folded
    t9 = fc_head(g, f1, fb1, f2, fb2, f3w, f3b, logsoftmax=False)
    return t9.reshape(b, 3, 3)


def pointnetfeat_forward(x, p):
    """x: (B, 3, N) -> (global_feat (B,1024), trans (B,3,3), trans_feat=None)."""
    xt = jnp.transpose(x, (0, 2, 1))                      # (B, N, 3)
    trans = stn3d_forward(xt, p["stn"])

    # Fold the STN transform AND the BN1 scale into conv1 (exact, f32):
    # (x^T @ T) @ (W1 * s1) == (x^T @ (T @ (W1 * s1))).
    scale1, sh1 = _bn_fold(p["bn1"], p["conv1"]["b"])
    w1_fold = jnp.einsum("bij,jk->bik", trans,
                         p["conv1"]["w"] * scale1[None, :])   # (B, 3, 64) f32

    w2, sh2 = _prep(p["conv2"], p["bn2"])
    w3, sh3 = _prep(p["conv3"], p["bn3"])
    g = point_mlp_max(xt, w1_fold, sh1, w2, sh2, w3, sh3,
                      relu3=False)                        # conv3 has no ReLU here
    return g, trans, None


def pointnet_cls_forward(x, params):
    """x: (B, 3, N) -> (log_probs (B,k), trans (B,3,3), trans_feat=None)."""
    g, trans, trans_feat = pointnetfeat_forward(x, params["feat"])

    f1, fb1 = _prep(params["fc1"], params["bn1"])
    # TODO(synk): Dropout(p=0.3) is identity in eval mode; training-mode RNG
    # dropout and training-mode BatchNorm batch statistics are not implemented.
    f2, fb2 = _prep(params["fc2"], params["bn2"])
    f3w = params["fc3"]["w"].astype(jnp.bfloat16)
    f3b = params["fc3"]["b"]

    log_probs = fc_head(g, f1, fb1, f2, fb2, f3w, f3b, logsoftmax=True)
    return log_probs, trans, trans_feat


# ----------------------------------------------------------------------------
# Pure-JAX f32 reference (eval-mode semantics) for a sanity check
# ----------------------------------------------------------------------------

def _ref_forward(x, params):
    def lin_bn(h, lin, bn, relu):
        scale, shift = _bn_fold(bn, lin["b"])
        y = (h @ lin["w"]) * scale + shift
        return jnp.maximum(y, 0.0) if relu else y

    b, _, n = x.shape
    xt = jnp.transpose(x, (0, 2, 1))
    p = params["feat"]["stn"]
    h = xt.reshape(b * n, 3)
    h = lin_bn(h, p["conv1"], p["bn1"], True)
    h = lin_bn(h, p["conv2"], p["bn2"], True)
    h = lin_bn(h, p["conv3"], p["bn3"], True)
    g = jnp.max(h.reshape(b, n, 1024), axis=1)
    g = lin_bn(g, p["fc1"], p["bn4"], True)
    g = lin_bn(g, p["fc2"], p["bn5"], True)
    g = g @ p["fc3"]["w"] + p["fc3"]["b"] + jnp.eye(3, dtype=jnp.float32).reshape(-1)
    trans = g.reshape(b, 3, 3)

    pf = params["feat"]
    ht = jnp.einsum("bnc,bck->bnk", xt, trans).reshape(b * n, 3)
    h = lin_bn(ht, pf["conv1"], pf["bn1"], True)
    h = lin_bn(h, pf["conv2"], pf["bn2"], True)
    h = lin_bn(h, pf["conv3"], pf["bn3"], False)
    g = jnp.max(h.reshape(b, n, 1024), axis=1)

    h = lin_bn(g, params["fc1"], params["bn1"], True)
    h = lin_bn(h, params["fc2"], params["bn2"], True)
    y = h @ params["fc3"]["w"] + params["fc3"]["b"]
    return jax.nn.log_softmax(y, axis=1), trans


# ----------------------------------------------------------------------------

if __name__ == "__main__":
    key = jax.random.PRNGKey(0)
    k_params, k_x = jax.random.split(key)

    B, N, K_CLASSES = 2, 16, 2
    params = init_params(k_params, k_classes=K_CLASSES)
    x = jax.random.normal(k_x, (B, 3, N), jnp.float32)   # PyTorch NCW point cloud

    fwd = jax.jit(pointnet_cls_forward)
    log_probs, trans, trans_feat = fwd(x, params)
    jax.block_until_ready((log_probs, trans))

    assert log_probs.shape == (B, K_CLASSES)
    assert trans.shape == (B, 3, 3)
    assert trans_feat is None
    # log_softmax rows must exp-sum to 1
    assert jnp.allclose(jnp.sum(jnp.exp(log_probs), axis=1), 1.0, atol=1e-4)

    # Cross-check against pure-JAX f32 reference (bf16 MXU path => loose tol).
    ref_logp, ref_trans = _ref_forward(x, params)
    assert jnp.allclose(trans, ref_trans, atol=5e-2, rtol=5e-2)
    assert jnp.allclose(log_probs, ref_logp, atol=5e-2, rtol=5e-2)

    print("KERNEL_OK")
</pallas_src>

<mosaic_0001>
module attributes {stable_mosaic.version = 11 : i64} {
  func.func @_point_mlp_max_kernel(%arg0: i32, %arg1: i32, %arg2: memref<1x16x3xf32, #tpu.memory_space<vmem>>, %arg3: memref<1x3x64xf32, #tpu.memory_space<vmem>>, %arg4: memref<1x64xf32, #tpu.memory_space<vmem>>, %arg5: memref<64x128xbf16, #tpu.memory_space<vmem>>, %arg6: memref<1x128xf32, #tpu.memory_space<vmem>>, %arg7: memref<128x1024xbf16, #tpu.memory_space<vmem>>, %arg8: memref<1x1024xf32, #tpu.memory_space<vmem>>, %arg9: memref<1x1x1024xf32, #tpu.memory_space<vmem>>) attributes {dimension_semantics = [#tpu.dimension_semantics<parallel>, #tpu.dimension_semantics<arbitrary>], iteration_bounds = array<i64: 2, 1>, scalar_prefetch = 0 : i64, scratch_operands = 0 : i64, tpu.core_type = #tpu.core_type<tc>, window_params = [{transform_indices = @transform_0, window_bounds = array<i64: 1, 16, 3>}, {pipeline_mode = #tpu.pipeline_mode<synchronous>, transform_indices = @transform_1, window_bounds = array<i64: 1, 3, 64>}, {pipeline_mode = #tpu.pipeline_mode<synchronous>, transform_indices = @transform_2, window_bounds = array<i64: 1, 64>}, {pipeline_mode = #tpu.pipeline_mode<synchronous>, transform_indices = @transform_3, window_bounds = array<i64: 64, 128>}, {pipeline_mode = #tpu.pipeline_mode<synchronous>, transform_indices = @transform_4, window_bounds = array<i64: 1, 128>}, {pipeline_mode = #tpu.pipeline_mode<synchronous>, transform_indices = @transform_5, window_bounds = array<i64: 128, 1024>}, {pipeline_mode = #tpu.pipeline_mode<synchronous>, transform_indices = @transform_6, window_bounds = array<i64: 1, 1024>}, {transform_indices = @transform_7, window_bounds = array<i64: 1, 1, 1024>}]} {
    %c0_i32 = arith.constant 0 : i32
    %0 = arith.cmpi eq, %arg1, %c0_i32 : i32
    %1 = arith.extui %0 : i1 to i32
    %c0_i32_0 = arith.constant 0 : i32
    %2 = arith.cmpi ne, %1, %c0_i32_0 : i32
    scf.if %2 {
      %cst_26 = arith.constant 0xFF800000 : f32
      %51 = vector.broadcast %cst_26 : f32 to vector<1x1x1024xf32>
      %c0_27 = arith.constant 0 : index
      %c0_28 = arith.constant 0 : index
      %c0_29 = arith.constant 0 : index
      %52 = vector.load %arg9[%c0_27, %c0_28, %c0_29] : memref<1x1x1024xf32, #tpu.memory_space<vmem>>, vector<1x1x1024xf32>
      tpu.vector_store %arg9[%c0_27, %c0_28, %c0_29], %51 {strides = array<i32>} : memref<1x1x1024xf32, #tpu.memory_space<vmem>>, vector<1x1x1024xf32>,
    } else {
    }
    %c0 = arith.constant 0 : index
    %c0_1 = arith.constant 0 : index
    %c0_2 = arith.constant 0 : index
    %3 = vector.load %arg2[%c0, %c0_1, %c0_2] : memref<1x16x3xf32, #tpu.memory_space<vmem>>, vector<1x16x3xf32>
    %4 = vector.shape_cast %3 : vector<1x16x3xf32> to vector<16x3xf32>
    %c0_3 = arith.constant 0 : index
    %c0_4 = arith.constant 0 : index
    %c0_5 = arith.constant 0 : index
    %5 = vector.load %arg3[%c0_3, %c0_4, %c0_5] : memref<1x3x64xf32, #tpu.memory_space<vmem>>, vector<1x3x64xf32>
    %6 = vector.shape_cast %5 : vector<1x3x64xf32> to vector<3x64xf32>
    %7 = vector.extract_strided_slice %4 {offsets = [0, 0], sizes = [16, 1], strides = [1, 1]} : vector<16x3xf32> to vector<16x1xf32>
    %8 = vector.extract_strided_slice %6 {offsets = [0, 0], sizes = [1, 64], strides = [1, 1]} : vector<3x64xf32> to vector<1x64xf32>
    %9 = vector.broadcast %7 : vector<16x1xf32> to vector<16x64xf32>
    %10 = vector.broadcast %8 : vector<1x64xf32> to vector<16x64xf32>
    %11 = arith.mulf %9, %10 : vector<16x64xf32>
    %12 = vector.extract_strided_slice %4 {offsets = [0, 1], sizes = [16, 1], strides = [1, 1]} : vector<16x3xf32> to vector<16x1xf32>
    %13 = vector.extract_strided_slice %6 {offsets = [1, 0], sizes = [1, 64], strides = [1, 1]} : vector<3x64xf32> to vector<1x64xf32>
    %14 = vector.broadcast %12 : vector<16x1xf32> to vector<16x64xf32>
    %15 = vector.broadcast %13 : vector<1x64xf32> to vector<16x64xf32>
    %16 = arith.mulf %14, %15 : vector<16x64xf32>
    %17 = arith.addf %11, %16 : vector<16x64xf32>
    %18 = vector.extract_strided_slice %4 {offsets = [0, 2], sizes = [16, 1], strides = [1, 1]} : vector<16x3xf32> to vector<16x1xf32>
    %19 = vector.extract_strided_slice %6 {offsets = [2, 0], sizes = [1, 64], strides = [1, 1]} : vector<3x64xf32> to vector<1x64xf32>
    %20 = vector.broadcast %18 : vector<16x1xf32> to vector<16x64xf32>
    %21 = vector.broadcast %19 : vector<1x64xf32> to vector<16x64xf32>
    %22 = arith.mulf %20, %21 : vector<16x64xf32>
    %23 = arith.addf %17, %22 : vector<16x64xf32>
    %c0_6 = arith.constant 0 : index
    %c0_7 = arith.constant 0 : index
    %24 = vector.load %arg4[%c0_6, %c0_7] : memref<1x64xf32, #tpu.memory_space<vmem>>, vector<1x64xf32>
    %25 = vector.broadcast %24 : vector<1x64xf32> to vector<16x64xf32>
    %26 = arith.addf %23, %25 : vector<16x64xf32>
    %cst = arith.constant 0.000000e+00 : f32
    %27 = vector.broadcast %cst : f32 to vector<16x64xf32>
    %28 = arith.maximumf %26, %27 : vector<16x64xf32>
    %29 = arith.truncf %28 : vector<16x64xf32> to vector<16x64xbf16>
    %c0_8 = arith.constant 0 : index
    %c0_9 = arith.constant 0 : index
    %30 = vector.load %arg5[%c0_8, %c0_9] : memref<64x128xbf16, #tpu.memory_space<vmem>>, vector<64x128xbf16>
    %cst_10 = arith.constant dense<0.000000e+00> : vector<16x128xf32>
    %31 = tpu.matmul %29, %30, %cst_10 {dimension_numbers = #tpu.dot_dimension_numbers<[1], [0], [0], [1], [0, 0, 1, 1], [], []>} : vector<16x64xbf16>, vector<64x128xbf16>, vector<16x128xf32> -> vector<16x128xf32>
    %c0_11 = arith.constant 0 : index
    %c0_12 = arith.constant 0 : index
    %32 = vector.load %arg6[%c0_11, %c0_12] : memref<1x128xf32, #tpu.memory_space<vmem>>, vector<1x128xf32>
    %33 = vector.broadcast %32 : vector<1x128xf32> to vector<16x128xf32>
    %34 = arith.addf %31, %33 : vector<16x128xf32>
    %cst_13 = arith.constant 0.000000e+00 : f32
    %35 = vector.broadcast %cst_13 : f32 to vector<16x128xf32>
    %36 = arith.maximumf %34, %35 : vector<16x128xf32>
    %37 = arith.truncf %36 : vector<16x128xf32> to vector<16x128xbf16>
    %c0_14 = arith.constant 0 : index
    %c0_15 = arith.constant 0 : index
    %38 = vector.load %arg7[%c0_14, %c0_15] : memref<128x1024xbf16, #tpu.memory_space<vmem>>, vector<128x1024xbf16>
    %cst_16 = arith.constant dense<0.000000e+00> : vector<16x1024xf32>
    %39 = tpu.matmul %37, %38, %cst_16 {dimension_numbers = #tpu.dot_dimension_numbers<[1], [0], [0], [1], [0, 0, 1, 1], [], []>} : vector<16x128xbf16>, vector<128x1024xbf16>, vector<16x1024xf32> -> vector<16x1024xf32>
    %c0_17 = arith.constant 0 : index
    %c0_18 = arith.constant 0 : index
    %c0_19 = arith.constant 0 : index
    %40 = vector.load %arg9[%c0_17, %c0_18, %c0_19] : memref<1x1x1024xf32, #tpu.memory_space<vmem>>, vector<1x1x1024xf32>
    %41 = vector.shape_cast %40 : vector<1x1x1024xf32> to vector<1x1024xf32>
    %cst_20 = arith.constant dense<0xFF800000> : vector<1024xf32>
    %42 = vector.multi_reduction <maximumf>, %39, %cst_20 [0] : vector<16x1024xf32> to vector<1024xf32>
    %43 = vector.shape_cast %42 : vector<1024xf32> to vector<1x1024xf32>
    %44 = arith.maximumf %41, %43 : vector<1x1024xf32>
    %c0_21 = arith.constant 0 : index
    %c0_22 = arith.constant 0 : index
    %c0_23 = arith.constant 0 : index
    %45 = vector.load %arg9[%c0_21, %c0_22, %c0_23] : memref<1x1x1024xf32, #tpu.memory_space<vmem>>, vector<1x1x1024xf32>
    %46 = vector.shape_cast %45 : vector<1x1x1024xf32> to vector<1x1024xf32>
    %47 = vector.shape_cast %44 : vector<1x1024xf32> to vector<1x1x1024xf32>
    tpu.vector_store %arg9[%c0_21, %c0_22, %c0_23], %47 {strides = array<i32>} : memref<1x1x1024xf32, #tpu.memory_space<vmem>>, vector<1x1x1024xf32>,
    %c0_i32_24 = arith.constant 0 : i32
    %48 = arith.cmpi eq, %arg1, %c0_i32_24 : i32
    %49 = arith.extui %48 : i1 to i32
    %c0_i32_25 = arith.constant 0 : i32
    %50 = arith.cmpi ne, %49, %c0_i32_25 : i32
    scf.if %50 {
      %c0_26 = arith.constant 0 : index
      %c0_27 = arith.constant 0 : index
      %c0_28 = arith.constant 0 : index
      %51 = vector.load %arg9[%c0_26, %c0_27, %c0_28] : memref<1x1x1024xf32, #tpu.memory_space<vmem>>, vector<1x1x1024xf32>
      %52 = vector.shape_cast %51 : vector<1x1x1024xf32> to vector<1x1024xf32>
      %c0_29 = arith.constant 0 : index
      %c0_30 = arith.constant 0 : index
      %53 = vector.load %arg8[%c0_29, %c0_30] : memref<1x1024xf32, #tpu.memory_space<vmem>>, vector<1x1024xf32>
      %54 = arith.addf %52, %53 : vector<1x1024xf32>
      %cst_31 = arith.constant 0.000000e+00 : f32
      %55 = vector.broadcast %cst_31 : f32 to vector<1x1024xf32>
      %56 = arith.maximumf %54, %55 : vector<1x1024xf32>
      %c0_32 = arith.constant 0 : index
      %c0_33 = arith.constant 0 : index
      %c0_34 = arith.constant 0 : index
      %57 = vector.load %arg9[%c0_32, %c0_33, %c0_34] : memref<1x1x1024xf32, #tpu.memory_space<vmem>>, vector<1x1x1024xf32>
      %58 = vector.shape_cast %57 : vector<1x1x1024xf32> to vector<1x1024xf32>
      %59 = vector.shape_cast %56 : vector<1x1024xf32> to vector<1x1x1024xf32>
      tpu.vector_store %arg9[%c0_32, %c0_33, %c0_34], %59 {strides = array<i32>} : memref<1x1x1024xf32, #tpu.memory_space<vmem>>, vector<1x1x1024xf32>,
    } else {
    }
    return
  }
  func.func @transform_0(%arg0: i32, %arg1: i32) -> (i32, i32, i32) {
    %c0_i32 = arith.constant 0 : i32
    %c0_i32_0 = arith.constant 0 : i32
    return %arg0, %arg1, %c0_i32 : i32, i32, i32
  }
  func.func @transform_1(%arg0: i32, %arg1: i32) -> (i32, i32, i32) {
    %c0_i32 = arith.constant 0 : i32
    %c0_i32_0 = arith.constant 0 : i32
    %c0_i32_1 = arith.constant 0 : i32
    %c0_i32_2 = arith.constant 0 : i32
    return %c0_i32, %c0_i32_0, %c0_i32_1 : i32, i32, i32
  }
  func.func @transform_2(%arg0: i32, %arg1: i32) -> (i32, i32) {
    %c0_i32 = arith.constant 0 : i32
    %c0_i32_0 = arith.constant 0 : i32
    %c0_i32_1 = arith.constant 0 : i32
    return %c0_i32, %c0_i32_0 : i32, i32
  }
  func.func @transform_3(%arg0: i32, %arg1: i32) -> (i32, i32) {
    %c0_i32 = arith.constant 0 : i32
    %c0_i32_0 = arith.constant 0 : i32
    %c0_i32_1 = arith.constant 0 : i32
    return %c0_i32, %c0_i32_0 : i32, i32
  }
  func.func @transform_4(%arg0: i32, %arg1: i32) -> (i32, i32) {
    %c0_i32 = arith.constant 0 : i32
    %c0_i32_0 = arith.constant 0 : i32
    %c0_i32_1 = arith.constant 0 : i32
    return %c0_i32, %c0_i32_0 : i32, i32
  }
  func.func @transform_5(%arg0: i32, %arg1: i32) -> (i32, i32) {
    %c0_i32 = arith.constant 0 : i32
    %c0_i32_0 = arith.constant 0 : i32
    %c0_i32_1 = arith.constant 0 : i32
    return %c0_i32, %c0_i32_0 : i32, i32
  }
  func.func @transform_6(%arg0: i32, %arg1: i32) -> (i32, i32) {
    %c0_i32 = arith.constant 0 : i32
    %c0_i32_0 = arith.constant 0 : i32
    %c0_i32_1 = arith.constant 0 : i32
    return %c0_i32, %c0_i32_0 : i32, i32
  }
  func.func @transform_7(%arg0: i32, %arg1: i32) -> (i32, i32, i32) {
    %c0_i32 = arith.constant 0 : i32
    %c0_i32_0 = arith.constant 0 : i32
    %c0_i32_1 = arith.constant 0 : i32
    return %arg0, %c0_i32, %c0_i32_0 : i32, i32, i32
  }
}

module attributes {stable_mosaic.version = 11 : i64} {
  func.func @_fc_head_kernel(%arg0: i32, %arg1: memref<8x1024xf32, #tpu.memory_space<vmem>>, %arg2: memref<1024x512xbf16, #tpu.memory_space<vmem>>, %arg3: memref<1x512xf32, #tpu.memory_space<vmem>>, %arg4: memref<512x256xbf16, #tpu.memory_space<vmem>>, %arg5: memref<1x256xf32, #tpu.memory_space<vmem>>, %arg6: memref<256x9xbf16, #tpu.memory_space<vmem>>, %arg7: memref<1x9xf32, #tpu.memory_space<vmem>>, %arg8: memref<8x9xf32, #tpu.memory_space<vmem>>) attributes {dimension_semantics = [#tpu.dimension_semantics<parallel>], iteration_bounds = array<i64: 1>, scalar_prefetch = 0 : i64, scratch_operands = 0 : i64, tpu.core_type = #tpu.core_type<tc>, window_params = [{transform_indices = @transform_0, window_bounds = array<i64: 8, 1024>}, {pipeline_mode = #tpu.pipeline_mode<synchronous>, transform_indices = @transform_1, window_bounds = array<i64: 1024, 512>}, {pipeline_mode = #tpu.pipeline_mode<synchronous>, transform_indices = @transform_2, window_bounds = array<i64: 1, 512>}, {pipeline_mode = #tpu.pipeline_mode<synchronous>, transform_indices = @transform_3, window_bounds = array<i64: 512, 256>}, {pipeline_mode = #tpu.pipeline_mode<synchronous>, transform_indices = @transform_4, window_bounds = array<i64: 1, 256>}, {pipeline_mode = #tpu.pipeline_mode<synchronous>, transform_indices = @transform_5, window_bounds = array<i64: 256, 9>}, {pipeline_mode = #tpu.pipeline_mode<synchronous>, transform_indices = @transform_6, window_bounds = array<i64: 1, 9>}, {transform_indices = @transform_7, window_bounds = array<i64: 8, 9>}]} {
    %c0 = arith.constant 0 : index
    %c0_0 = arith.constant 0 : index
    %0 = vector.load %arg1[%c0, %c0_0] : memref<8x1024xf32, #tpu.memory_space<vmem>>, vector<8x1024xf32>
    %1 = arith.truncf %0 : vector<8x1024xf32> to vector<8x1024xbf16>
    %c0_1 = arith.constant 0 : index
    %c0_2 = arith.constant 0 : index
    %2 = vector.load %arg2[%c0_1, %c0_2] : memref<1024x512xbf16, #tpu.memory_space<vmem>>, vector<1024x512xbf16>
    %cst = arith.constant dense<0.000000e+00> : vector<8x512xf32>
    %3 = tpu.matmul %1, %2, %cst {dimension_numbers = #tpu.dot_dimension_numbers<[1], [0], [0], [1], [0, 0, 1, 1], [], []>} : vector<8x1024xbf16>, vector<1024x512xbf16>, vector<8x512xf32> -> vector<8x512xf32>
    %c0_3 = arith.constant 0 : index
    %c0_4 = arith.constant 0 : index
    %4 = vector.load %arg3[%c0_3, %c0_4] : memref<1x512xf32, #tpu.memory_space<vmem>>, vector<1x512xf32>
    %5 = vector.broadcast %4 : vector<1x512xf32> to vector<8x512xf32>
    %6 = arith.addf %3, %5 : vector<8x512xf32>
    %cst_5 = arith.constant 0.000000e+00 : f32
    %7 = vector.broadcast %cst_5 : f32 to vector<8x512xf32>
    %8 = arith.maximumf %6, %7 : vector<8x512xf32>
    %9 = arith.truncf %8 : vector<8x512xf32> to vector<8x512xbf16>
    %c0_6 = arith.constant 0 : index
    %c0_7 = arith.constant 0 : index
    %10 = vector.load %arg4[%c0_6, %c0_7] : memref<512x256xbf16, #tpu.memory_space<vmem>>, vector<512x256xbf16>
    %cst_8 = arith.constant dense<0.000000e+00> : vector<8x256xf32>
    %11 = tpu.matmul %9, %10, %cst_8 {dimension_numbers = #tpu.dot_dimension_numbers<[1], [0], [0], [1], [0, 0, 1, 1], [], []>} : vector<8x512xbf16>, vector<512x256xbf16>, vector<8x256xf32> -> vector<8x256xf32>
    %c0_9 = arith.constant 0 : index
    %c0_10 = arith.constant 0 : index
    %12 = vector.load %arg5[%c0_9, %c0_10] : memref<1x256xf32, #tpu.memory_space<vmem>>, vector<1x256xf32>
    %13 = vector.broadcast %12 : vector<1x256xf32> to vector<8x256xf32>
    %14 = arith.addf %11, %13 : vector<8x256xf32>
    %cst_11 = arith.constant 0.000000e+00 : f32
    %15 = vector.broadcast %cst_11 : f32 to vector<8x256xf32>
    %16 = arith.maximumf %14, %15 : vector<8x256xf32>
    %17 = arith.truncf %16 : vector<8x256xf32> to vector<8x256xbf16>
    %c0_12 = arith.constant 0 : index
    %c0_13 = arith.constant 0 : index
    %18 = vector.load %arg6[%c0_12, %c0_13] : memref<256x9xbf16, #tpu.memory_space<vmem>>, vector<256x9xbf16>
    %cst_14 = arith.constant dense<0.000000e+00> : vector<8x9xf32>
    %19 = tpu.matmul %17, %18, %cst_14 {dimension_numbers = #tpu.dot_dimension_numbers<[1], [0], [0], [1], [0, 0, 1, 1], [], []>} : vector<8x256xbf16>, vector<256x9xbf16>, vector<8x9xf32> -> vector<8x9xf32>
    %c0_15 = arith.constant 0 : index
    %c0_16 = arith.constant 0 : index
    %20 = vector.load %arg7[%c0_15, %c0_16] : memref<1x9xf32, #tpu.memory_space<vmem>>, vector<1x9xf32>
    %21 = vector.broadcast %20 : vector<1x9xf32> to vector<8x9xf32>
    %22 = arith.addf %19, %21 : vector<8x9xf32>
    %c0_17 = arith.constant 0 : index
    %c0_18 = arith.constant 0 : index
    %23 = vector.load %arg8[%c0_17, %c0_18] : memref<8x9xf32, #tpu.memory_space<vmem>>, vector<8x9xf32>
    tpu.vector_store %arg8[%c0_17, %c0_18], %22 {strides = array<i32>} : memref<8x9xf32, #tpu.memory_space<vmem>>, vector<8x9xf32>,
    return
  }
  func.func @transform_0(%arg0: i32) -> (i32, i32) {
    %c0_i32 = arith.constant 0 : i32
    %c0_i32_0 = arith.constant 0 : i32
    return %arg0, %c0_i32 : i32, i32
  }
  func.func @transform_1(%arg0: i32) -> (i32, i32) {
    %c0_i32 = arith.constant 0 : i32
    %c0_i32_0 = arith.constant 0 : i32
    %c0_i32_1 = arith.constant 0 : i32
    return %c0_i32, %c0_i32_0 : i32, i32
  }
  func.func @transform_2(%arg0: i32) -> (i32, i32) {
    %c0_i32 = arith.constant 0 : i32
    %c0_i32_0 = arith.constant 0 : i32
    %c0_i32_1 = arith.constant 0 : i32
    return %c0_i32, %c0_i32_0 : i32, i32
  }
  func.func @transform_3(%arg0: i32) -> (i32, i32) {
    %c0_i32 = arith.constant 0 : i32
    %c0_i32_0 = arith.constant 0 : i32
    %c0_i32_1 = arith.constant 0 : i32
    return %c0_i32, %c0_i32_0 : i32, i32
  }
  func.func @transform_4(%arg0: i32) -> (i32, i32) {
    %c0_i32 = arith.constant 0 : i32
    %c0_i32_0 = arith.constant 0 : i32
    %c0_i32_1 = arith.constant 0 : i32
    return %c0_i32, %c0_i32_0 : i32, i32
  }
  func.func @transform_5(%arg0: i32) -> (i32, i32) {
    %c0_i32 = arith.constant 0 : i32
    %c0_i32_0 = arith.constant 0 : i32
    %c0_i32_1 = arith.constant 0 : i32
    return %c0_i32, %c0_i32_0 : i32, i32
  }
  func.func @transform_6(%arg0: i32) -> (i32, i32) {
    %c0_i32 = arith.constant 0 : i32
    %c0_i32_0 = arith.constant 0 : i32
    %c0_i32_1 = arith.constant 0 : i32
    return %c0_i32, %c0_i32_0 : i32, i32
  }
  func.func @transform_7(%arg0: i32) -> (i32, i32) {
    %c0_i32 = arith.constant 0 : i32
    %c0_i32_0 = arith.constant 0 : i32
    return %arg0, %c0_i32 : i32, i32
  }
}

module attributes {stable_mosaic.version = 11 : i64} {
  func.func @_point_mlp_max_kernel(%arg0: i32, %arg1: i32, %arg2: memref<1x16x3xf32, #tpu.memory_space<vmem>>, %arg3: memref<1x3x64xf32, #tpu.memory_space<vmem>>, %arg4: memref<1x64xf32, #tpu.memory_space<vmem>>, %arg5: memref<64x128xbf16, #tpu.memory_space<vmem>>, %arg6: memref<1x128xf32, #tpu.memory_space<vmem>>, %arg7: memref<128x1024xbf16, #tpu.memory_space<vmem>>, %arg8: memref<1x1024xf32, #tpu.memory_space<vmem>>, %arg9: memref<1x1x1024xf32, #tpu.memory_space<vmem>>) attributes {dimension_semantics = [#tpu.dimension_semantics<parallel>, #tpu.dimension_semantics<arbitrary>], iteration_bounds = array<i64: 2, 1>, scalar_prefetch = 0 : i64, scratch_operands = 0 : i64, tpu.core_type = #tpu.core_type<tc>, window_params = [{transform_indices = @transform_0, window_bounds = array<i64: 1, 16, 3>}, {transform_indices = @transform_1, window_bounds = array<i64: 1, 3, 64>}, {pipeline_mode = #tpu.pipeline_mode<synchronous>, transform_indices = @transform_2, window_bounds = array<i64: 1, 64>}, {pipeline_mode = #tpu.pipeline_mode<synchronous>, transform_indices = @transform_3, window_bounds = array<i64: 64, 128>}, {pipeline_mode = #tpu.pipeline_mode<synchronous>, transform_indices = @transform_4, window_bounds = array<i64: 1, 128>}, {pipeline_mode = #tpu.pipeline_mode<synchronous>, transform_indices = @transform_5, window_bounds = array<i64: 128, 1024>}, {pipeline_mode = #tpu.pipeline_mode<synchronous>, transform_indices = @transform_6, window_bounds = array<i64: 1, 1024>}, {transform_indices = @transform_7, window_bounds = array<i64: 1, 1, 1024>}]} {
    %c0_i32 = arith.constant 0 : i32
    %0 = arith.cmpi eq, %arg1, %c0_i32 : i32
    %1 = arith.extui %0 : i1 to i32
    %c0_i32_0 = arith.constant 0 : i32
    %2 = arith.cmpi ne, %1, %c0_i32_0 : i32
    scf.if %2 {
      %cst_26 = arith.constant 0xFF800000 : f32
      %51 = vector.broadcast %cst_26 : f32 to vector<1x1x1024xf32>
      %c0_27 = arith.constant 0 : index
      %c0_28 = arith.constant 0 : index
      %c0_29 = arith.constant 0 : index
      %52 = vector.load %arg9[%c0_27, %c0_28, %c0_29] : memref<1x1x1024xf32, #tpu.memory_space<vmem>>, vector<1x1x1024xf32>
      tpu.vector_store %arg9[%c0_27, %c0_28, %c0_29], %51 {strides = array<i32>} : memref<1x1x1024xf32, #tpu.memory_space<vmem>>, vector<1x1x1024xf32>,
    } else {
    }
    %c0 = arith.constant 0 : index
    %c0_1 = arith.constant 0 : index
    %c0_2 = arith.constant 0 : index
    %3 = vector.load %arg2[%c0, %c0_1, %c0_2] : memref<1x16x3xf32, #tpu.memory_space<vmem>>, vector<1x16x3xf32>
    %4 = vector.shape_cast %3 : vector<1x16x3xf32> to vector<16x3xf32>
    %c0_3 = arith.constant 0 : index
    %c0_4 = arith.constant 0 : index
    %c0_5 = arith.constant 0 : index
    %5 = vector.load %arg3[%c0_3, %c0_4, %c0_5] : memref<1x3x64xf32, #tpu.memory_space<vmem>>, vector<1x3x64xf32>
    %6 = vector.shape_cast %5 : vector<1x3x64xf32> to vector<3x64xf32>
    %7 = vector.extract_strided_slice %4 {offsets = [0, 0], sizes = [16, 1], strides = [1, 1]} : vector<16x3xf32> to vector<16x1xf32>
    %8 = vector.extract_strided_slice %6 {offsets = [0, 0], sizes = [1, 64], strides = [1, 1]} : vector<3x64xf32> to vector<1x64xf32>
    %9 = vector.broadcast %7 : vector<16x1xf32> to vector<16x64xf32>
    %10 = vector.broadcast %8 : vector<1x64xf32> to vector<16x64xf32>
    %11 = arith.mulf %9, %10 : vector<16x64xf32>
    %12 = vector.extract_strided_slice %4 {offsets = [0, 1], sizes = [16, 1], strides = [1, 1]} : vector<16x3xf32> to vector<16x1xf32>
    %13 = vector.extract_strided_slice %6 {offsets = [1, 0], sizes = [1, 64], strides = [1, 1]} : vector<3x64xf32> to vector<1x64xf32>
    %14 = vector.broadcast %12 : vector<16x1xf32> to vector<16x64xf32>
    %15 = vector.broadcast %13 : vector<1x64xf32> to vector<16x64xf32>
    %16 = arith.mulf %14, %15 : vector<16x64xf32>
    %17 = arith.addf %11, %16 : vector<16x64xf32>
    %18 = vector.extract_strided_slice %4 {offsets = [0, 2], sizes = [16, 1], strides = [1, 1]} : vector<16x3xf32> to vector<16x1xf32>
    %19 = vector.extract_strided_slice %6 {offsets = [2, 0], sizes = [1, 64], strides = [1, 1]} : vector<3x64xf32> to vector<1x64xf32>
    %20 = vector.broadcast %18 : vector<16x1xf32> to vector<16x64xf32>
    %21 = vector.broadcast %19 : vector<1x64xf32> to vector<16x64xf32>
    %22 = arith.mulf %20, %21 : vector<16x64xf32>
    %23 = arith.addf %17, %22 : vector<16x64xf32>
    %c0_6 = arith.constant 0 : index
    %c0_7 = arith.constant 0 : index
    %24 = vector.load %arg4[%c0_6, %c0_7] : memref<1x64xf32, #tpu.memory_space<vmem>>, vector<1x64xf32>
    %25 = vector.broadcast %24 : vector<1x64xf32> to vector<16x64xf32>
    %26 = arith.addf %23, %25 : vector<16x64xf32>
    %cst = arith.constant 0.000000e+00 : f32
    %27 = vector.broadcast %cst : f32 to vector<16x64xf32>
    %28 = arith.maximumf %26, %27 : vector<16x64xf32>
    %29 = arith.truncf %28 : vector<16x64xf32> to vector<16x64xbf16>
    %c0_8 = arith.constant 0 : index
    %c0_9 = arith.constant 0 : index
    %30 = vector.load %arg5[%c0_8, %c0_9] : memref<64x128xbf16, #tpu.memory_space<vmem>>, vector<64x128xbf16>
    %cst_10 = arith.constant dense<0.000000e+00> : vector<16x128xf32>
    %31 = tpu.matmul %29, %30, %cst_10 {dimension_numbers = #tpu.dot_dimension_numbers<[1], [0], [0], [1], [0, 0, 1, 1], [], []>} : vector<16x64xbf16>, vector<64x128xbf16>, vector<16x128xf32> -> vector<16x128xf32>
    %c0_11 = arith.constant 0 : index
    %c0_12 = arith.constant 0 : index
    %32 = vector.load %arg6[%c0_11, %c0_12] : memref<1x128xf32, #tpu.memory_space<vmem>>, vector<1x128xf32>
    %33 = vector.broadcast %32 : vector<1x128xf32> to vector<16x128xf32>
    %34 = arith.addf %31, %33 : vector<16x128xf32>
    %cst_13 = arith.constant 0.000000e+00 : f32
    %35 = vector.broadcast %cst_13 : f32 to vector<16x128xf32>
    %36 = arith.maximumf %34, %35 : vector<16x128xf32>
    %37 = arith.truncf %36 : vector<16x128xf32> to vector<16x128xbf16>
    %c0_14 = arith.constant 0 : index
    %c0_15 = arith.constant 0 : index
    %38 = vector.load %arg7[%c0_14, %c0_15] : memref<128x1024xbf16, #tpu.memory_space<vmem>>, vector<128x1024xbf16>
    %cst_16 = arith.constant dense<0.000000e+00> : vector<16x1024xf32>
    %39 = tpu.matmul %37, %38, %cst_16 {dimension_numbers = #tpu.dot_dimension_numbers<[1], [0], [0], [1], [0, 0, 1, 1], [], []>} : vector<16x128xbf16>, vector<128x1024xbf16>, vector<16x1024xf32> -> vector<16x1024xf32>
    %c0_17 = arith.constant 0 : index
    %c0_18 = arith.constant 0 : index
    %c0_19 = arith.constant 0 : index
    %40 = vector.load %arg9[%c0_17, %c0_18, %c0_19] : memref<1x1x1024xf32, #tpu.memory_space<vmem>>, vector<1x1x1024xf32>
    %41 = vector.shape_cast %40 : vector<1x1x1024xf32> to vector<1x1024xf32>
    %cst_20 = arith.constant dense<0xFF800000> : vector<1024xf32>
    %42 = vector.multi_reduction <maximumf>, %39, %cst_20 [0] : vector<16x1024xf32> to vector<1024xf32>
    %43 = vector.shape_cast %42 : vector<1024xf32> to vector<1x1024xf32>
    %44 = arith.maximumf %41, %43 : vector<1x1024xf32>
    %c0_21 = arith.constant 0 : index
    %c0_22 = arith.constant 0 : index
    %c0_23 = arith.constant 0 : index
    %45 = vector.load %arg9[%c0_21, %c0_22, %c0_23] : memref<1x1x1024xf32, #tpu.memory_space<vmem>>, vector<1x1x1024xf32>
    %46 = vector.shape_cast %45 : vector<1x1x1024xf32> to vector<1x1024xf32>
    %47 = vector.shape_cast %44 : vector<1x1024xf32> to vector<1x1x1024xf32>
    tpu.vector_store %arg9[%c0_21, %c0_22, %c0_23], %47 {strides = array<i32>} : memref<1x1x1024xf32, #tpu.memory_space<vmem>>, vector<1x1x1024xf32>,
    %c0_i32_24 = arith.constant 0 : i32
    %48 = arith.cmpi eq, %arg1, %c0_i32_24 : i32
    %49 = arith.extui %48 : i1 to i32
    %c0_i32_25 = arith.constant 0 : i32
    %50 = arith.cmpi ne, %49, %c0_i32_25 : i32
    scf.if %50 {
      %c0_26 = arith.constant 0 : index
      %c0_27 = arith.constant 0 : index
      %c0_28 = arith.constant 0 : index
      %51 = vector.load %arg9[%c0_26, %c0_27, %c0_28] : memref<1x1x1024xf32, #tpu.memory_space<vmem>>, vector<1x1x1024xf32>
      %52 = vector.shape_cast %51 : vector<1x1x1024xf32> to vector<1x1024xf32>
      %c0_29 = arith.constant 0 : index
      %c0_30 = arith.constant 0 : index
      %53 = vector.load %arg8[%c0_29, %c0_30] : memref<1x1024xf32, #tpu.memory_space<vmem>>, vector<1x1024xf32>
      %54 = arith.addf %52, %53 : vector<1x1024xf32>
      %c0_31 = arith.constant 0 : index
      %c0_32 = arith.constant 0 : index
      %c0_33 = arith.constant 0 : index
      %55 = vector.load %arg9[%c0_31, %c0_32, %c0_33] : memref<1x1x1024xf32, #tpu.memory_space<vmem>>, vector<1x1x1024xf32>
      %56 = vector.shape_cast %55 : vector<1x1x1024xf32> to vector<1x1024xf32>
      %57 = vector.shape_cast %54 : vector<1x1024xf32> to vector<1x1x1024xf32>
      tpu.vector_store %arg9[%c0_31, %c0_32, %c0_33], %57 {strides = array<i32>} : memref<1x1x1024xf32, #tpu.memory_space<vmem>>, vector<1x1x1024xf32>,
    } else {
    }
    return
  }
  func.func @transform_0(%arg0: i32, %arg1: i32) -> (i32, i32, i32) {
    %c0_i32 = arith.constant 0 : i32
    %c0_i32_0 = arith.constant 0 : i32
    return %arg0, %arg1, %c0_i32 : i32, i32, i32
  }
  func.func @transform_1(%arg0: i32, %arg1: i32) -> (i32, i32, i32) {
    %c0_i32 = arith.constant 0 : i32
    %c0_i32_0 = arith.constant 0 : i32
    %c0_i32_1 = arith.constant 0 : i32
    return %arg0, %c0_i32, %c0_i32_0 : i32, i32, i32
  }
  func.func @transform_2(%arg0: i32, %arg1: i32) -> (i32, i32) {
    %c0_i32 = arith.constant 0 : i32
    %c0_i32_0 = arith.constant 0 : i32
    %c0_i32_1 = arith.constant 0 : i32
    return %c0_i32, %c0_i32_0 : i32, i32
  }
  func.func @transform_3(%arg0: i32, %arg1: i32) -> (i32, i32) {
    %c0_i32 = arith.constant 0 : i32
    %c0_i32_0 = arith.constant 0 : i32
    %c0_i32_1 = arith.constant 0 : i32
    return %c0_i32, %c0_i32_0 : i32, i32
  }
  func.func @transform_4(%arg0: i32, %arg1: i32) -> (i32, i32) {
    %c0_i32 = arith.constant 0 : i32
    %c0_i32_0 = arith.constant 0 : i32
    %c0_i32_1 = arith.constant 0 : i32
    return %c0_i32, %c0_i32_0 : i32, i32
  }
  func.func @transform_5(%arg0: i32, %arg1: i32) -> (i32, i32) {
    %c0_i32 = arith.constant 0 : i32
    %c0_i32_0 = arith.constant 0 : i32
    %c0_i32_1 = arith.constant 0 : i32
    return %c0_i32, %c0_i32_0 : i32, i32
  }
  func.func @transform_6(%arg0: i32, %arg1: i32) -> (i32, i32) {
    %c0_i32 = arith.constant 0 : i32
    %c0_i32_0 = arith.constant 0 : i32
    %c0_i32_1 = arith.constant 0 : i32
    return %c0_i32, %c0_i32_0 : i32, i32
  }
  func.func @transform_7(%arg0: i32, %arg1: i32) -> (i32, i32, i32) {
    %c0_i32 = arith.constant 0 : i32
    %c0_i32_0 = arith.constant 0 : i32
    %c0_i32_1 = arith.constant 0 : i32
    return %arg0, %c0_i32, %c0_i32_0 : i32, i32, i32
  }
}

module attributes {stable_mosaic.version = 11 : i64} {
  func.func @_fc_head_kernel(%arg0: i32, %arg1: memref<8x1024xf32, #tpu.memory_space<vmem>>, %arg2: memref<1024x512xbf16, #tpu.memory_space<vmem>>, %arg3: memref<1x512xf32, #tpu.memory_space<vmem>>, %arg4: memref<512x256xbf16, #tpu.memory_space<vmem>>, %arg5: memref<1x256xf32, #tpu.memory_space<vmem>>, %arg6: memref<256x2xbf16, #tpu.memory_space<vmem>>, %arg7: memref<1x2xf32, #tpu.memory_space<vmem>>, %arg8: memref<8x2xf32, #tpu.memory_space<vmem>>) attributes {dimension_semantics = [#tpu.dimension_semantics<parallel>], iteration_bounds = array<i64: 1>, scalar_prefetch = 0 : i64, scratch_operands = 0 : i64, tpu.core_type = #tpu.core_type<tc>, window_params = [{transform_indices = @transform_0, window_bounds = array<i64: 8, 1024>}, {pipeline_mode = #tpu.pipeline_mode<synchronous>, transform_indices = @transform_1, window_bounds = array<i64: 1024, 512>}, {pipeline_mode = #tpu.pipeline_mode<synchronous>, transform_indices = @transform_2, window_bounds = array<i64: 1, 512>}, {pipeline_mode = #tpu.pipeline_mode<synchronous>, transform_indices = @transform_3, window_bounds = array<i64: 512, 256>}, {pipeline_mode = #tpu.pipeline_mode<synchronous>, transform_indices = @transform_4, window_bounds = array<i64: 1, 256>}, {pipeline_mode = #tpu.pipeline_mode<synchronous>, transform_indices = @transform_5, window_bounds = array<i64: 256, 2>}, {pipeline_mode = #tpu.pipeline_mode<synchronous>, transform_indices = @transform_6, window_bounds = array<i64: 1, 2>}, {transform_indices = @transform_7, window_bounds = array<i64: 8, 2>}]} {
    %c0 = arith.constant 0 : index
    %c0_0 = arith.constant 0 : index
    %0 = vector.load %arg1[%c0, %c0_0] : memref<8x1024xf32, #tpu.memory_space<vmem>>, vector<8x1024xf32>
    %1 = arith.truncf %0 : vector<8x1024xf32> to vector<8x1024xbf16>
    %c0_1 = arith.constant 0 : index
    %c0_2 = arith.constant 0 : index
    %2 = vector.load %arg2[%c0_1, %c0_2] : memref<1024x512xbf16, #tpu.memory_space<vmem>>, vector<1024x512xbf16>
    %cst = arith.constant dense<0.000000e+00> : vector<8x512xf32>
    %3 = tpu.matmul %1, %2, %cst {dimension_numbers = #tpu.dot_dimension_numbers<[1], [0], [0], [1], [0, 0, 1, 1], [], []>} : vector<8x1024xbf16>, vector<1024x512xbf16>, vector<8x512xf32> -> vector<8x512xf32>
    %c0_3 = arith.constant 0 : index
    %c0_4 = arith.constant 0 : index
    %4 = vector.load %arg3[%c0_3, %c0_4] : memref<1x512xf32, #tpu.memory_space<vmem>>, vector<1x512xf32>
    %5 = vector.broadcast %4 : vector<1x512xf32> to vector<8x512xf32>
    %6 = arith.addf %3, %5 : vector<8x512xf32>
    %cst_5 = arith.constant 0.000000e+00 : f32
    %7 = vector.broadcast %cst_5 : f32 to vector<8x512xf32>
    %8 = arith.maximumf %6, %7 : vector<8x512xf32>
    %9 = arith.truncf %8 : vector<8x512xf32> to vector<8x512xbf16>
    %c0_6 = arith.constant 0 : index
    %c0_7 = arith.constant 0 : index
    %10 = vector.load %arg4[%c0_6, %c0_7] : memref<512x256xbf16, #tpu.memory_space<vmem>>, vector<512x256xbf16>
    %cst_8 = arith.constant dense<0.000000e+00> : vector<8x256xf32>
    %11 = tpu.matmul %9, %10, %cst_8 {dimension_numbers = #tpu.dot_dimension_numbers<[1], [0], [0], [1], [0, 0, 1, 1], [], []>} : vector<8x512xbf16>, vector<512x256xbf16>, vector<8x256xf32> -> vector<8x256xf32>
    %c0_9 = arith.constant 0 : index
    %c0_10 = arith.constant 0 : index
    %12 = vector.load %arg5[%c0_9, %c0_10] : memref<1x256xf32, #tpu.memory_space<vmem>>, vector<1x256xf32>
    %13 = vector.broadcast %12 : vector<1x256xf32> to vector<8x256xf32>
    %14 = arith.addf %11, %13 : vector<8x256xf32>
    %cst_11 = arith.constant 0.000000e+00 : f32
    %15 = vector.broadcast %cst_11 : f32 to vector<8x256xf32>
    %16 = arith.maximumf %14, %15 : vector<8x256xf32>
    %17 = arith.truncf %16 : vector<8x256xf32> to vector<8x256xbf16>
    %c0_12 = arith.constant 0 : index
    %c0_13 = arith.constant 0 : index
    %18 = vector.load %arg6[%c0_12, %c0_13] : memref<256x2xbf16, #tpu.memory_space<vmem>>, vector<256x2xbf16>
    %cst_14 = arith.constant dense<0.000000e+00> : vector<8x2xf32>
    %19 = tpu.matmul %17, %18, %cst_14 {dimension_numbers = #tpu.dot_dimension_numbers<[1], [0], [0], [1], [0, 0, 1, 1], [], []>} : vector<8x256xbf16>, vector<256x2xbf16>, vector<8x2xf32> -> vector<8x2xf32>
    %c0_15 = arith.constant 0 : index
    %c0_16 = arith.constant 0 : index
    %20 = vector.load %arg7[%c0_15, %c0_16] : memref<1x2xf32, #tpu.memory_space<vmem>>, vector<1x2xf32>
    %21 = vector.broadcast %20 : vector<1x2xf32> to vector<8x2xf32>
    %22 = arith.addf %19, %21 : vector<8x2xf32>
    %cst_17 = arith.constant dense<0xFF800000> : vector<8xf32>
    %23 = vector.multi_reduction <maximumf>, %22, %cst_17 [1] : vector<8x2xf32> to vector<8xf32>
    %24 = vector.shape_cast %23 : vector<8xf32> to vector<8x1xf32>
    %25 = vector.broadcast %24 : vector<8x1xf32> to vector<8x2xf32>
    %26 = arith.subf %22, %25 : vector<8x2xf32>
    %27 = math.exp %26 : vector<8x2xf32>
    %cst_18 = arith.constant dense<0.000000e+00> : vector<8xf32>
    %28 = vector.multi_reduction <add>, %27, %cst_18 [1] : vector<8x2xf32> to vector<8xf32>
    %29 = vector.shape_cast %28 : vector<8xf32> to vector<8x1xf32>
    %30 = math.log %29 : vector<8x1xf32>
    %31 = vector.broadcast %30 : vector<8x1xf32> to vector<8x2xf32>
    %32 = arith.subf %26, %31 : vector<8x2xf32>
    %c0_19 = arith.constant 0 : index
    %c0_20 = arith.constant 0 : index
    %33 = vector.load %arg8[%c0_19, %c0_20] : memref<8x2xf32, #tpu.memory_space<vmem>>, vector<8x2xf32>
    tpu.vector_store %arg8[%c0_19, %c0_20], %32 {strides = array<i32>} : memref<8x2xf32, #tpu.memory_space<vmem>>, vector<8x2xf32>,
    return
  }
  func.func @transform_0(%arg0: i32) -> (i32, i32) {
    %c0_i32 = arith.constant 0 : i32
    %c0_i32_0 = arith.constant 0 : i32
    return %arg0, %c0_i32 : i32, i32
  }
  func.func @transform_1(%arg0: i32) -> (i32, i32) {
    %c0_i32 = arith.constant 0 : i32
    %c0_i32_0 = arith.constant 0 : i32
    %c0_i32_1 = arith.constant 0 : i32
    return %c0_i32, %c0_i32_0 : i32, i32
  }
  func.func @transform_2(%arg0: i32) -> (i32, i32) {
    %c0_i32 = arith.constant 0 : i32
    %c0_i32_0 = arith.constant 0 : i32
    %c0_i32_1 = arith.constant 0 : i32
    return %c0_i32, %c0_i32_0 : i32, i32
  }
  func.func @transform_3(%arg0: i32) -> (i32, i32) {
    %c0_i32 = arith.constant 0 : i32
    %c0_i32_0 = arith.constant 0 : i32
    %c0_i32_1 = arith.constant 0 : i32
    return %c0_i32, %c0_i32_0 : i32, i32
  }
  func.func @transform_4(%arg0: i32) -> (i32, i32) {
    %c0_i32 = arith.constant 0 : i32
    %c0_i32_0 = arith.constant 0 : i32
    %c0_i32_1 = arith.constant 0 : i32
    return %c0_i32, %c0_i32_0 : i32, i32
  }
  func.func @transform_5(%arg0: i32) -> (i32, i32) {
    %c0_i32 = arith.constant 0 : i32
    %c0_i32_0 = arith.constant 0 : i32
    %c0_i32_1 = arith.constant 0 : i32
    return %c0_i32, %c0_i32_0 : i32, i32
  }
  func.func @transform_6(%arg0: i32) -> (i32, i32) {
    %c0_i32 = arith.constant 0 : i32
    %c0_i32_0 = arith.constant 0 : i32
    %c0_i32_1 = arith.constant 0 : i32
    return %c0_i32, %c0_i32_0 : i32, i32
  }
  func.func @transform_7(%arg0: i32) -> (i32, i32) {
    %c0_i32 = arith.constant 0 : i32
    %c0_i32_0 = arith.constant 0 : i32
    return %arg0, %c0_i32 : i32, i32
  }
}

</mosaic_0001>

<bundles_post_ra>
// kernel: pointnet_cls_forward.4
= control target key start
LH: loop header
LB: loop body
LE: loop exit
PB: predicated region body
PF: predicated region fallthrough
CT: control target
= control target key end

     0   :  { %s1417_s24 = smov 0   ;;  %s1419_s25 = smov 0   ;;  %s1698_s0 = inlined_call_operand.vmem [shape: f32[2,16,3], index: 0, kind: input, shape index: {}]   ;;  %s1699_s1 = inlined_call_operand.vmem [shape: f32[1,3,64], index: 1, kind: input, shape index: {}]   ;;  %s1700_s2 = inlined_call_operand.vmem [shape: f32[1,64], index: 2, kind: input, shape index: {}]   ;;  %s1701_s3 = inlined_call_operand.vmem [shape: bf16[64,128], index: 3, kind: input, shape index: {}]   ;;  %s1702_s4 = inlined_call_operand.vmem [shape: f32[1,128], index: 4, kind: input, shape index: {}]   ;;  %s1703_s5 = inlined_call_operand.vmem [shape: bf16[128,1024], index: 5, kind: input, shape index: {}]   ;;  %s1704_s6 = inlined_call_operand.vmem [shape: f32[1,1024], index: 6, kind: input, shape index: {}]   ;;  %s1705_s7 = inlined_call_operand.vmem [shape: f32[2,1,1024], index: 7, kind: output, shape index: {}]  }
   0x1   :  { %s1421_s26 = smov 0  }
   0x2 LB: > { %s29_s27 = sadd.s32 1, %s1365_s25  ;;  %p1213_p0 = scmp.ge.s32.totalorder %s1369_s26, 1  ;;  %s1369_s26 = sphi %s1421_s26, %s17_s26   ;;  %s1365_s25 = sphi %s1419_s25, %s1707_s25   ;;  %s1361_s24 = sphi %s1417_s24, %s1706_s24  }
   0x3   : > { %p31_p1 = scmp.ge.s32.totalorder %s29_s27, 2  ;;  %p256_p2 = scmp.lt.s32.totalorder %s1369_s26, 3 }
   0x5   : > { %s1709_s27 = smov (%p31_p1, %s29_s27), 0  ;;  %p257_p3 = pnand %p1213_p0, %p256_p2 }
   0x6   : > { %p292_p4 = scmp.lt.s32.totalorder (!%p257_p3), %s1361_s24, 1 }
   0x7   : > { %260 = sbr.rel (%p257_p3) target bundleno = 622 (0x26e), region = 48 }
   0xc   : > { %v1371_v0 = vmov 1   ;;  %v1372_v1 = vmov 0   ;;  %s1711_s24 = smov (!%p292_p4, %s1361_s24), 1  ;;  %v1343_v2 = vld [vmem:[%s1701_s3 + $0x18] sm:$0xff]   ;;  %v1373_v4 = vmov 0.0   ;;  %v1344_v6 = vld [vmem:[%s1701_s3 + $0x10] sm:$0xff]   ;;  %v324_v38 = vlaneseq }
   0xd   : > { %1340 = vset.pattern.permute.xlu1 %v1371_v0  ;;  %1339 = vset.pattern.permute.xlu0 %v1372_v1  ;;  %s1290_s28 = sshll.u32 %s1711_s24, 4  ;;  %v1345_v7 = vld [vmem:[%s1701_s3 + $0x8] sm:$0xff]   ;;  %v1374_v8 = vmov 2   ;;  %v1346_v9 = vld [vmem:[%s1701_s3] sm:$0xff]   ;;  %vm1375_vm0 = vmmov 0   ;;  %vm413_vm1 = vcmask 523264  }
   0xe   : > { %877 = vmatprep.mubr.bf16.mxu1 %v1372_v1  ;;  %s299_s8 = scalar_lea.vmem %s1698_s0, %s1290_s28  ;;  %1296 = vmatprep.subr.bf16.mxu0 %v1373_v4  ;;  %v517_v10 = vld [vmem:[%s1703_s5 + $0x1c0] sm:$0xff]  ;;  %v1464_v12 = vld [vmem:[%s1703_s5 + $0x1c8] sm:$0xff]  ;;  %v1505_v39 = vshrl.u32 %v324_v38, 7  ;;  %s1216_s20 = sshll.u32 %s1711_s24, 3 }
   0xf   : > { %v311_v3 = vld [vmem:[%s299_s8] sm:$0xff]  ;;  %v312_v5 = vld [vmem:[%s299_s8 + $0x8] sm:$0xff]  ;;  %1297 = vmatpush3.bf16.msra.mxu0 %v1343_v2  ;;  %1304 = vmatprep.mubr.msk.bf16.mxu0 %vm1375_vm0, %v1373_v4  ;;  %s304_s23 = scalar_lea.vmem %s1705_s7, %s1216_s20 }
  0x10   : > { %331 = vperm.xlu1 %1340, %v311_v3   ;;  %316 = vperm.xlu0 %1339, %v311_v3   ;;  %v521_v11 = vld [vmem:[%s1703_s5 + $0x1e0] sm:$0xff]  ;;  %v1469_v14 = vld [vmem:[%s1703_s5 + $0x1e8] sm:$0xff]  ;;  %v340_v40 = vsub.s32 1, %v1505_v39  ;;  %v326_v41 = vsub.s32 0, %v1505_v39  ;;  %v356_v45 = vsub.s32 2, %v1505_v39 }
  0x11   : > { %1298 = vmatprep.subr.bf16.mxu0 %v1373_v4  ;;  %v1281_v13 = vcombine.high %v517_v10, %v521_v11  ;;  %v1280_v15 = vcombine.low %v517_v10, %v521_v11  ;;  %v509_v16 = vld [vmem:[%s1703_s5 + $0x180] sm:$0xff]  ;;  %v1282_v18 = vcombine.low %v1464_v12, %v1469_v14  ;;  %v1283_v19 = vcombine.high %v1464_v12, %v1469_v14  ;;  %v506_v10 = vld [vmem:[%s1703_s5 + $0x168] sm:$0xff] }
  0x12   : > { %v513_v17 = vld [vmem:[%s1703_s5 + $0x1a0] sm:$0xff]  ;;  %v486_v12 = vld [vmem:[%s1703_s5 + $0xc8] sm:$0xff] }
  0x13   : > { %1299 = vmatpush3.bf16.msra.mxu0 %v1344_v6  ;;  %v1273_v20 = vcombine.high %v509_v16, %v513_v17  ;;  %845 = vmatprep.subr.bf16.mxu1 %v1281_v13  ;;  %v1272_v21 = vcombine.low %v509_v16, %v513_v17  ;;  %v501_v22 = vld [vmem:[%s1703_s5 + $0x140] sm:$0xff]  ;;  %v498_v16 = vld [vmem:[%s1703_s5 + $0x128] sm:$0xff] }
  0x14   : > { %335 = vperm.xlu1 %1340, %v312_v5   ;;  %321 = vperm.xlu0 %1339, %v312_v5   ;;  %v505_v23 = vld [vmem:[%s1703_s5 + $0x160] sm:$0xff]  ;;  %v490_v14 = vld [vmem:[%s1703_s5 + $0xe8] sm:$0xff] }
  0x15   : > { %1300 = vmatprep.subr.bf16.mxu0 %v1373_v4  ;;  %846 = vmatpush1.bf16.msra.mxu1 %v1280_v15  ;;  %v1265_v24 = vcombine.high %v501_v22, %v505_v23  ;;  %v1264_v25 = vcombine.low %v501_v22, %v505_v23  ;;  %v493_v26 = vld [vmem:[%s1703_s5 + $0x100] sm:$0xff]  ;;  %v494_v15 = vld [vmem:[%s1703_s5 + $0x108] sm:$0xff]  ;;  %v1250_v23 = vcombine.low %v486_v12, %v490_v14 }
  0x16   : > { %847 = vmatprep.subr.bf16.mxu1 %v1273_v20  ;;  %v497_v27 = vld [vmem:[%s1703_s5 + $0x120] sm:$0xff]  ;;  %v1251_v20 = vcombine.high %v486_v12, %v490_v14  ;;  %v482_v22 = vld [vmem:[%s1703_s5 + $0xa8] sm:$0xff] }
  0x17   : > { %1301 = vmatpush3.bf16.msra.mxu0 %v1345_v7  ;;  %v1257_v28 = vcombine.high %v493_v26, %v497_v27  ;;  %v1256_v29 = vcombine.low %v493_v26, %v497_v27  ;;  %v485_v30 = vld [vmem:[%s1703_s5 + $0xc0] sm:$0xff]  ;;  %v466_v38 = vld [vmem:[%s1703_s5 + $0x28] sm:$0xff] }
  0x18   : > { %1342 = vset.pattern.permute.xlu1 %v1374_v8  ;;  %1341 = vset.pattern.permute.xlu0 %v1374_v8  ;;  %v489_v31 = vld [vmem:[%s1703_s5 + $0xe0] sm:$0xff] }
  0x19   : > { %351 = vperm.xlu1 %1342, %v312_v5   ;;  %347 = vperm.xlu0 %1341, %v311_v3   ;;  %v1249_v32 = vcombine.high %v485_v30, %v489_v31  ;;  %v1248_v33 = vcombine.low %v485_v30, %v489_v31  ;;  %v477_v34 = vld [vmem:[%s1703_s5 + $0x80] sm:$0xff]  ;;  %v510_v3 = vld [vmem:[%s1703_s5 + $0x188] sm:$0xff] }
  0x1a   : > { %1302 = vmatprep.subr.bf16.mxu0 %v1373_v4  ;;  %848 = vmatpush1.bf16.msra.mxu1 %v1272_v21  ;;  %v481_v35 = vld [vmem:[%s1703_s5 + $0xa0] sm:$0xff]  ;;  %v514_v4 = vld [vmem:[%s1703_s5 + $0x1a8] sm:$0xff] }
  0x1b   : > { %1303 = vmatpush3.bf16.msra.mxu0 %v1346_v9  ;;  %849 = vmatprep.subr.bf16.mxu1 %v1265_v24  ;;  %v1241_v36 = vcombine.high %v477_v34, %v481_v35  ;;  %v1240_v37 = vcombine.low %v477_v34, %v481_v35  ;;  %v313_v42 = vld [vmem:[%s1699_s1] sm:$0x7]  ;;  %v1275_v8 = vcombine.high %v510_v3, %v514_v4  ;;  %v502_v9 = vld [vmem:[%s1703_s5 + $0x148] sm:$0xff] }
  0x1c   : > { %888 = vmatprep.subr.bf16.mxu0 %v1283_v19  ;;  %v341_v46 = vrot.slane %v313_v42, %v340_v40  ;;  %v327_v47 = vrot.slane %v313_v42, %v326_v41  ;;  %v357_v50 = vrot.slane %v313_v42, %v356_v45  ;;  %v1217_v61 = vld [vmem:[%s1700_s2] ss:$0 sm:$0xff]  ;;  %v1274_v11 = vcombine.low %v510_v3, %v514_v4  ;;  %v478_v21 = vld [vmem:[%s1703_s5 + $0x88] sm:$0xff]  ;;  %v520_v45 = vld [vmem:[%s1703_s5 + $0x1d8] sm:$0xff] }
  0x1d   : > { %v1267_v13 = vcombine.high %v502_v9, %v506_v10  ;;  %v1266_v17 = vcombine.low %v502_v9, %v506_v10  ;;  %v1259_v19 = vcombine.high %v494_v15, %v498_v16  ;;  %v1243_v24 = vcombine.high %v478_v21, %v482_v22  ;;  %v469_v26 = vld [vmem:[%s1703_s5 + $0x40] sm:$0xff]  ;;  %v474_v30 = vld [vmem:[%s1703_s5 + $0x68] sm:$0xff]  ;;  %v503_v4 = vld [vmem:[%s1703_s5 + $0x150] sm:$0xff] }
  0x1e   : > { %850 = vmatpush1.bf16.msra.mxu1 %v1264_v25  ;;  %v1242_v25 = vcombine.low %v478_v21, %v482_v22  ;;  %v473_v27 = vld [vmem:[%s1703_s5 + $0x60] sm:$0xff]  ;;  %v491_v21 = vld [vmem:[%s1703_s5 + $0xf0] sm:$0xff]  ;;  %v492_v22 = vld [vmem:[%s1703_s5 + $0xf8] sm:$0xff] }
  0x1f   : > { %851 = vmatprep.subr.bf16.mxu1 %v1257_v28  ;;  %v470_v28 = vld [vmem:[%s1703_s5 + $0x48] sm:$0xff]  ;;  %v461_v34 = vld [vmem:[%s1703_s5] sm:$0xff] }
  0x20   : > { %v1234_v31 = vcombine.low %v470_v28, %v474_v30  ;;  %v465_v35 = vld [vmem:[%s1703_s5 + $0x20] sm:$0xff] }
  0x21   : > { %v1224_v42 = vcombine.low %v461_v34, %v465_v35 }
  0x22   : > { %852 = vmatpush1.bf16.msra.mxu1 %v1256_v29  ;;  %v1233_v29 = vcombine.high %v469_v26, %v473_v27 }
  0x23   : > { %853 = vmatprep.subr.bf16.mxu1 %v1249_v32  ;;  %v1235_v32 = vcombine.high %v470_v28, %v474_v30  ;;  %v483_v28 = vld [vmem:[%s1703_s5 + $0xb0] sm:$0xff]  ;;  %v484_v30 = vld [vmem:[%s1703_s5 + $0xb8] sm:$0xff] }
  0x26   : > { %854 = vmatpush1.bf16.msra.mxu1 %v1248_v33  ;;  %v1232_v33 = vcombine.low %v469_v26, %v473_v27  ;;  %v479_v27 = vld [vmem:[%s1703_s5 + $0x90] sm:$0xff] }
  0x27   : > { %855 = vmatprep.subr.bf16.mxu1 %v1241_v36  ;;  %v462_v36 = vld [vmem:[%s1703_s5 + $0x8] sm:$0xff] }
  0x28   : > { %v1226_v40 = vcombine.low %v462_v36, %v466_v38  ;;  %v1227_v41 = vcombine.high %v462_v36, %v466_v38  ;;  %v475_v36 = vld [vmem:[%s1703_s5 + $0x70] sm:$0xff]  ;;  %v476_v38 = vld [vmem:[%s1703_s5 + $0x78] sm:$0xff] }
  0x2a   : > { %856 = vmatpush1.bf16.msra.mxu1 %v1240_v37  ;;  %v1225_v37 = vcombine.high %v461_v34, %v465_v35  ;;  %v471_v35 = vld [vmem:[%s1703_s5 + $0x50] sm:$0xff] }
  0x2b   : > { %857 = vmatprep.subr.bf16.mxu1 %v1233_v29  ;;  %v480_v29 = vld [vmem:[%s1703_s5 + $0x98] sm:$0xff] }
  0x2c   : > { %v1247_v34 = vcombine.high %v480_v29, %v484_v30 }
  0x2e   : > { %858 = vmatpush1.bf16.msra.mxu1 %v1232_v33  ;;  %v1245_v33 = vcombine.high %v479_v27, %v483_v28 }
  0x2f   : > { %859 = vmatprep.subr.bf16.mxu1 %v1225_v37  ;;  %v472_v37 = vld [vmem:[%s1703_s5 + $0x58] sm:$0xff] }
  0x32   : > { %860 = vmatpush1.bf16.msra.mxu1 %v1224_v42  ;;  %v1237_v42 = vcombine.high %v471_v35, %v475_v36 }
  0x8b   : > { %v332_v43 = vpop.permute.xlu1 %331  ;;  %v317_v44 = vpop.permute.xlu0 %316 }
  0x8c   : > { %v342_v51 = vmul.f32 %v341_v46, %v332_v43  ;;  %v328_v52 = vmul.f32 %v327_v47, %v317_v44  ;;  %v519_v43 = vld [vmem:[%s1703_s5 + $0x1d0] sm:$0xff] }
  0x8d   : > { %v523_v44 = vld [vmem:[%s1703_s5 + $0x1f0] sm:$0xff] }
  0x8e   : > { %v344_v57 = vadd.f32 %v342_v51, %v328_v52  ;;  %v1218_v51 = vld [vmem:[%s1702_s4] ss:$0 sm:$0xff] }
  0x8f   : > { %v336_v48 = vpop.permute.xlu1 %335  ;;  %v322_v49 = vpop.permute.xlu0 %321 }
  0x90   : > { %v343_v53 = vmul.f32 %v341_v46, %v336_v48  ;;  %v329_v54 = vmul.f32 %v327_v47, %v322_v49  ;;  %v1285_v46 = vcombine.high %v519_v43, %v523_v44  ;;  %v524_v47 = vld [vmem:[%s1703_s5 + $0x1f8] sm:$0xff]  ;;  %v1284_v48 = vcombine.low %v519_v43, %v523_v44  ;;  %v463_v44 = vld [vmem:[%s1703_s5 + $0x10] sm:$0xff] }
  0x91   : > { %v1286_v49 = vcombine.low %v520_v45, %v524_v47  ;;  %v1239_v43 = vcombine.high %v472_v37, %v476_v38 }
  0x92   : > { %v345_v58 = vadd.f32 %v343_v53, %v329_v54  ;;  %931 = vmatprep.subr.bf16.mxu1 %v1285_v46  ;;  %v464_v46 = vld [vmem:[%s1703_s5 + $0x18] sm:$0xff] }
  0x94   : > { %v352_v55 = vpop.permute.xlu1 %351  ;;  %v348_v56 = vpop.permute.xlu0 %347 }
  0x95   : > { %v359_v59 = vmul.f32 %v357_v50, %v352_v55  ;;  %v358_v60 = vmul.f32 %v357_v50, %v348_v56  ;;  %v1287_v50 = vcombine.high %v520_v45, %v524_v47  ;;  %v467_v45 = vld [vmem:[%s1703_s5 + $0x30] sm:$0xff]  ;;  %v468_v47 = vld [vmem:[%s1703_s5 + $0x38] sm:$0xff] }
  0x97   : > { %v361_v62 = vadd.f32 %v359_v59, %v345_v58  ;;  %v360_v63 = vadd.f32 %v358_v60, %v344_v57  ;;  %v511_v57 = vld [vmem:[%s1703_s5 + $0x190] sm:$0xff]  ;;  %v512_v60 = vld [vmem:[%s1703_s5 + $0x198] sm:$0xff] }
  0x98   : > { %v515_v59 = vld [vmem:[%s1703_s5 + $0x1b0] sm:$0xff] }
  0x99   : > { %v370_v0 = vadd.f32 %v1217_v61, %v361_v62  ;;  %v369_v2 = vadd.f32 %v1217_v61, %v360_v63  ;;  %v516_v61 = vld [vmem:[%s1703_s5 + $0x1b8] sm:$0xff] }
  0x9a   : > { %v1279_v3 = vcombine.high %v512_v60, %v516_v61  ;;  %v1278_v9 = vcombine.low %v512_v60, %v516_v61 }
  0x9b   : > { %v372_v5 = vmax.f32 %v370_v0, 0.0  ;;  %v371_v6 = vmax.f32 %v369_v2, 0.0  ;;  %v1277_v2 = vcombine.high %v511_v57, %v515_v59 }
  0x9d   : > { %v373_v7 = vpack.c.bf16 %v372_v5, %v371_v6  ;;  %v507_v5 = vld [vmem:[%s1703_s5 + $0x170] sm:$0xff]  ;;  %v504_v6 = vld [vmem:[%s1703_s5 + $0x158] sm:$0xff] }
  0x9e   : > { %v1269_v10 = vcombine.high %v503_v4, %v507_v5 }
  0x9f   : > { %1305 = vmatmul.mubr.msk.bf16.vlgmr.msra.gmra.mxu0 %vm413_vm1, %v373_v7  ;;  %v508_v7 = vld [vmem:[%s1703_s5 + $0x178] sm:$0xff] }
  0xa0   : > { %889 = vmatpush1.bf16.msra.mxu0 %v1282_v18  ;;  %920 = vmatprep.mubr.bf16.mxu0 %v1372_v1  ;;  %v1258_v18 = vcombine.low %v494_v15, %v498_v16  ;;  %v499_v15 = vld [vmem:[%s1703_s5 + $0x130] sm:$0xff]  ;;  %v496_v16 = vld [vmem:[%s1703_s5 + $0x118] sm:$0xff]  ;;  %v1270_v12 = vcombine.low %v504_v6, %v508_v7 }
  0xa1   : > { %890 = vmatprep.subr.bf16.mxu0 %v1275_v8  ;;  %v1276_v8 = vcombine.low %v511_v57, %v515_v59 }
  0xa4   : > { %891 = vmatpush1.bf16.msra.mxu0 %v1274_v11  ;;  %v1271_v11 = vcombine.high %v504_v6, %v508_v7 }
  0xa5   : > { %892 = vmatprep.subr.bf16.mxu0 %v1267_v13  ;;  %v495_v13 = vld [vmem:[%s1703_s5 + $0x110] sm:$0xff] }
  0xa6   : > { %v1261_v14 = vcombine.high %v495_v13, %v499_v15 }
  0xa8   : > { %893 = vmatpush1.bf16.msra.mxu0 %v1266_v17  ;;  %v500_v17 = vld [vmem:[%s1703_s5 + $0x138] sm:$0xff] }
  0xa9   : > { %894 = vmatprep.subr.bf16.mxu0 %v1259_v19  ;;  %v1268_v19 = vcombine.low %v503_v4, %v507_v5 }
  0xac   : > { %895 = vmatpush1.bf16.msra.mxu0 %v1258_v18  ;;  %v1263_v18 = vcombine.high %v496_v16, %v500_v17 }
  0xad   : > { %896 = vmatprep.subr.bf16.mxu0 %v1251_v20  ;;  %v487_v20 = vld [vmem:[%s1703_s5 + $0xd0] sm:$0xff] }
  0xb0   : > { %897 = vmatpush1.bf16.msra.mxu0 %v1250_v23  ;;  %v1260_v23 = vcombine.low %v495_v13, %v499_v15 }
  0xb1   : > { %898 = vmatprep.subr.bf16.mxu0 %v1243_v24  ;;  %v1262_v24 = vcombine.low %v496_v16, %v500_v17 }
  0xb4   : > { %899 = vmatpush1.bf16.msra.mxu0 %v1242_v25  ;;  %v1253_v25 = vcombine.high %v487_v20, %v491_v21 }
  0xb5   : > { %900 = vmatprep.subr.bf16.mxu0 %v1235_v32 }
  0xb8   : > { %901 = vmatpush1.bf16.msra.mxu0 %v1234_v31  ;;  %v1252_v31 = vcombine.low %v487_v20, %v491_v21 }
  0xb9   : > { %902 = vmatprep.subr.bf16.mxu0 %v1227_v41  ;;  %v1246_v41 = vcombine.low %v480_v29, %v484_v30 }
  0xbc   : > { %903 = vmatpush1.bf16.msra.mxu0 %v1226_v40  ;;  %v1244_v40 = vcombine.low %v479_v27, %v483_v28 }
  0xbd   : > { %974 = vmatprep.subr.bf16.mxu0 %v1287_v50  ;;  %v1229_v50 = vcombine.high %v463_v44, %v467_v45 }
 0x15f   : > { %v451_v52 = vpop.f32.mrf.mxu0 }
 0x160   : > { %v452_v54 = vadd.f32 %v1218_v51, %v451_v52  ;;  %v1228_v52 = vcombine.low %v463_v44, %v467_v45 }
 0x161   : > { %v1306_v53 = vpop.f32.mrf.mxu0 }
 0x162   : > { %v458_v62 = vmax.f32 %v452_v54, 0.0  ;;  %v1230_v53 = vcombine.low %v464_v46, %v468_v47 }
 0x163   : > { %v454_v55 = vpop.f32.mrf.mxu0 }
 0x164   : > { %v455_v56 = vadd.f32 %v1218_v51, %v454_v55  ;;  %v1231_v51 = vcombine.high %v464_v46, %v468_v47 }
 0x165   : > { %v1307_v58 = vpop.f32.mrf.mxu0 }
 0x166   : > { %v459_v63 = vmax.f32 %v455_v56, 0.0 }
 0x168   : > { %v1601_v0 = vpack.c.bf16 %v459_v63, %v458_v62 }
 0x16a   : > { %878 = vmatmul.mubr.bf16.vlgmr.msra.gmra.mxu1 %v1601_v0  ;;  %921 = vmatmul.mubr.bf16.vlgmr.msra.gmra.mxu0 %v1601_v0 }
 0x16b   : > { %932 = vmatpush1.bf16.msra.mxu1 %v1284_v48  ;;  %975 = vmatpush1.bf16.msra.mxu0 %v1286_v49  ;;  %v1236_v48 = vcombine.low %v471_v35, %v475_v36  ;;  %v1238_v49 = vcombine.low %v472_v37, %v476_v38 }
 0x16c   : > { %933 = vmatprep.subr.bf16.mxu1 %v1277_v2  ;;  %976 = vmatprep.subr.bf16.mxu0 %v1279_v3 }
 0x16d   : > { %963 = vmatprep.mubr.bf16.mxu1 %v1372_v1  ;;  %1006 = vmatprep.mubr.bf16.mxu0 %v1372_v1  ;;  %v488_v1 = vld [vmem:[%s1703_s5 + $0xd8] sm:$0xff] }
 0x16e   : > { %v1255_v26 = vcombine.high %v488_v1, %v492_v22  ;;  %v1254_v32 = vcombine.low %v488_v1, %v492_v22 }
 0x16f   : > { %934 = vmatpush1.bf16.msra.mxu1 %v1276_v8  ;;  %977 = vmatpush1.bf16.msra.mxu0 %v1278_v9 }
 0x170   : > { %935 = vmatprep.subr.bf16.mxu1 %v1269_v10  ;;  %978 = vmatprep.subr.bf16.mxu0 %v1271_v11 }
 0x173   : > { %936 = vmatpush1.bf16.msra.mxu1 %v1268_v19  ;;  %979 = vmatpush1.bf16.msra.mxu0 %v1270_v12 }
 0x174   : > { %937 = vmatprep.subr.bf16.mxu1 %v1261_v14  ;;  %980 = vmatprep.subr.bf16.mxu0 %v1263_v18 }
 0x177   : > { %938 = vmatpush1.bf16.msra.mxu1 %v1260_v23  ;;  %981 = vmatpush1.bf16.msra.mxu0 %v1262_v24 }
 0x178   : > { %939 = vmatprep.subr.bf16.mxu1 %v1253_v25  ;;  %982 = vmatprep.subr.bf16.mxu0 %v1255_v26  ;;  %v1376_v26 = vmov 1966171168  }
 0x179   : > { %v1087_v27 = vunpack.c.l.s4 %v1376_v26 }
 0x17b   : > { %940 = vmatpush1.bf16.msra.mxu1 %v1252_v31  ;;  %983 = vmatpush1.bf16.msra.mxu0 %v1254_v32 }
 0x17c   : > { %941 = vmatprep.subr.bf16.mxu1 %v1245_v33  ;;  %984 = vmatprep.subr.bf16.mxu0 %v1247_v34 }
 0x17f   : > { %942 = vmatpush1.bf16.msra.mxu1 %v1244_v40  ;;  %985 = vmatpush1.bf16.msra.mxu0 %v1246_v41 }
 0x180   : > { %943 = vmatprep.subr.bf16.mxu1 %v1237_v42  ;;  %986 = vmatprep.subr.bf16.mxu0 %v1239_v43  ;;  %v1088_v43 = vunpack.c.0.s8 %v1087_v27 }
 0x183   : > { %944 = vmatpush1.bf16.msra.mxu1 %v1236_v48  ;;  %987 = vmatpush1.bf16.msra.mxu0 %v1238_v49 }
 0x184   : > { %945 = vmatprep.subr.bf16.mxu1 %v1229_v50  ;;  %988 = vmatprep.subr.bf16.mxu0 %v1231_v51 }
 0x187   : > { %946 = vmatpush1.bf16.msra.mxu1 %v1228_v52  ;;  %989 = vmatpush1.bf16.msra.mxu0 %v1230_v53 }
 0x18a   : > { %964 = vmatmul.mubr.bf16.vlgmr.msra.gmra.mxu1 %v1601_v0  ;;  %1007 = vmatmul.mubr.bf16.vlgmr.msra.gmra.mxu0 %v1601_v0 }
 0x22a   : > { %v879_v54 = vpop.f32.mrf.mxu1  ;;  %v922_v55 = vpop.f32.mrf.mxu0 }
 0x22c   : > { %v881_v56 = vpop.f32.mrf.mxu1  ;;  %v924_v57 = vpop.f32.mrf.mxu0 }
 0x22e   : > { %v883_v58 = vpop.f32.mrf.mxu1  ;;  %v926_v59 = vpop.f32.mrf.mxu0 }
 0x22f   : > { %v1018_v2 = vmax.f32 %v879_v54, %v883_v58  ;;  %v1032_v3 = vmax.f32 %v922_v55, %v926_v59 }
 0x230   : > { %v885_v60 = vpop.f32.mrf.mxu1  ;;  %v928_v61 = vpop.f32.mrf.mxu0 }
 0x231   : > { %v1025_v62 = vmax.f32 %v881_v56, %v885_v60  ;;  %v1039_v63 = vmax.f32 %v924_v57, %v928_v61  ;;  %v1019_v6 = vrot.slane %v1018_v2, 4  ;;  %v1033_v7 = vrot.slane %v1032_v3, 4 }
 0x232   : > { %v1091_v56 = vsub.s32 %v1088_v43, %v1505_v39 }
 0x233   : > { %v1026_v4 = vrot.slane %v1025_v62, 4  ;;  %v1040_v5 = vrot.slane %v1039_v63, 4  ;;  %v1020_v10 = vmax.f32 %v1018_v2, %v1019_v6  ;;  %v1034_v0 = vmax.f32 %v1032_v3, %v1033_v7 }
 0x235   : > { %v1027_v8 = vmax.f32 %v1025_v62, %v1026_v4  ;;  %v1041_v9 = vmax.f32 %v1039_v63, %v1040_v5  ;;  %v1021_v15 = vrot.slane %v1020_v10, 2  ;;  %v1035_v16 = vrot.slane %v1034_v0, 2 }
 0x237   : > { %v1028_v11 = vrot.slane %v1027_v8, 2  ;;  %v1042_v13 = vrot.slane %v1041_v9, 2  ;;  %v1022_v21 = vmax.f32 %v1020_v10, %v1021_v15  ;;  %v1036_v1 = vmax.f32 %v1034_v0, %v1035_v16 }
 0x239   : > { %v1029_v12 = vmax.f32 %v1027_v8, %v1028_v11  ;;  %v1043_v14 = vmax.f32 %v1041_v9, %v1042_v13  ;;  %v1023_v36 = vrot.slane %v1022_v21, 1  ;;  %v1037_v37 = vrot.slane %v1036_v1, 1 }
 0x23b   : > { %v1030_v28 = vrot.slane %v1029_v12, 1  ;;  %v1044_v29 = vrot.slane %v1043_v14, 1  ;;  %v1024_v50 = vmax.f32 %v1022_v21, %v1023_v36  ;;  %v1038_v51 = vmax.f32 %v1036_v1, %v1037_v37 }
 0x23d   : > { %v1031_v44 = vmax.f32 %v1029_v12, %v1030_v28  ;;  %v1045_v45 = vmax.f32 %v1043_v14, %v1044_v29 }
 0x23f   : > { %v1082_v57 = vcombine.low %v1024_v50, %v1031_v44  ;;  %v1083_v58 = vcombine.low %v1038_v51, %v1045_v45 }
 0x241   : > { %v1092_v3 = vrot.slane %v1082_v57, %v1091_v56  ;;  %v1099_v4 = vrot.slane %v1083_v58, %v1091_v56 }
 0x243   : > { %v1114_v0 = vcombine.low %v1092_v3, %v1099_v4 }
 0x245   : > { %v1122_v15 = vrot.slane %v1114_v0, %v1091_v56 }
 0x24a   : > { %v965_v17 = vpop.f32.mrf.mxu1  ;;  %v1008_v19 = vpop.f32.mrf.mxu0 }
 0x24c   : > { %v967_v18 = vpop.f32.mrf.mxu1  ;;  %v1010_v20 = vpop.f32.mrf.mxu0 }
 0x24e   : > { %v969_v22 = vpop.f32.mrf.mxu1  ;;  %v1012_v23 = vpop.f32.mrf.mxu0 }
 0x24f   : > { %v1046_v24 = vmax.f32 %v965_v17, %v969_v22  ;;  %v1060_v25 = vmax.f32 %v1008_v19, %v1012_v23  ;;  %v1138_v19 = vld [vmem:[%s1704_s6] sm:$0xff] }
 0x250   : > { %v971_v30 = vpop.f32.mrf.mxu1  ;;  %v1014_v31 = vpop.f32.mrf.mxu0 }
 0x251   : > { %v1047_v32 = vrot.slane %v1046_v24, 4  ;;  %v1061_v33 = vrot.slane %v1060_v25, 4  ;;  %v1053_v34 = vmax.f32 %v967_v18, %v971_v30  ;;  %v1067_v35 = vmax.f32 %v1010_v20, %v1014_v31 }
 0x253   : > { %v1048_v38 = vmax.f32 %v1046_v24, %v1047_v32  ;;  %v1062_v40 = vmax.f32 %v1060_v25, %v1061_v33  ;;  %v1054_v41 = vrot.slane %v1053_v34, 4  ;;  %v1068_v42 = vrot.slane %v1067_v35, 4 }
 0x255   : > { %v1049_v46 = vrot.slane %v1048_v38, 2  ;;  %v1063_v47 = vrot.slane %v1062_v40, 2  ;;  %v1055_v48 = vmax.f32 %v1053_v34, %v1054_v41  ;;  %v1069_v49 = vmax.f32 %v1067_v35, %v1068_v42 }
 0x257   : > { %v1050_v52 = vmax.f32 %v1048_v38, %v1049_v46  ;;  %v1064_v53 = vmax.f32 %v1062_v40, %v1063_v47  ;;  %v1056_v54 = vrot.slane %v1055_v48, 2  ;;  %v1070_v55 = vrot.slane %v1069_v49, 2 }
 0x259   : > { %v1051_v59 = vrot.slane %v1050_v52, 1  ;;  %v1065_v60 = vrot.slane %v1064_v53, 1  ;;  %v1057_v61 = vmax.f32 %v1055_v48, %v1056_v54  ;;  %v1071_v62 = vmax.f32 %v1069_v49, %v1070_v55 }
 0x25b   : > { %v1058_v63 = vrot.slane %v1057_v61, 1  ;;  %v1072_v2 = vrot.slane %v1071_v62, 1  ;;  %v1052_v5 = vmax.f32 %v1050_v52, %v1051_v59  ;;  %v1066_v6 = vmax.f32 %v1064_v53, %v1065_v60 }
 0x25d   : > { %v1059_v7 = vmax.f32 %v1057_v61, %v1058_v63  ;;  %v1073_v8 = vmax.f32 %v1071_v62, %v1072_v2 }
 0x25f   : > { %v1084_v9 = vcombine.low %v1052_v5, %v1059_v7  ;;  %v1085_v10 = vcombine.low %v1066_v6, %v1073_v8 }
 0x261   : > { %v1106_v11 = vrot.slane %v1084_v9, %v1091_v56  ;;  %v1113_v39 = vrot.slane %v1085_v10, %v1091_v56 }
 0x263   : > { %v1115_v13 = vcombine.low %v1106_v11, %v1113_v39 }
 0x265   : > { %v1129_v16 = vrot.slane %v1115_v13, %v1091_v56 }
 0x267   : > { %v1130_v17 = vcombine.low %v1122_v15, %v1129_v16 }
 0x269   : > { %v1139_v12 = vadd.f32 %v1138_v19, %v1130_v17 }
 0x26b   : > { %v1140_v14 = vmax.f32 %v1139_v12, 0.0 }
 0x26d   : > { %1141 = vst [vmem:[%s304_s23] sm:$0xff] %v1140_v14 }
 0x26e PF: > { %s17_s26 = sadd.s32 1, %s1369_s26   ;;  %s1706_s24 = smov %s1365_s25 }
 0x26f   : > { %p14_p5 = scmp.ge.s32.totalorder %s17_s26, 4   ;;  %s1707_s25 = smov %s1709_s27 }
 0x271   :  { %16 = sbr.rel (!%p14_p5) target bundleno = 2 (0x2), region = 86 }

// kernel: pointnet_cls_forward.5
= control target key start
LH: loop header
LB: loop body
LE: loop exit
PB: predicated region body
PF: predicated region fallthrough
CT: control target
= control target key end

     0   :  { %vm2594_vm0 = vcmask 72704   ;;  %s4603_s1 = inlined_call_operand.vmem [shape: bf16[1024,512], index: 1, kind: input, shape index: {}]   ;;  %s4604_s0 = inlined_call_operand.vmem [shape: f32[8,1024], index: 0, kind: input, shape index: {}]   ;;  %s4605_s3 = inlined_call_operand.vmem [shape: bf16[512,256], index: 3, kind: input, shape index: {}]   ;;  %s4606_s2 = inlined_call_operand.vmem [shape: f32[1,512], index: 2, kind: input, shape index: {}]   ;;  %s4607_s5 = inlined_call_operand.vmem [shape: bf16[256,9], index: 5, kind: input, shape index: {}]   ;;  %s4608_s4 = inlined_call_operand.vmem [shape: f32[1,256], index: 4, kind: input, shape index: {}]   ;;  %s4609_s6 = inlined_call_operand.vmem [shape: f32[1,9], index: 6, kind: input, shape index: {}]   ;;  %s4610_s7 = inlined_call_operand.vmem [shape: f32[8,9], index: 7, kind: output, shape index: {}]  }
   0x1   :  { %v2959_v0 = vld [vmem:[%s4603_s1 + $0xe4] ss:$16 sps:$4 sm:$0xff]   ;;  %v2963_v2 = vld [vmem:[%s4603_s1 + $0xe0] ss:$16 sps:$4 sm:$0xff]   ;;  %v28_v46 = vld [vmem:[%s4604_s0 + $0x8] sm:$0xff] }
   0x2   :  { %v2961_v1 = vld [vmem:[%s4603_s1 + $0x2e4] ss:$16 sps:$4 sm:$0xff]   ;;  %1601 = vmatprep.subr.bf16.mxu0 %v2959_v0  ;;  %v2964_v3 = vld [vmem:[%s4603_s1 + $0x2e0] ss:$16 sps:$4 sm:$0xff]   ;;  %v3642_v49 = vpack.c.bf16 %v28_v46, %v28_v46  ;;  %v30_v50 = vld [vmem:[%s4604_s0 + $0x18] sm:$0xff] }
   0x3   :  { %1642 = vmatprep.subr.bf16.mxu1 %v2961_v1  ;;  %v2965_v4 = vld [vmem:[%s4603_s1 + $0xc4] ss:$16 sps:$4 sm:$0xff]   ;;  %1602 = vmatpush1.bf16.msra.mxu0 %v2963_v2  ;;  %v2969_v6 = vld [vmem:[%s4603_s1 + $0xc0] ss:$16 sps:$4 sm:$0xff]   ;;  %v3650_v52 = vpack.c.bf16 %v30_v50, %v30_v50 }
   0x4   :  { %1643 = vmatpush1.bf16.msra.mxu1 %v2964_v3  ;;  %v2967_v5 = vld [vmem:[%s4603_s1 + $0x2c4] ss:$16 sps:$4 sm:$0xff]   ;;  %1603 = vmatprep.subr.bf16.mxu0 %v2965_v4  ;;  %v2970_v7 = vld [vmem:[%s4603_s1 + $0x2c0] ss:$16 sps:$4 sm:$0xff]  }
   0x5   :  { %1644 = vmatprep.subr.bf16.mxu1 %v2967_v5  ;;  %v2971_v8 = vld [vmem:[%s4603_s1 + $0xa4] ss:$16 sps:$4 sm:$0xff]   ;;  %v2975_v10 = vld [vmem:[%s4603_s1 + $0xa0] ss:$16 sps:$4 sm:$0xff]   ;;  %1633 = vmatprep.mubr.bf16.mxu0 %v3642_v49 }
   0x6   :  { %v2973_v9 = vld [vmem:[%s4603_s1 + $0x2a4] ss:$16 sps:$4 sm:$0xff]   ;;  %v2976_v11 = vld [vmem:[%s4603_s1 + $0x2a0] ss:$16 sps:$4 sm:$0xff]   ;;  %1674 = vmatprep.mubr.bf16.mxu1 %v3650_v52 }
   0x7   :  { %1604 = vmatpush1.bf16.msra.mxu0 %v2969_v6  ;;  %v2977_v12 = vld [vmem:[%s4603_s1 + $0x84] ss:$16 sps:$4 sm:$0xff]   ;;  %v2981_v14 = vld [vmem:[%s4603_s1 + $0x80] ss:$16 sps:$4 sm:$0xff]  }
   0x8   :  { %1645 = vmatpush1.bf16.msra.mxu1 %v2970_v7  ;;  %1605 = vmatprep.subr.bf16.mxu0 %v2971_v8  ;;  %v2979_v13 = vld [vmem:[%s4603_s1 + $0x284] ss:$16 sps:$4 sm:$0xff]   ;;  %v2982_v15 = vld [vmem:[%s4603_s1 + $0x280] ss:$16 sps:$4 sm:$0xff]  }
   0x9   :  { %1646 = vmatprep.subr.bf16.mxu1 %v2973_v9  ;;  %v2983_v16 = vld [vmem:[%s4603_s1 + $0x64] ss:$16 sps:$4 sm:$0xff]   ;;  %v2987_v18 = vld [vmem:[%s4603_s1 + $0x60] ss:$16 sps:$4 sm:$0xff]  }
   0xa   :  { %v2985_v17 = vld [vmem:[%s4603_s1 + $0x264] ss:$16 sps:$4 sm:$0xff]   ;;  %v2988_v19 = vld [vmem:[%s4603_s1 + $0x260] ss:$16 sps:$4 sm:$0xff]  }
   0xb   :  { %1606 = vmatpush1.bf16.msra.mxu0 %v2975_v10  ;;  %v2989_v20 = vld [vmem:[%s4603_s1 + $0x44] ss:$16 sps:$4 sm:$0xff]   ;;  %v2993_v22 = vld [vmem:[%s4603_s1 + $0x40] ss:$16 sps:$4 sm:$0xff]  }
   0xc   :  { %1647 = vmatpush1.bf16.msra.mxu1 %v2976_v11  ;;  %1607 = vmatprep.subr.bf16.mxu0 %v2977_v12  ;;  %v2991_v21 = vld [vmem:[%s4603_s1 + $0x244] ss:$16 sps:$4 sm:$0xff]   ;;  %v2994_v23 = vld [vmem:[%s4603_s1 + $0x240] ss:$16 sps:$4 sm:$0xff]  }
   0xd   :  { %1648 = vmatprep.subr.bf16.mxu1 %v2979_v13  ;;  %v2995_v24 = vld [vmem:[%s4603_s1 + $0x24] ss:$16 sps:$4 sm:$0xff]   ;;  %v2999_v26 = vld [vmem:[%s4603_s1 + $0x20] ss:$16 sps:$4 sm:$0xff]  }
   0xe   :  { %v2997_v25 = vld [vmem:[%s4603_s1 + $0x224] ss:$16 sps:$4 sm:$0xff]   ;;  %v3000_v27 = vld [vmem:[%s4603_s1 + $0x220] ss:$16 sps:$4 sm:$0xff]  }
   0xf   :  { %1608 = vmatpush1.bf16.msra.mxu0 %v2981_v14  ;;  %v3001_v28 = vld [vmem:[%s4603_s1 + $0x4] ss:$16 sps:$4 sm:$0xff]   ;;  %v3005_v30 = vld [vmem:[%s4603_s1] ss:$16 sps:$4 sm:$0xff]  }
  0x10   :  { %1649 = vmatpush1.bf16.msra.mxu1 %v2982_v15  ;;  %1609 = vmatprep.subr.bf16.mxu0 %v2983_v16  ;;  %v3003_v29 = vld [vmem:[%s4603_s1 + $0x204] ss:$16 sps:$4 sm:$0xff]   ;;  %v3006_v31 = vld [vmem:[%s4603_s1 + $0x200] ss:$16 sps:$4 sm:$0xff]  }
  0x11   :  { %1650 = vmatprep.subr.bf16.mxu1 %v2985_v17  ;;  %v3007_v32 = vld [vmem:[%s4603_s1 + $0x1e4] ss:$16 sps:$4 sm:$0xff]   ;;  %v3011_v34 = vld [vmem:[%s4603_s1 + $0x1e0] ss:$16 sps:$4 sm:$0xff]  }
  0x12   :  { %v3009_v33 = vld [vmem:[%s4603_s1 + $0x3e4] ss:$16 sps:$4 sm:$0xff]   ;;  %v3012_v35 = vld [vmem:[%s4603_s1 + $0x3e0] ss:$16 sps:$4 sm:$0xff]  }
  0x13   :  { %1610 = vmatpush1.bf16.msra.mxu0 %v2987_v18  ;;  %v3013_v36 = vld [vmem:[%s4603_s1 + $0x1c4] ss:$16 sps:$4 sm:$0xff]   ;;  %v3017_v38 = vld [vmem:[%s4603_s1 + $0x1c0] ss:$16 sps:$4 sm:$0xff]  }
  0x14   :  { %1651 = vmatpush1.bf16.msra.mxu1 %v2988_v19  ;;  %1611 = vmatprep.subr.bf16.mxu0 %v2989_v20  ;;  %v3015_v37 = vld [vmem:[%s4603_s1 + $0x3c4] ss:$16 sps:$4 sm:$0xff]   ;;  %v3018_v39 = vld [vmem:[%s4603_s1 + $0x3c0] ss:$16 sps:$4 sm:$0xff]  }
  0x15   :  { %1652 = vmatprep.subr.bf16.mxu1 %v2991_v21  ;;  %v3019_v40 = vld [vmem:[%s4603_s1 + $0x1a4] ss:$16 sps:$4 sm:$0xff]   ;;  %v3023_v42 = vld [vmem:[%s4603_s1 + $0x1a0] ss:$16 sps:$4 sm:$0xff]  }
  0x16   :  { %v3021_v41 = vld [vmem:[%s4603_s1 + $0x3a4] ss:$16 sps:$4 sm:$0xff]   ;;  %v3024_v43 = vld [vmem:[%s4603_s1 + $0x3a0] ss:$16 sps:$4 sm:$0xff]  }
  0x17   :  { %1612 = vmatpush1.bf16.msra.mxu0 %v2993_v22  ;;  %v3025_v44 = vld [vmem:[%s4603_s1 + $0x184] ss:$16 sps:$4 sm:$0xff]   ;;  %v3029_v47 = vld [vmem:[%s4603_s1 + $0x180] ss:$16 sps:$4 sm:$0xff]  }
  0x18   :  { %1653 = vmatpush1.bf16.msra.mxu1 %v2994_v23  ;;  %1613 = vmatprep.subr.bf16.mxu0 %v2995_v24  ;;  %v3027_v45 = vld [vmem:[%s4603_s1 + $0x384] ss:$16 sps:$4 sm:$0xff]   ;;  %v3030_v48 = vld [vmem:[%s4603_s1 + $0x380] ss:$16 sps:$4 sm:$0xff]  }
  0x19   :  { %1654 = vmatprep.subr.bf16.mxu1 %v2997_v25  ;;  %v3031_v51 = vld [vmem:[%s4603_s1 + $0x164] ss:$16 sps:$4 sm:$0xff]   ;;  %v3035_v54 = vld [vmem:[%s4603_s1 + $0x160] ss:$16 sps:$4 sm:$0xff]  }
  0x1a   :  { %v3033_v53 = vld [vmem:[%s4603_s1 + $0x364] ss:$16 sps:$4 sm:$0xff]   ;;  %v3036_v55 = vld [vmem:[%s4603_s1 + $0x360] ss:$16 sps:$4 sm:$0xff]  }
  0x1b   :  { %1614 = vmatpush1.bf16.msra.mxu0 %v2999_v26  ;;  %v3037_v56 = vld [vmem:[%s4603_s1 + $0x144] ss:$16 sps:$4 sm:$0xff]   ;;  %v3041_v58 = vld [vmem:[%s4603_s1 + $0x140] ss:$16 sps:$4 sm:$0xff]  }
  0x1c   :  { %1655 = vmatpush1.bf16.msra.mxu1 %v3000_v27  ;;  %1615 = vmatprep.subr.bf16.mxu0 %v3001_v28  ;;  %v3039_v57 = vld [vmem:[%s4603_s1 + $0x344] ss:$16 sps:$4 sm:$0xff]   ;;  %v3042_v59 = vld [vmem:[%s4603_s1 + $0x340] ss:$16 sps:$4 sm:$0xff]  }
  0x1d   :  { %1656 = vmatprep.subr.bf16.mxu1 %v3003_v29  ;;  %v3043_v60 = vld [vmem:[%s4603_s1 + $0x124] ss:$16 sps:$4 sm:$0xff]   ;;  %v3047_v62 = vld [vmem:[%s4603_s1 + $0x120] ss:$16 sps:$4 sm:$0xff]  }
  0x1e   :  { %v3045_v61 = vld [vmem:[%s4603_s1 + $0x324] ss:$16 sps:$4 sm:$0xff]   ;;  %v3048_v63 = vld [vmem:[%s4603_s1 + $0x320] ss:$16 sps:$4 sm:$0xff]  }
  0x1f   :  { %1616 = vmatpush1.bf16.msra.mxu0 %v3005_v30  ;;  %v3049_v0 = vld [vmem:[%s4603_s1 + $0x104] ss:$16 sps:$4 sm:$0xff]   ;;  %v3053_v2 = vld [vmem:[%s4603_s1 + $0x100] ss:$16 sps:$4 sm:$0xff]  }
  0x20   :  { %1657 = vmatpush1.bf16.msra.mxu1 %v3006_v31  ;;  %1617 = vmatprep.subr.bf16.mxu0 %v3007_v32  ;;  %v3051_v1 = vld [vmem:[%s4603_s1 + $0x304] ss:$16 sps:$4 sm:$0xff]   ;;  %v3054_v3 = vld [vmem:[%s4603_s1 + $0x300] ss:$16 sps:$4 sm:$0xff]  }
  0x21   :  { %1658 = vmatprep.subr.bf16.mxu1 %v3009_v33  ;;  %v27_v4 = vld [vmem:[%s4604_s0] sm:$0xff]  ;;  %v29_v5 = vld [vmem:[%s4604_s0 + $0x10] sm:$0xff] }
  0x22   :  { %v3057_v6 = vld [vmem:[%s4603_s1 + $0x4e4] ss:$16 sps:$4 sm:$0xff]   ;;  %v3711_v8 = vpack.c.bf16 %v27_v4, %v27_v4  ;;  %v3713_v9 = vpack.c.bf16 %v29_v5, %v29_v5  ;;  %v3055_v10 = vld [vmem:[%s4603_s1 + $0x4e0] ss:$16 sps:$4 sm:$0xff]  }
  0x23   :  { %1618 = vmatpush2.bf16.msra.mxu0 %v3011_v34  ;;  %v3060_v7 = vld [vmem:[%s4603_s1 + $0x6e4] ss:$16 sps:$4 sm:$0xff]   ;;  %v3058_v11 = vld [vmem:[%s4603_s1 + $0x6e0] ss:$16 sps:$4 sm:$0xff]   ;;  %v32_v34 = vld [vmem:[%s4604_s0 + $0x28] sm:$0xff] }
  0x24   :  { %1659 = vmatpush2.bf16.msra.mxu1 %v3012_v35  ;;  %1619 = vmatprep.subr.bf16.mxu0 %v3013_v36  ;;  %v3063_v12 = vld [vmem:[%s4603_s1 + $0x4c4] ss:$16 sps:$4 sm:$0xff]   ;;  %v3061_v14 = vld [vmem:[%s4603_s1 + $0x4c0] ss:$16 sps:$4 sm:$0xff]  }
  0x25   :  { %1660 = vmatprep.subr.bf16.mxu1 %v3015_v37  ;;  %v3066_v13 = vld [vmem:[%s4603_s1 + $0x6c4] ss:$16 sps:$4 sm:$0xff]   ;;  %v3064_v15 = vld [vmem:[%s4603_s1 + $0x6c0] ss:$16 sps:$4 sm:$0xff]   ;;  %v3798_v37 = vpack.c.bf16 %v32_v34, %v32_v34  ;;  %v3177_v34 = vld [vmem:[%s4603_s1 + $0x6c] ss:$16 sps:$4 sm:$0xff]  }
  0x26   :  { %v3069_v16 = vld [vmem:[%s4603_s1 + $0x4a4] ss:$16 sps:$4 sm:$0xff]   ;;  %v3067_v18 = vld [vmem:[%s4603_s1 + $0x4a0] ss:$16 sps:$4 sm:$0xff]  }
  0x27   :  { %1620 = vmatpush2.bf16.msra.mxu0 %v3017_v38  ;;  %v3072_v17 = vld [vmem:[%s4603_s1 + $0x6a4] ss:$16 sps:$4 sm:$0xff]   ;;  %v3070_v19 = vld [vmem:[%s4603_s1 + $0x6a0] ss:$16 sps:$4 sm:$0xff]   ;;  %v34_v38 = vld [vmem:[%s4604_s0 + $0x38] sm:$0xff] }
  0x28   :  { %1661 = vmatpush2.bf16.msra.mxu1 %v3018_v39  ;;  %1621 = vmatprep.subr.bf16.mxu0 %v3019_v40  ;;  %v3075_v20 = vld [vmem:[%s4603_s1 + $0x484] ss:$16 sps:$4 sm:$0xff]   ;;  %v3073_v22 = vld [vmem:[%s4603_s1 + $0x480] ss:$16 sps:$4 sm:$0xff]   ;;  %v3806_v40 = vpack.c.bf16 %v34_v38, %v34_v38  ;;  %v3178_v38 = vld [vmem:[%s4603_s1 + $0x268] ss:$16 sps:$4 sm:$0xff]  }
  0x29   :  { %1662 = vmatprep.subr.bf16.mxu1 %v3021_v41  ;;  %v3078_v21 = vld [vmem:[%s4603_s1 + $0x684] ss:$16 sps:$4 sm:$0xff]   ;;  %v3076_v23 = vld [vmem:[%s4603_s1 + $0x680] ss:$16 sps:$4 sm:$0xff]  }
  0x2a   :  { %v3081_v24 = vld [vmem:[%s4603_s1 + $0x464] ss:$16 sps:$4 sm:$0xff]   ;;  %v3079_v26 = vld [vmem:[%s4603_s1 + $0x460] ss:$16 sps:$4 sm:$0xff]  }
  0x2b   :  { %1622 = vmatpush2.bf16.msra.mxu0 %v3023_v42  ;;  %v3084_v25 = vld [vmem:[%s4603_s1 + $0x664] ss:$16 sps:$4 sm:$0xff]   ;;  %v3082_v27 = vld [vmem:[%s4603_s1 + $0x660] ss:$16 sps:$4 sm:$0xff]  }
  0x2c   :  { %1663 = vmatpush2.bf16.msra.mxu1 %v3024_v43  ;;  %1623 = vmatprep.subr.bf16.mxu0 %v3025_v44  ;;  %v3087_v28 = vld [vmem:[%s4603_s1 + $0x444] ss:$16 sps:$4 sm:$0xff]   ;;  %v3085_v30 = vld [vmem:[%s4603_s1 + $0x440] ss:$16 sps:$4 sm:$0xff]  }
  0x2d   :  { %1664 = vmatprep.subr.bf16.mxu1 %v3027_v45  ;;  %v3090_v29 = vld [vmem:[%s4603_s1 + $0x644] ss:$16 sps:$4 sm:$0xff]   ;;  %v3088_v31 = vld [vmem:[%s4603_s1 + $0x640] ss:$16 sps:$4 sm:$0xff]  }
  0x2e   :  { %v3093_v32 = vld [vmem:[%s4603_s1 + $0x424] ss:$16 sps:$4 sm:$0xff]   ;;  %v3091_v35 = vld [vmem:[%s4603_s1 + $0x420] ss:$16 sps:$4 sm:$0xff]  }
  0x2f   :  { %1624 = vmatpush2.bf16.msra.mxu0 %v3029_v47  ;;  %v3096_v33 = vld [vmem:[%s4603_s1 + $0x624] ss:$16 sps:$4 sm:$0xff]   ;;  %v3094_v36 = vld [vmem:[%s4603_s1 + $0x620] ss:$16 sps:$4 sm:$0xff]  }
  0x30   :  { %1665 = vmatpush2.bf16.msra.mxu1 %v3030_v48  ;;  %1625 = vmatprep.subr.bf16.mxu0 %v3031_v51  ;;  %v3099_v39 = vld [vmem:[%s4603_s1 + $0x404] ss:$16 sps:$4 sm:$0xff]   ;;  %v3097_v42 = vld [vmem:[%s4603_s1 + $0x400] ss:$16 sps:$4 sm:$0xff]  }
  0x31   :  { %1666 = vmatprep.subr.bf16.mxu1 %v3033_v53  ;;  %v3102_v41 = vld [vmem:[%s4603_s1 + $0x604] ss:$16 sps:$4 sm:$0xff]   ;;  %v3100_v43 = vld [vmem:[%s4603_s1 + $0x600] ss:$16 sps:$4 sm:$0xff]  }
  0x32   :  { %v3105_v44 = vld [vmem:[%s4603_s1 + $0x5e4] ss:$16 sps:$4 sm:$0xff]   ;;  %v3103_v46 = vld [vmem:[%s4603_s1 + $0x5e0] ss:$16 sps:$4 sm:$0xff]  }
  0x33   :  { %1626 = vmatpush2.bf16.msra.mxu0 %v3035_v54  ;;  %v3108_v45 = vld [vmem:[%s4603_s1 + $0x7e4] ss:$16 sps:$4 sm:$0xff]   ;;  %v3106_v47 = vld [vmem:[%s4603_s1 + $0x7e0] ss:$16 sps:$4 sm:$0xff]  }
  0x34   :  { %1667 = vmatpush2.bf16.msra.mxu1 %v3036_v55  ;;  %1627 = vmatprep.subr.bf16.mxu0 %v3037_v56  ;;  %v3111_v48 = vld [vmem:[%s4603_s1 + $0x5c4] ss:$16 sps:$4 sm:$0xff]   ;;  %v3109_v51 = vld [vmem:[%s4603_s1 + $0x5c0] ss:$16 sps:$4 sm:$0xff]  }
  0x35   :  { %1668 = vmatprep.subr.bf16.mxu1 %v3039_v57  ;;  %v3114_v50 = vld [vmem:[%s4603_s1 + $0x7c4] ss:$16 sps:$4 sm:$0xff]   ;;  %v3112_v53 = vld [vmem:[%s4603_s1 + $0x7c0] ss:$16 sps:$4 sm:$0xff]  }
  0x36   :  { %v3117_v54 = vld [vmem:[%s4603_s1 + $0x5a4] ss:$16 sps:$4 sm:$0xff]   ;;  %v3115_v56 = vld [vmem:[%s4603_s1 + $0x5a0] ss:$16 sps:$4 sm:$0xff]  }
  0x37   :  { %1628 = vmatpush2.bf16.msra.mxu0 %v3041_v58  ;;  %v3120_v55 = vld [vmem:[%s4603_s1 + $0x7a4] ss:$16 sps:$4 sm:$0xff]   ;;  %v3118_v57 = vld [vmem:[%s4603_s1 + $0x7a0] ss:$16 sps:$4 sm:$0xff]  }
  0x38   :  { %1669 = vmatpush2.bf16.msra.mxu1 %v3042_v59  ;;  %1629 = vmatprep.subr.bf16.mxu0 %v3043_v60  ;;  %v3123_v58 = vld [vmem:[%s4603_s1 + $0x584] ss:$16 sps:$4 sm:$0xff]   ;;  %v3121_v60 = vld [vmem:[%s4603_s1 + $0x580] ss:$16 sps:$4 sm:$0xff]  }
  0x39   :  { %1670 = vmatprep.subr.bf16.mxu1 %v3045_v61  ;;  %v3126_v59 = vld [vmem:[%s4603_s1 + $0x784] ss:$16 sps:$4 sm:$0xff]   ;;  %v3124_v61 = vld [vmem:[%s4603_s1 + $0x780] ss:$16 sps:$4 sm:$0xff]  }
  0x3a   :  { %v3133_v4 = vld [vmem:[%s4603_s1 + $0x540] ss:$16 sps:$4 sm:$0xff]  }
  0x3b   :  { %1630 = vmatpush2.bf16.msra.mxu0 %v3047_v62  ;;  %v3129_v62 = vld [vmem:[%s4603_s1 + $0x564] ss:$16 sps:$4 sm:$0xff]   ;;  %v3136_v5 = vld [vmem:[%s4603_s1 + $0x740] ss:$16 sps:$4 sm:$0xff]  }
  0x3c   :  { %1671 = vmatpush2.bf16.msra.mxu1 %v3048_v63  ;;  %1631 = vmatprep.subr.bf16.mxu0 %v3049_v0  ;;  %v3132_v63 = vld [vmem:[%s4603_s1 + $0x764] ss:$16 sps:$4 sm:$0xff]   ;;  %v3127_v0 = vld [vmem:[%s4603_s1 + $0x560] ss:$16 sps:$4 sm:$0xff]  }
  0x3d   :  { %1672 = vmatprep.subr.bf16.mxu1 %v3051_v1  ;;  %v3130_v1 = vld [vmem:[%s4603_s1 + $0x760] ss:$16 sps:$4 sm:$0xff]  }
  0x3f   :  { %1632 = vmatpush2.bf16.msra.mxu0 %v3053_v2  ;;  %v3135_v2 = vld [vmem:[%s4603_s1 + $0x544] ss:$16 sps:$4 sm:$0xff]  }
  0x40   :  { %1673 = vmatpush2.bf16.msra.mxu1 %v3054_v3  ;;  %1683 = vmatprep.subr.bf16.mxu0 %v3057_v6  ;;  %v3138_v3 = vld [vmem:[%s4603_s1 + $0x744] ss:$16 sps:$4 sm:$0xff]  }
  0x41   :  { %1724 = vmatprep.subr.bf16.mxu1 %v3060_v7  ;;  %v3141_v6 = vld [vmem:[%s4603_s1 + $0x524] ss:$16 sps:$4 sm:$0xff]  }
  0x42   :  { %1634 = vmatmul.mubr.bf16.vlgmr.msra.gmra.mxu0 %v3711_v8  ;;  %v3144_v7 = vld [vmem:[%s4603_s1 + $0x724] ss:$16 sps:$4 sm:$0xff]  }
  0x43   :  { %1675 = vmatmul.mubr.bf16.vlgmr.msra.gmra.mxu1 %v3713_v9  ;;  %1684 = vmatpush1.bf16.msra.mxu0 %v3055_v10  ;;  %v3139_v10 = vld [vmem:[%s4603_s1 + $0x520] ss:$16 sps:$4 sm:$0xff]  }
  0x44   :  { %1725 = vmatpush1.bf16.msra.mxu1 %v3058_v11  ;;  %1685 = vmatprep.subr.bf16.mxu0 %v3063_v12  ;;  %v3142_v11 = vld [vmem:[%s4603_s1 + $0x720] ss:$16 sps:$4 sm:$0xff]   ;;  %v3147_v12 = vld [vmem:[%s4603_s1 + $0x504] ss:$16 sps:$4 sm:$0xff]  }
  0x45   :  { %1726 = vmatprep.subr.bf16.mxu1 %v3066_v13  ;;  %1715 = vmatprep.mubr.bf16.mxu0 %v3798_v37  ;;  %v3150_v13 = vld [vmem:[%s4603_s1 + $0x704] ss:$16 sps:$4 sm:$0xff]  }
  0x46   :  { %1756 = vmatprep.mubr.bf16.mxu1 %v3806_v40 }
  0x47   :  { %1686 = vmatpush1.bf16.msra.mxu0 %v3061_v14  ;;  %v3145_v14 = vld [vmem:[%s4603_s1 + $0x500] ss:$16 sps:$4 sm:$0xff]  }
  0x48   :  { %1727 = vmatpush1.bf16.msra.mxu1 %v3064_v15  ;;  %1687 = vmatprep.subr.bf16.mxu0 %v3069_v16  ;;  %v3148_v15 = vld [vmem:[%s4603_s1 + $0x700] ss:$16 sps:$4 sm:$0xff]  }
  0x49   :  { %1728 = vmatprep.subr.bf16.mxu1 %v3072_v17  ;;  %v31_v16 = vld [vmem:[%s4604_s0 + $0x20] sm:$0xff]  ;;  %v33_v17 = vld [vmem:[%s4604_s0 + $0x30] sm:$0xff] }
  0x4b   :  { %1688 = vmatpush1.bf16.msra.mxu0 %v3067_v18  ;;  %v3153_v18 = vld [vmem:[%s4603_s1 + $0xec] ss:$16 sps:$4 sm:$0xff]  }
  0x4c   :  { %1729 = vmatpush1.bf16.msra.mxu1 %v3070_v19  ;;  %1689 = vmatprep.subr.bf16.mxu0 %v3075_v20  ;;  %v3156_v19 = vld [vmem:[%s4603_s1 + $0x2ec] ss:$16 sps:$4 sm:$0xff]   ;;  %v3927_v20 = vpack.c.bf16 %v31_v16, %v31_v16 }
  0x4d   :  { %1730 = vmatprep.subr.bf16.mxu1 %v3078_v21  ;;  %v3929_v21 = vpack.c.bf16 %v33_v17, %v33_v17  ;;  %v3237_v16 = vld [vmem:[%s4603_s1 + $0x12c] ss:$16 sps:$4 sm:$0xff]  }
  0x4e   :  { %v3240_v17 = vld [vmem:[%s4603_s1 + $0x32c] ss:$16 sps:$4 sm:$0xff]  }
  0x4f   :  { %1690 = vmatpush1.bf16.msra.mxu0 %v3073_v22  ;;  %v3151_v22 = vld [vmem:[%s4603_s1 + $0xe8] ss:$16 sps:$4 sm:$0xff]  }
  0x50   :  { %1731 = vmatpush1.bf16.msra.mxu1 %v3076_v23  ;;  %1691 = vmatprep.subr.bf16.mxu0 %v3081_v24  ;;  %v3154_v23 = vld [vmem:[%s4603_s1 + $0x2e8] ss:$16 sps:$4 sm:$0xff]   ;;  %v3159_v24 = vld [vmem:[%s4603_s1 + $0xcc] ss:$16 sps:$4 sm:$0xff]  }
  0x51   :  { %1732 = vmatprep.subr.bf16.mxu1 %v3084_v25  ;;  %v3162_v25 = vld [vmem:[%s4603_s1 + $0x2cc] ss:$16 sps:$4 sm:$0xff]  }
  0x53   :  { %1692 = vmatpush1.bf16.msra.mxu0 %v3079_v26  ;;  %v3157_v26 = vld [vmem:[%s4603_s1 + $0xc8] ss:$16 sps:$4 sm:$0xff]  }
  0x54   :  { %1733 = vmatpush1.bf16.msra.mxu1 %v3082_v27  ;;  %1693 = vmatprep.subr.bf16.mxu0 %v3087_v28  ;;  %v3160_v27 = vld [vmem:[%s4603_s1 + $0x2c8] ss:$16 sps:$4 sm:$0xff]   ;;  %v3165_v28 = vld [vmem:[%s4603_s1 + $0xac] ss:$16 sps:$4 sm:$0xff]  }
  0x55   :  { %1734 = vmatprep.subr.bf16.mxu1 %v3090_v29  ;;  %v3168_v29 = vld [vmem:[%s4603_s1 + $0x2ac] ss:$16 sps:$4 sm:$0xff]  }
  0x57   :  { %1694 = vmatpush1.bf16.msra.mxu0 %v3085_v30  ;;  %v3163_v30 = vld [vmem:[%s4603_s1 + $0xa8] ss:$16 sps:$4 sm:$0xff]  }
  0x58   :  { %1735 = vmatpush1.bf16.msra.mxu1 %v3088_v31  ;;  %1695 = vmatprep.subr.bf16.mxu0 %v3093_v32  ;;  %v3166_v31 = vld [vmem:[%s4603_s1 + $0x2a8] ss:$16 sps:$4 sm:$0xff]   ;;  %v3171_v32 = vld [vmem:[%s4603_s1 + $0x8c] ss:$16 sps:$4 sm:$0xff]  }
  0x59   :  { %1736 = vmatprep.subr.bf16.mxu1 %v3096_v33  ;;  %v3172_v33 = vld [vmem:[%s4603_s1 + $0x288] ss:$16 sps:$4 sm:$0xff]  }
  0x5b   :  { %1696 = vmatpush1.bf16.msra.mxu0 %v3091_v35  ;;  %v3180_v35 = vld [vmem:[%s4603_s1 + $0x26c] ss:$16 sps:$4 sm:$0xff]  }
  0x5c   :  { %1737 = vmatpush1.bf16.msra.mxu1 %v3094_v36  ;;  %1697 = vmatprep.subr.bf16.mxu0 %v3099_v39  ;;  %v3175_v36 = vld [vmem:[%s4603_s1 + $0x68] ss:$16 sps:$4 sm:$0xff]   ;;  %v3183_v39 = vld [vmem:[%s4603_s1 + $0x4c] ss:$16 sps:$4 sm:$0xff]  }
  0x5d   :  { %1738 = vmatprep.subr.bf16.mxu1 %v3102_v41  ;;  %v3186_v41 = vld [vmem:[%s4603_s1 + $0x24c] ss:$16 sps:$4 sm:$0xff]  }
  0x5f   :  { %1698 = vmatpush1.bf16.msra.mxu0 %v3097_v42  ;;  %v3181_v42 = vld [vmem:[%s4603_s1 + $0x48] ss:$16 sps:$4 sm:$0xff]  }
  0x60   :  { %1739 = vmatpush1.bf16.msra.mxu1 %v3100_v43  ;;  %1699 = vmatprep.subr.bf16.mxu0 %v3105_v44  ;;  %v3184_v43 = vld [vmem:[%s4603_s1 + $0x248] ss:$16 sps:$4 sm:$0xff]   ;;  %v3189_v44 = vld [vmem:[%s4603_s1 + $0x2c] ss:$16 sps:$4 sm:$0xff]  }
  0x61   :  { %1740 = vmatprep.subr.bf16.mxu1 %v3108_v45  ;;  %v3192_v45 = vld [vmem:[%s4603_s1 + $0x22c] ss:$16 sps:$4 sm:$0xff]  }
  0x63   :  { %1700 = vmatpush2.bf16.msra.mxu0 %v3103_v46  ;;  %v3187_v46 = vld [vmem:[%s4603_s1 + $0x28] ss:$16 sps:$4 sm:$0xff]  }
  0x64   :  { %1741 = vmatpush2.bf16.msra.mxu1 %v3106_v47  ;;  %1701 = vmatprep.subr.bf16.mxu0 %v3111_v48  ;;  %v3190_v47 = vld [vmem:[%s4603_s1 + $0x228] ss:$16 sps:$4 sm:$0xff]   ;;  %v3195_v48 = vld [vmem:[%s4603_s1 + $0xc] ss:$16 sps:$4 sm:$0xff]  }
  0x65   :  { %1742 = vmatprep.subr.bf16.mxu1 %v3114_v50  ;;  %v3198_v50 = vld [vmem:[%s4603_s1 + $0x20c] ss:$16 sps:$4 sm:$0xff]  }
  0x67   :  { %1702 = vmatpush2.bf16.msra.mxu0 %v3109_v51  ;;  %v3193_v51 = vld [vmem:[%s4603_s1 + $0x8] ss:$16 sps:$4 sm:$0xff]  }
  0x68   :  { %1743 = vmatpush2.bf16.msra.mxu1 %v3112_v53  ;;  %1703 = vmatprep.subr.bf16.mxu0 %v3117_v54  ;;  %v3196_v53 = vld [vmem:[%s4603_s1 + $0x208] ss:$16 sps:$4 sm:$0xff]   ;;  %v3201_v54 = vld [vmem:[%s4603_s1 + $0x1ec] ss:$16 sps:$4 sm:$0xff]  }
  0x69   :  { %1744 = vmatprep.subr.bf16.mxu1 %v3120_v55  ;;  %v3204_v55 = vld [vmem:[%s4603_s1 + $0x3ec] ss:$16 sps:$4 sm:$0xff]  }
  0x6b   :  { %1704 = vmatpush2.bf16.msra.mxu0 %v3115_v56  ;;  %v3199_v56 = vld [vmem:[%s4603_s1 + $0x1e8] ss:$16 sps:$4 sm:$0xff]  }
  0x6c   :  { %1745 = vmatpush2.bf16.msra.mxu1 %v3118_v57  ;;  %1705 = vmatprep.subr.bf16.mxu0 %v3123_v58  ;;  %v3202_v57 = vld [vmem:[%s4603_s1 + $0x3e8] ss:$16 sps:$4 sm:$0xff]   ;;  %v3207_v58 = vld [vmem:[%s4603_s1 + $0x1cc] ss:$16 sps:$4 sm:$0xff]  }
  0x6d   :  { %1746 = vmatprep.subr.bf16.mxu1 %v3126_v59  ;;  %v3210_v59 = vld [vmem:[%s4603_s1 + $0x3cc] ss:$16 sps:$4 sm:$0xff]  }
  0x6f   :  { %1706 = vmatpush2.bf16.msra.mxu0 %v3121_v60  ;;  %v3205_v60 = vld [vmem:[%s4603_s1 + $0x1c8] ss:$16 sps:$4 sm:$0xff]  }
  0x70   :  { %1747 = vmatpush2.bf16.msra.mxu1 %v3124_v61  ;;  %1707 = vmatprep.subr.bf16.mxu0 %v3129_v62  ;;  %v3208_v61 = vld [vmem:[%s4603_s1 + $0x3c8] ss:$16 sps:$4 sm:$0xff]   ;;  %v3213_v62 = vld [vmem:[%s4603_s1 + $0x1ac] ss:$16 sps:$4 sm:$0xff]  }
  0x71   :  { %1748 = vmatprep.subr.bf16.mxu1 %v3132_v63  ;;  %v3216_v63 = vld [vmem:[%s4603_s1 + $0x3ac] ss:$16 sps:$4 sm:$0xff]  }
  0x73   :  { %1708 = vmatpush2.bf16.msra.mxu0 %v3127_v0  ;;  %v3211_v0 = vld [vmem:[%s4603_s1 + $0x1a8] ss:$16 sps:$4 sm:$0xff]  }
  0x74   :  { %1749 = vmatpush2.bf16.msra.mxu1 %v3130_v1  ;;  %1709 = vmatprep.subr.bf16.mxu0 %v3135_v2  ;;  %v3214_v1 = vld [vmem:[%s4603_s1 + $0x3a8] ss:$16 sps:$4 sm:$0xff]   ;;  %v3219_v2 = vld [vmem:[%s4603_s1 + $0x18c] ss:$16 sps:$4 sm:$0xff]  }
  0x75   :  { %1750 = vmatprep.subr.bf16.mxu1 %v3138_v3  ;;  %v3222_v3 = vld [vmem:[%s4603_s1 + $0x38c] ss:$16 sps:$4 sm:$0xff]  }
  0x77   :  { %1710 = vmatpush2.bf16.msra.mxu0 %v3133_v4  ;;  %v3217_v4 = vld [vmem:[%s4603_s1 + $0x188] ss:$16 sps:$4 sm:$0xff]  }
  0x78   :  { %1751 = vmatpush2.bf16.msra.mxu1 %v3136_v5  ;;  %1711 = vmatprep.subr.bf16.mxu0 %v3141_v6  ;;  %v3220_v5 = vld [vmem:[%s4603_s1 + $0x388] ss:$16 sps:$4 sm:$0xff]   ;;  %v3225_v6 = vld [vmem:[%s4603_s1 + $0x16c] ss:$16 sps:$4 sm:$0xff]  }
  0x79   :  { %1752 = vmatprep.subr.bf16.mxu1 %v3144_v7  ;;  %v3228_v7 = vld [vmem:[%s4603_s1 + $0x36c] ss:$16 sps:$4 sm:$0xff]  }
  0x7b   :  { %1712 = vmatpush2.bf16.msra.mxu0 %v3139_v10  ;;  %v3223_v10 = vld [vmem:[%s4603_s1 + $0x168] ss:$16 sps:$4 sm:$0xff]  }
  0x7c   :  { %1753 = vmatpush2.bf16.msra.mxu1 %v3142_v11  ;;  %1713 = vmatprep.subr.bf16.mxu0 %v3147_v12  ;;  %v3226_v11 = vld [vmem:[%s4603_s1 + $0x368] ss:$16 sps:$4 sm:$0xff]   ;;  %v3231_v12 = vld [vmem:[%s4603_s1 + $0x14c] ss:$16 sps:$4 sm:$0xff]  }
  0x7d   :  { %1754 = vmatprep.subr.bf16.mxu1 %v3150_v13  ;;  %v3234_v13 = vld [vmem:[%s4603_s1 + $0x34c] ss:$16 sps:$4 sm:$0xff]  }
  0x7f   :  { %1714 = vmatpush2.bf16.msra.mxu0 %v3145_v14  ;;  %v3229_v14 = vld [vmem:[%s4603_s1 + $0x148] ss:$16 sps:$4 sm:$0xff]  }
  0x80   :  { %1755 = vmatpush2.bf16.msra.mxu1 %v3148_v15  ;;  %1765 = vmatprep.subr.bf16.mxu0 %v3153_v18  ;;  %v3232_v15 = vld [vmem:[%s4603_s1 + $0x348] ss:$16 sps:$4 sm:$0xff]  }
  0x81   :  { %1806 = vmatprep.subr.bf16.mxu1 %v3156_v19  ;;  %v3235_v18 = vld [vmem:[%s4603_s1 + $0x128] ss:$16 sps:$4 sm:$0xff]  }
  0x82   :  { %1716 = vmatmul.mubr.bf16.vlgmr.msra.gmra.mxu0 %v3927_v20  ;;  %v3238_v19 = vld [vmem:[%s4603_s1 + $0x328] ss:$16 sps:$4 sm:$0xff]  }
  0x83   :  { %1757 = vmatmul.mubr.bf16.vlgmr.msra.gmra.mxu1 %v3929_v21  ;;  %1766 = vmatpush1.bf16.msra.mxu0 %v3151_v22  ;;  %v3243_v22 = vld [vmem:[%s4603_s1 + $0x10c] ss:$16 sps:$4 sm:$0xff]  }
  0x84   :  { %1807 = vmatpush1.bf16.msra.mxu1 %v3154_v23  ;;  %1767 = vmatprep.subr.bf16.mxu0 %v3159_v24  ;;  %v3246_v23 = vld [vmem:[%s4603_s1 + $0x30c] ss:$16 sps:$4 sm:$0xff]   ;;  %v3241_v24 = vld [vmem:[%s4603_s1 + $0x108] ss:$16 sps:$4 sm:$0xff]  }
  0x85   :  { %1808 = vmatprep.subr.bf16.mxu1 %v3162_v25  ;;  %1797 = vmatprep.mubr.bf16.mxu0 %v3642_v49  ;;  %v3174_v49 = vld [vmem:[%s4603_s1 + $0x28c] ss:$16 sps:$4 sm:$0xff]   ;;  %v3244_v25 = vld [vmem:[%s4603_s1 + $0x308] ss:$16 sps:$4 sm:$0xff]  }
  0x86   :  { %1838 = vmatprep.mubr.bf16.mxu1 %v3650_v52  ;;  %v3169_v52 = vld [vmem:[%s4603_s1 + $0x88] ss:$16 sps:$4 sm:$0xff]  }
  0x87   :  { %1768 = vmatpush1.bf16.msra.mxu0 %v3157_v26  ;;  %v3249_v26 = vld [vmem:[%s4603_s1 + $0x4ec] ss:$16 sps:$4 sm:$0xff]  }
  0x88   :  { %1809 = vmatpush1.bf16.msra.mxu1 %v3160_v27  ;;  %1769 = vmatprep.subr.bf16.mxu0 %v3165_v28  ;;  %v3252_v27 = vld [vmem:[%s4603_s1 + $0x6ec] ss:$16 sps:$4 sm:$0xff]   ;;  %v3247_v28 = vld [vmem:[%s4603_s1 + $0x4e8] ss:$16 sps:$4 sm:$0xff]  }
  0x89   :  { %1810 = vmatprep.subr.bf16.mxu1 %v3168_v29  ;;  %v3250_v29 = vld [vmem:[%s4603_s1 + $0x6e8] ss:$16 sps:$4 sm:$0xff]  }
  0x8b   :  { %1770 = vmatpush1.bf16.msra.mxu0 %v3163_v30  ;;  %v3255_v30 = vld [vmem:[%s4603_s1 + $0x4cc] ss:$16 sps:$4 sm:$0xff]  }
  0x8c   :  { %1811 = vmatpush1.bf16.msra.mxu1 %v3166_v31  ;;  %1771 = vmatprep.subr.bf16.mxu0 %v3171_v32  ;;  %v3258_v31 = vld [vmem:[%s4603_s1 + $0x6cc] ss:$16 sps:$4 sm:$0xff]   ;;  %v3253_v32 = vld [vmem:[%s4603_s1 + $0x4c8] ss:$16 sps:$4 sm:$0xff]  }
  0x8d   :  { %1812 = vmatprep.subr.bf16.mxu1 %v3174_v49  ;;  %v3256_v49 = vld [vmem:[%s4603_s1 + $0x6c8] ss:$16 sps:$4 sm:$0xff]  }
  0x8f   :  { %1772 = vmatpush1.bf16.msra.mxu0 %v3169_v52  ;;  %v3261_v52 = vld [vmem:[%s4603_s1 + $0x4ac] ss:$16 sps:$4 sm:$0xff]  }
  0x90   :  { %1813 = vmatpush1.bf16.msra.mxu1 %v3172_v33  ;;  %1773 = vmatprep.subr.bf16.mxu0 %v3177_v34  ;;  %v3264_v33 = vld [vmem:[%s4603_s1 + $0x6ac] ss:$16 sps:$4 sm:$0xff]   ;;  %v3259_v34 = vld [vmem:[%s4603_s1 + $0x4a8] ss:$16 sps:$4 sm:$0xff]  }
  0x91   :  { %1814 = vmatprep.subr.bf16.mxu1 %v3180_v35  ;;  %v3270_v35 = vld [vmem:[%s4603_s1 + $0x68c] ss:$16 sps:$4 sm:$0xff]  }
  0x93   :  { %1774 = vmatpush1.bf16.msra.mxu0 %v3175_v36  ;;  %v3265_v36 = vld [vmem:[%s4603_s1 + $0x488] ss:$16 sps:$4 sm:$0xff]  }
  0x94   :  { %1815 = vmatpush1.bf16.msra.mxu1 %v3178_v38  ;;  %1775 = vmatprep.subr.bf16.mxu0 %v3183_v39  ;;  %v3276_v38 = vld [vmem:[%s4603_s1 + $0x66c] ss:$16 sps:$4 sm:$0xff]   ;;  %v3271_v39 = vld [vmem:[%s4603_s1 + $0x468] ss:$16 sps:$4 sm:$0xff]  }
  0x95   :  { %1816 = vmatprep.subr.bf16.mxu1 %v3186_v41  ;;  %v3274_v41 = vld [vmem:[%s4603_s1 + $0x668] ss:$16 sps:$4 sm:$0xff]  }
  0x97   :  { %1776 = vmatpush1.bf16.msra.mxu0 %v3181_v42  ;;  %v3279_v42 = vld [vmem:[%s4603_s1 + $0x44c] ss:$16 sps:$4 sm:$0xff]  }
  0x98   :  { %1817 = vmatpush1.bf16.msra.mxu1 %v3184_v43  ;;  %1777 = vmatprep.subr.bf16.mxu0 %v3189_v44  ;;  %v3282_v43 = vld [vmem:[%s4603_s1 + $0x64c] ss:$16 sps:$4 sm:$0xff]   ;;  %v3277_v44 = vld [vmem:[%s4603_s1 + $0x448] ss:$16 sps:$4 sm:$0xff]  }
  0x99   :  { %1818 = vmatprep.subr.bf16.mxu1 %v3192_v45  ;;  %v3280_v45 = vld [vmem:[%s4603_s1 + $0x648] ss:$16 sps:$4 sm:$0xff]  }
  0x9b   :  { %1778 = vmatpush1.bf16.msra.mxu0 %v3187_v46  ;;  %v3285_v46 = vld [vmem:[%s4603_s1 + $0x42c] ss:$16 sps:$4 sm:$0xff]  }
  0x9c   :  { %1819 = vmatpush1.bf16.msra.mxu1 %v3190_v47  ;;  %1779 = vmatprep.subr.bf16.mxu0 %v3195_v48  ;;  %v3288_v47 = vld [vmem:[%s4603_s1 + $0x62c] ss:$16 sps:$4 sm:$0xff]   ;;  %v3283_v48 = vld [vmem:[%s4603_s1 + $0x428] ss:$16 sps:$4 sm:$0xff]  }
  0x9d   :  { %1820 = vmatprep.subr.bf16.mxu1 %v3198_v50  ;;  %v3286_v50 = vld [vmem:[%s4603_s1 + $0x628] ss:$16 sps:$4 sm:$0xff]  }
  0x9f   :  { %1780 = vmatpush1.bf16.msra.mxu0 %v3193_v51  ;;  %v3291_v51 = vld [vmem:[%s4603_s1 + $0x40c] ss:$16 sps:$4 sm:$0xff]  }
  0xa0   :  { %1821 = vmatpush1.bf16.msra.mxu1 %v3196_v53  ;;  %1781 = vmatprep.subr.bf16.mxu0 %v3201_v54  ;;  %v3294_v53 = vld [vmem:[%s4603_s1 + $0x60c] ss:$16 sps:$4 sm:$0xff]   ;;  %v3289_v54 = vld [vmem:[%s4603_s1 + $0x408] ss:$16 sps:$4 sm:$0xff]  }
  0xa1   :  { %1822 = vmatprep.subr.bf16.mxu1 %v3204_v55  ;;  %v3292_v55 = vld [vmem:[%s4603_s1 + $0x608] ss:$16 sps:$4 sm:$0xff]  }
  0xa3   :  { %1782 = vmatpush2.bf16.msra.mxu0 %v3199_v56  ;;  %v3297_v56 = vld [vmem:[%s4603_s1 + $0x5ec] ss:$16 sps:$4 sm:$0xff]  }
  0xa4   :  { %1823 = vmatpush2.bf16.msra.mxu1 %v3202_v57  ;;  %1783 = vmatprep.subr.bf16.mxu0 %v3207_v58  ;;  %v3300_v57 = vld [vmem:[%s4603_s1 + $0x7ec] ss:$16 sps:$4 sm:$0xff]   ;;  %v3295_v58 = vld [vmem:[%s4603_s1 + $0x5e8] ss:$16 sps:$4 sm:$0xff]  }
  0xa5   :  { %1824 = vmatprep.subr.bf16.mxu1 %v3210_v59  ;;  %v3298_v59 = vld [vmem:[%s4603_s1 + $0x7e8] ss:$16 sps:$4 sm:$0xff]  }
  0xa7   :  { %1784 = vmatpush2.bf16.msra.mxu0 %v3205_v60  ;;  %v3303_v60 = vld [vmem:[%s4603_s1 + $0x5cc] ss:$16 sps:$4 sm:$0xff]  }
  0xa8   :  { %1825 = vmatpush2.bf16.msra.mxu1 %v3208_v61  ;;  %1785 = vmatprep.subr.bf16.mxu0 %v3213_v62  ;;  %v3306_v61 = vld [vmem:[%s4603_s1 + $0x7cc] ss:$16 sps:$4 sm:$0xff]   ;;  %v3301_v62 = vld [vmem:[%s4603_s1 + $0x5c8] ss:$16 sps:$4 sm:$0xff]  }
  0xa9   :  { %1826 = vmatprep.subr.bf16.mxu1 %v3216_v63  ;;  %v3304_v63 = vld [vmem:[%s4603_s1 + $0x7c8] ss:$16 sps:$4 sm:$0xff]  }
  0xab   :  { %1786 = vmatpush2.bf16.msra.mxu0 %v3211_v0  ;;  %v3309_v0 = vld [vmem:[%s4603_s1 + $0x5ac] ss:$16 sps:$4 sm:$0xff]  }
  0xac   :  { %1827 = vmatpush2.bf16.msra.mxu1 %v3214_v1  ;;  %1787 = vmatprep.subr.bf16.mxu0 %v3219_v2  ;;  %v3312_v1 = vld [vmem:[%s4603_s1 + $0x7ac] ss:$16 sps:$4 sm:$0xff]   ;;  %v3307_v2 = vld [vmem:[%s4603_s1 + $0x5a8] ss:$16 sps:$4 sm:$0xff]  }
  0xad   :  { %1828 = vmatprep.subr.bf16.mxu1 %v3222_v3  ;;  %v3310_v3 = vld [vmem:[%s4603_s1 + $0x7a8] ss:$16 sps:$4 sm:$0xff]  }
  0xaf   :  { %1788 = vmatpush2.bf16.msra.mxu0 %v3217_v4  ;;  %v3315_v4 = vld [vmem:[%s4603_s1 + $0x58c] ss:$16 sps:$4 sm:$0xff]  }
  0xb0   :  { %1829 = vmatpush2.bf16.msra.mxu1 %v3220_v5  ;;  %1789 = vmatprep.subr.bf16.mxu0 %v3225_v6  ;;  %v3318_v5 = vld [vmem:[%s4603_s1 + $0x78c] ss:$16 sps:$4 sm:$0xff]   ;;  %v3313_v6 = vld [vmem:[%s4603_s1 + $0x588] ss:$16 sps:$4 sm:$0xff]  }
  0xb1   :  { %1830 = vmatprep.subr.bf16.mxu1 %v3228_v7  ;;  %v3316_v7 = vld [vmem:[%s4603_s1 + $0x788] ss:$16 sps:$4 sm:$0xff]  }
  0xb3   :  { %1790 = vmatpush2.bf16.msra.mxu0 %v3223_v10  ;;  %v3321_v10 = vld [vmem:[%s4603_s1 + $0x56c] ss:$16 sps:$4 sm:$0xff]  }
  0xb4   :  { %1831 = vmatpush2.bf16.msra.mxu1 %v3226_v11  ;;  %1791 = vmatprep.subr.bf16.mxu0 %v3231_v12  ;;  %v3324_v11 = vld [vmem:[%s4603_s1 + $0x76c] ss:$16 sps:$4 sm:$0xff]   ;;  %v3319_v12 = vld [vmem:[%s4603_s1 + $0x568] ss:$16 sps:$4 sm:$0xff]  }
  0xb5   :  { %1832 = vmatprep.subr.bf16.mxu1 %v3234_v13  ;;  %v3322_v13 = vld [vmem:[%s4603_s1 + $0x768] ss:$16 sps:$4 sm:$0xff]  }
  0xb7   :  { %1792 = vmatpush2.bf16.msra.mxu0 %v3229_v14  ;;  %v3327_v14 = vld [vmem:[%s4603_s1 + $0x54c] ss:$16 sps:$4 sm:$0xff]  }
  0xb8   :  { %1833 = vmatpush2.bf16.msra.mxu1 %v3232_v15  ;;  %1793 = vmatprep.subr.bf16.mxu0 %v3237_v16  ;;  %v3330_v15 = vld [vmem:[%s4603_s1 + $0x74c] ss:$16 sps:$4 sm:$0xff]   ;;  %v3325_v16 = vld [vmem:[%s4603_s1 + $0x548] ss:$16 sps:$4 sm:$0xff]  }
  0xb9   :  { %1834 = vmatprep.subr.bf16.mxu1 %v3240_v17  ;;  %v3328_v17 = vld [vmem:[%s4603_s1 + $0x748] ss:$16 sps:$4 sm:$0xff]  }
  0xbb   :  { %1794 = vmatpush2.bf16.msra.mxu0 %v3235_v18  ;;  %v3333_v18 = vld [vmem:[%s4603_s1 + $0x52c] ss:$16 sps:$4 sm:$0xff]  }
  0xbc   :  { %1835 = vmatpush2.bf16.msra.mxu1 %v3238_v19  ;;  %1795 = vmatprep.subr.bf16.mxu0 %v3243_v22  ;;  %v3336_v19 = vld [vmem:[%s4603_s1 + $0x72c] ss:$16 sps:$4 sm:$0xff]   ;;  %v3331_v22 = vld [vmem:[%s4603_s1 + $0x528] ss:$16 sps:$4 sm:$0xff]  }
  0xbd   :  { %1836 = vmatprep.subr.bf16.mxu1 %v3246_v23  ;;  %v3334_v23 = vld [vmem:[%s4603_s1 + $0x728] ss:$16 sps:$4 sm:$0xff]  }
  0xbf   :  { %1796 = vmatpush2.bf16.msra.mxu0 %v3241_v24  ;;  %v3339_v24 = vld [vmem:[%s4603_s1 + $0x50c] ss:$16 sps:$4 sm:$0xff]  }
  0xc0   :  { %1837 = vmatpush2.bf16.msra.mxu1 %v3244_v25  ;;  %1847 = vmatprep.subr.bf16.mxu0 %v3249_v26  ;;  %v3342_v25 = vld [vmem:[%s4603_s1 + $0x70c] ss:$16 sps:$4 sm:$0xff]   ;;  %v3337_v26 = vld [vmem:[%s4603_s1 + $0x508] ss:$16 sps:$4 sm:$0xff]  }
  0xc1   :  { %1888 = vmatprep.subr.bf16.mxu1 %v3252_v27  ;;  %v3340_v27 = vld [vmem:[%s4603_s1 + $0x708] ss:$16 sps:$4 sm:$0xff]  }
  0xc2   :  { %1798 = vmatmul.mubr.bf16.vlgmr.msra.gmra.mxu0 %v3711_v8  ;;  %v3262_v8 = vld [vmem:[%s4603_s1 + $0x6a8] ss:$16 sps:$4 sm:$0xff]  }
  0xc3   :  { %1839 = vmatmul.mubr.bf16.vlgmr.msra.gmra.mxu1 %v3713_v9  ;;  %1848 = vmatpush1.bf16.msra.mxu0 %v3247_v28  ;;  %v3267_v9 = vld [vmem:[%s4603_s1 + $0x48c] ss:$16 sps:$4 sm:$0xff]  }
  0xc4   :  { %1889 = vmatpush1.bf16.msra.mxu1 %v3250_v29  ;;  %1849 = vmatprep.subr.bf16.mxu0 %v3255_v30  ;;  %v3345_v28 = vld [vmem:[%s4605_s3 + $0x74] ss:$8 sps:$4 sm:$0xff]   ;;  %v3343_v29 = vld [vmem:[%s4605_s3 + $0x70] ss:$8 sps:$4 sm:$0xff]   ;;  %v3348_v30 = vld [vmem:[%s4605_s3 + $0x64] ss:$8 sps:$4 sm:$0xff]  }
  0xc5   :  { %1890 = vmatprep.subr.bf16.mxu1 %v3258_v31  ;;  %1879 = vmatprep.mubr.bf16.mxu0 %v3798_v37  ;;  %v3268_v37 = vld [vmem:[%s4603_s1 + $0x688] ss:$16 sps:$4 sm:$0xff]  }
  0xc6   :  { %1920 = vmatprep.mubr.bf16.mxu1 %v3806_v40  ;;  %v3273_v40 = vld [vmem:[%s4603_s1 + $0x46c] ss:$16 sps:$4 sm:$0xff]  }
  0xc7   :  { %1850 = vmatpush1.bf16.msra.mxu0 %v3253_v32 }
  0xc8   :  { %1891 = vmatpush1.bf16.msra.mxu1 %v3256_v49  ;;  %1851 = vmatprep.subr.bf16.mxu0 %v3261_v52  ;;  %v3346_v49 = vld [vmem:[%s4605_s3 + $0x60] ss:$8 sps:$4 sm:$0xff]  }
  0xc9   :  { %1892 = vmatprep.subr.bf16.mxu1 %v3264_v33 }
  0xcb   :  { %1852 = vmatpush1.bf16.msra.mxu0 %v3259_v34  ;;  %v3351_v34 = vld [vmem:[%s4605_s3 + $0x54] ss:$8 sps:$4 sm:$0xff]  }
  0xcc   :  { %1893 = vmatpush1.bf16.msra.mxu1 %v3262_v8  ;;  %1853 = vmatprep.subr.bf16.mxu0 %v3267_v9 }
  0xcd   :  { %1894 = vmatprep.subr.bf16.mxu1 %v3270_v35 }
  0xcf   :  { %1854 = vmatpush1.bf16.msra.mxu0 %v3265_v36  ;;  %v3354_v36 = vld [vmem:[%s4605_s3 + $0x44] ss:$8 sps:$4 sm:$0xff]  }
  0xd0   :  { %1895 = vmatpush1.bf16.msra.mxu1 %v3268_v37  ;;  %1855 = vmatprep.subr.bf16.mxu0 %v3273_v40  ;;  %v3391_v37 = vld [vmem:[%s4605_s3 + $0x170] ss:$8 sps:$4 sm:$0xff]   ;;  %v3393_v40 = vld [vmem:[%s4605_s3 + $0x174] ss:$8 sps:$4 sm:$0xff]  }
  0xd1   :  { %1896 = vmatprep.subr.bf16.mxu1 %v3276_v38  ;;  %v3396_v38 = vld [vmem:[%s4605_s3 + $0x164] ss:$8 sps:$4 sm:$0xff]  }
  0xd3   :  { %1856 = vmatpush1.bf16.msra.mxu0 %v3271_v39  ;;  %v3352_v39 = vld [vmem:[%s4605_s3 + $0x40] ss:$8 sps:$4 sm:$0xff]  }
  0xd4   :  { %1897 = vmatpush1.bf16.msra.mxu1 %v3274_v41  ;;  %1857 = vmatprep.subr.bf16.mxu0 %v3279_v42  ;;  %v3394_v41 = vld [vmem:[%s4605_s3 + $0x160] ss:$8 sps:$4 sm:$0xff]   ;;  %v3357_v42 = vld [vmem:[%s4605_s3 + $0x34] ss:$8 sps:$4 sm:$0xff]  }
  0xd5   :  { %1898 = vmatprep.subr.bf16.mxu1 %v3282_v43  ;;  %v3399_v43 = vld [vmem:[%s4605_s3 + $0x154] ss:$8 sps:$4 sm:$0xff]  }
  0xd7   :  { %1858 = vmatpush1.bf16.msra.mxu0 %v3277_v44  ;;  %v3355_v44 = vld [vmem:[%s4605_s3 + $0x30] ss:$8 sps:$4 sm:$0xff]  }
  0xd8   :  { %1899 = vmatpush1.bf16.msra.mxu1 %v3280_v45  ;;  %1859 = vmatprep.subr.bf16.mxu0 %v3285_v46  ;;  %v3397_v45 = vld [vmem:[%s4605_s3 + $0x150] ss:$8 sps:$4 sm:$0xff]   ;;  %v3360_v46 = vld [vmem:[%s4605_s3 + $0x24] ss:$8 sps:$4 sm:$0xff]  }
  0xd9   :  { %1900 = vmatprep.subr.bf16.mxu1 %v3288_v47  ;;  %v3402_v47 = vld [vmem:[%s4605_s3 + $0x144] ss:$8 sps:$4 sm:$0xff]  }
  0xdb   :  { %1860 = vmatpush1.bf16.msra.mxu0 %v3283_v48  ;;  %v3358_v48 = vld [vmem:[%s4605_s3 + $0x20] ss:$8 sps:$4 sm:$0xff]  }
  0xdc   :  { %1901 = vmatpush1.bf16.msra.mxu1 %v3286_v50  ;;  %1861 = vmatprep.subr.bf16.mxu0 %v3291_v51  ;;  %v3400_v50 = vld [vmem:[%s4605_s3 + $0x140] ss:$8 sps:$4 sm:$0xff]   ;;  %v3363_v51 = vld [vmem:[%s4605_s3 + $0x14] ss:$8 sps:$4 sm:$0xff]  }
  0xdd   :  { %1902 = vmatprep.subr.bf16.mxu1 %v3294_v53  ;;  %v3405_v53 = vld [vmem:[%s4605_s3 + $0x134] ss:$8 sps:$4 sm:$0xff]  }
  0xdf   :  { %1862 = vmatpush1.bf16.msra.mxu0 %v3289_v54  ;;  %v3361_v54 = vld [vmem:[%s4605_s3 + $0x10] ss:$8 sps:$4 sm:$0xff]  }
  0xe0   :  { %1903 = vmatpush1.bf16.msra.mxu1 %v3292_v55  ;;  %1863 = vmatprep.subr.bf16.mxu0 %v3297_v56  ;;  %v3403_v55 = vld [vmem:[%s4605_s3 + $0x130] ss:$8 sps:$4 sm:$0xff]   ;;  %v3366_v56 = vld [vmem:[%s4605_s3 + $0x4] ss:$8 sps:$4 sm:$0xff]  }
  0xe1   :  { %1904 = vmatprep.subr.bf16.mxu1 %v3300_v57  ;;  %v3408_v57 = vld [vmem:[%s4605_s3 + $0x124] ss:$8 sps:$4 sm:$0xff]  }
  0xe3   :  { %1864 = vmatpush2.bf16.msra.mxu0 %v3295_v58  ;;  %v3364_v58 = vld [vmem:[%s4605_s3] ss:$8 sps:$4 sm:$0xff]  }
  0xe4   :  { %1905 = vmatpush2.bf16.msra.mxu1 %v3298_v59  ;;  %1865 = vmatprep.subr.bf16.mxu0 %v3303_v60  ;;  %v3406_v59 = vld [vmem:[%s4605_s3 + $0x120] ss:$8 sps:$4 sm:$0xff]   ;;  %v3369_v60 = vld [vmem:[%s4605_s3 + $0xf4] ss:$8 sps:$4 sm:$0xff]  }
  0xe5   :  { %1906 = vmatprep.subr.bf16.mxu1 %v3306_v61  ;;  %v3411_v61 = vld [vmem:[%s4605_s3 + $0x114] ss:$8 sps:$4 sm:$0xff]  }
  0xe7   :  { %1866 = vmatpush2.bf16.msra.mxu0 %v3301_v62  ;;  %v3367_v62 = vld [vmem:[%s4605_s3 + $0xf0] ss:$8 sps:$4 sm:$0xff]  }
  0xe8   :  { %1907 = vmatpush2.bf16.msra.mxu1 %v3304_v63  ;;  %1867 = vmatprep.subr.bf16.mxu0 %v3309_v0  ;;  %v3409_v63 = vld [vmem:[%s4605_s3 + $0x110] ss:$8 sps:$4 sm:$0xff]   ;;  %v3372_v0 = vld [vmem:[%s4605_s3 + $0xe4] ss:$8 sps:$4 sm:$0xff]  }
  0xe9   :  { %1908 = vmatprep.subr.bf16.mxu1 %v3312_v1  ;;  %v3414_v1 = vld [vmem:[%s4605_s3 + $0x104] ss:$8 sps:$4 sm:$0xff]  }
  0xeb   :  { %1868 = vmatpush2.bf16.msra.mxu0 %v3307_v2  ;;  %v3370_v2 = vld [vmem:[%s4605_s3 + $0xe0] ss:$8 sps:$4 sm:$0xff]  }
  0xec   :  { %1909 = vmatpush2.bf16.msra.mxu1 %v3310_v3  ;;  %1869 = vmatprep.subr.bf16.mxu0 %v3315_v4  ;;  %v3412_v3 = vld [vmem:[%s4605_s3 + $0x100] ss:$8 sps:$4 sm:$0xff]   ;;  %v3375_v4 = vld [vmem:[%s4605_s3 + $0xd4] ss:$8 sps:$4 sm:$0xff]  }
  0xed   :  { %1910 = vmatprep.subr.bf16.mxu1 %v3318_v5  ;;  %v3417_v5 = vld [vmem:[%s4605_s3 + $0x1f4] ss:$8 sps:$4 sm:$0xff]  }
  0xef   :  { %1870 = vmatpush2.bf16.msra.mxu0 %v3313_v6  ;;  %v3373_v6 = vld [vmem:[%s4605_s3 + $0xd0] ss:$8 sps:$4 sm:$0xff]  }
  0xf0   :  { %1911 = vmatpush2.bf16.msra.mxu1 %v3316_v7  ;;  %1871 = vmatprep.subr.bf16.mxu0 %v3321_v10  ;;  %v3415_v7 = vld [vmem:[%s4605_s3 + $0x1f0] ss:$8 sps:$4 sm:$0xff]   ;;  %v3378_v10 = vld [vmem:[%s4605_s3 + $0xc4] ss:$8 sps:$4 sm:$0xff]  }
  0xf1   :  { %1912 = vmatprep.subr.bf16.mxu1 %v3324_v11  ;;  %v3420_v11 = vld [vmem:[%s4605_s3 + $0x1e4] ss:$8 sps:$4 sm:$0xff]  }
  0xf3   :  { %1872 = vmatpush2.bf16.msra.mxu0 %v3319_v12  ;;  %v3376_v12 = vld [vmem:[%s4605_s3 + $0xc0] ss:$8 sps:$4 sm:$0xff]  }
  0xf4   :  { %1913 = vmatpush2.bf16.msra.mxu1 %v3322_v13  ;;  %1873 = vmatprep.subr.bf16.mxu0 %v3327_v14  ;;  %v3418_v13 = vld [vmem:[%s4605_s3 + $0x1e0] ss:$8 sps:$4 sm:$0xff]   ;;  %v3381_v14 = vld [vmem:[%s4605_s3 + $0xb4] ss:$8 sps:$4 sm:$0xff]  }
  0xf5   :  { %1914 = vmatprep.subr.bf16.mxu1 %v3330_v15  ;;  %v3423_v15 = vld [vmem:[%s4605_s3 + $0x1d4] ss:$8 sps:$4 sm:$0xff]  }
  0xf7   :  { %1874 = vmatpush2.bf16.msra.mxu0 %v3325_v16  ;;  %v301_v16 = vlaneseq }
  0xf8   :  { %1915 = vmatpush2.bf16.msra.mxu1 %v3328_v17  ;;  %1875 = vmatprep.subr.bf16.mxu0 %v3333_v18  ;;  %v3379_v17 = vld [vmem:[%s4605_s3 + $0xb0] ss:$8 sps:$4 sm:$0xff]  }
  0xf9   :  { %1916 = vmatprep.subr.bf16.mxu1 %v3336_v19  ;;  %v3421_v18 = vld [vmem:[%s4605_s3 + $0x1d0] ss:$8 sps:$4 sm:$0xff]   ;;  %v3384_v19 = vld [vmem:[%s4605_s3 + $0xa4] ss:$8 sps:$4 sm:$0xff]  }
  0xfb   :  { %1876 = vmatpush2.bf16.msra.mxu0 %v3331_v22  ;;  %v3426_v22 = vld [vmem:[%s4605_s3 + $0x1c4] ss:$8 sps:$4 sm:$0xff]  }
  0xfc   :  { %1917 = vmatpush2.bf16.msra.mxu1 %v3334_v23  ;;  %1877 = vmatprep.subr.bf16.mxu0 %v3339_v24  ;;  %v4477_v23 = vshrl.u32 %v301_v16, 7  ;;  %v3382_v24 = vld [vmem:[%s4605_s3 + $0xa0] ss:$8 sps:$4 sm:$0xff]   ;;  %v3450_v16 = vld [vmem:[%s4607_s5 + $0x10] sm:$0xff]  }
  0xfd   :  { %1918 = vmatprep.subr.bf16.mxu1 %v3342_v25  ;;  %v3424_v25 = vld [vmem:[%s4605_s3 + $0x1c0] ss:$8 sps:$4 sm:$0xff]  }
  0xff   :  { %1878 = vmatpush2.bf16.msra.mxu0 %v3337_v26  ;;  %v3387_v26 = vld [vmem:[%s4605_s3 + $0x94] ss:$8 sps:$4 sm:$0xff]  }
 0x100   :  { %1919 = vmatpush2.bf16.msra.mxu1 %v3340_v27  ;;  %2333 = vmatprep.subr.bf16.mxu0 %v3345_v28  ;;  %v3429_v27 = vld [vmem:[%s4605_s3 + $0x1b4] ss:$8 sps:$4 sm:$0xff]   ;;  %v303_v28 = vsub.s32 0, %v4477_v23 }
 0x101   :  { %2374 = vmatprep.subr.bf16.mxu1 %v3393_v40 }
 0x102   :  { %v4326_v31 = vpop.f32.mrf.mxu0  ;;  %1880 = vmatmul.mubr.bf16.vlgmr.msra.gmra.mxu0 %v3927_v20  ;;  %v3349_v20 = vld [vmem:[%s4605_s3 + $0x50] ss:$8 sps:$4 sm:$0xff]  }
 0x103   :  { %v4328_v32 = vpop.f32.mrf.mxu1  ;;  %1921 = vmatmul.mubr.bf16.vlgmr.msra.gmra.mxu1 %v3929_v21  ;;  %2334 = vmatpush1.bf16.msra.mxu0 %v3343_v29  ;;  %v4495_v29 = vld [vmem:[%s4606_s2] sm:$0xf] }
 0x104   :  { %v4335_v52 = vpop.f32.mrf.mxu0  ;;  %2335 = vmatprep.subr.bf16.mxu0 %v3348_v30  ;;  %2375 = vmatpush1.bf16.msra.mxu1 %v3391_v37  ;;  %v307_v30 = vsub.s32 1, %v4477_v23  ;;  %v3432_v37 = vld [vmem:[%s4605_s3 + $0x1a4] ss:$8 sps:$4 sm:$0xff]  }
 0x105   :  { %v4337_v33 = vpop.f32.mrf.mxu1  ;;  %2376 = vmatprep.subr.bf16.mxu1 %v3396_v38  ;;  %v3430_v38 = vld [vmem:[%s4605_s3 + $0x1a0] ss:$8 sps:$4 sm:$0xff]  }
 0x106   :  { %v1639_v8 = vpop.f32.mrf.mxu0 }
 0x107   :  { %v1680_v9 = vpop.f32.mrf.mxu1  ;;  %2336 = vmatpush1.bf16.msra.mxu0 %v3346_v49  ;;  %v3385_v49 = vld [vmem:[%s4605_s3 + $0x90] ss:$8 sps:$4 sm:$0xff]   ;;  %v3390_v8 = vld [vmem:[%s4605_s3 + $0x84] ss:$8 sps:$4 sm:$0xff]  }
 0x108   :  { %v1640_v21 = vpop.f32.mrf.mxu0  ;;  %2337 = vmatprep.subr.bf16.mxu0 %v3351_v34  ;;  %2377 = vmatpush1.bf16.msra.mxu1 %v3394_v41  ;;  %v3427_v34 = vld [vmem:[%s4605_s3 + $0x1b0] ss:$8 sps:$4 sm:$0xff]   ;;  %v304_v9 = vrot.slane %v4495_v29, %v303_v28 }
 0x109   :  { %v1681_v35 = vpop.f32.mrf.mxu1  ;;  %2378 = vmatprep.subr.bf16.mxu1 %v3399_v43  ;;  %v3388_v21 = vld [vmem:[%s4605_s3 + $0x80] ss:$8 sps:$4 sm:$0xff]  }
 0x10a   :  { %v1636_v35 = vadd.f32 %v4326_v31, %v304_v9 }
 0x10b   :  { %2338 = vmatpush1.bf16.msra.mxu0 %v3349_v20  ;;  %v308_v20 = vrot.slane %v4495_v29, %v307_v30 }
 0x10c   :  { %2339 = vmatprep.subr.bf16.mxu0 %v3354_v36  ;;  %2379 = vmatpush1.bf16.msra.mxu1 %v3397_v45  ;;  %v1677_v40 = vadd.f32 %v4328_v32, %v1636_v35  ;;  %v3433_v32 = vld [vmem:[%s4605_s3 + $0x190] ss:$8 sps:$4 sm:$0xff]  }
 0x10d   :  { %2380 = vmatprep.subr.bf16.mxu1 %v3402_v47  ;;  %v1638_v36 = vadd.f32 %v4335_v52, %v308_v20 }
 0x10f   :  { %2340 = vmatpush1.bf16.msra.mxu0 %v3352_v39 }
 0x110   :  { %2341 = vmatprep.subr.bf16.mxu0 %v3357_v42  ;;  %2381 = vmatpush1.bf16.msra.mxu1 %v3400_v50  ;;  %v1679_v42 = vadd.f32 %v4337_v33, %v1638_v36 }
 0x111   :  { %2382 = vmatprep.subr.bf16.mxu1 %v3405_v53 }
 0x113   :  { %2342 = vmatpush1.bf16.msra.mxu0 %v3355_v44  ;;  %v3435_v44 = vld [vmem:[%s4605_s3 + $0x194] ss:$8 sps:$4 sm:$0xff]  }
 0x114   :  { %2343 = vmatprep.subr.bf16.mxu0 %v3360_v46  ;;  %2383 = vmatpush1.bf16.msra.mxu1 %v3403_v55 }
 0x115   :  { %2384 = vmatprep.subr.bf16.mxu1 %v3408_v57 }
 0x117   :  { %2344 = vmatpush1.bf16.msra.mxu0 %v3358_v48 }
 0x118   :  { %2345 = vmatprep.subr.bf16.mxu0 %v3363_v51  ;;  %2385 = vmatpush1.bf16.msra.mxu1 %v3406_v59 }
 0x119   :  { %2386 = vmatprep.subr.bf16.mxu1 %v3411_v61 }
 0x11b   :  { %2346 = vmatpush1.bf16.msra.mxu0 %v3361_v54  ;;  %v3438_v54 = vld [vmem:[%s4605_s3 + $0x184] ss:$8 sps:$4 sm:$0xff]  }
 0x11c   :  { %2347 = vmatprep.subr.bf16.mxu0 %v3366_v56  ;;  %2387 = vmatpush1.bf16.msra.mxu1 %v3409_v63  ;;  %v3436_v56 = vld [vmem:[%s4605_s3 + $0x180] ss:$8 sps:$4 sm:$0xff]  }
 0x11d   :  { %2388 = vmatprep.subr.bf16.mxu1 %v3414_v1 }
 0x11f   :  { %2348 = vmatpush1.bf16.msra.mxu0 %v3364_v58 }
 0x120   :  { %2349 = vmatprep.subr.bf16.mxu0 %v3369_v60  ;;  %2389 = vmatpush1.bf16.msra.mxu1 %v3412_v3  ;;  %v3439_v3 = vld [vmem:[%s4607_s5 + $0x78] sm:$0xff]  }
 0x121   :  { %2390 = vmatprep.subr.bf16.mxu1 %v3417_v5  ;;  %v3441_v5 = vld [vmem:[%s4607_s5 + $0x70] sm:$0xff]  }
 0x123   :  { %2350 = vmatpush2.bf16.msra.mxu0 %v3367_v62 }
 0x124   :  { %2351 = vmatprep.subr.bf16.mxu0 %v3372_v0  ;;  %2391 = vmatpush2.bf16.msra.mxu1 %v3415_v7  ;;  %v3443_v7 = vld [vmem:[%s4607_s5 + $0x68] sm:$0xff]  }
 0x125   :  { %2392 = vmatprep.subr.bf16.mxu1 %v3420_v11  ;;  %v3445_v11 = vld [vmem:[%s4607_s5 + $0x60] sm:$0xff]  }
 0x127   :  { %2352 = vmatpush2.bf16.msra.mxu0 %v3370_v2 }
 0x128   :  { %2353 = vmatprep.subr.bf16.mxu0 %v3375_v4  ;;  %2393 = vmatpush2.bf16.msra.mxu1 %v3418_v13  ;;  %v3440_v4 = vld [vmem:[%s4607_s5 + $0x38] sm:$0xff]  }
 0x129   :  { %2394 = vmatprep.subr.bf16.mxu1 %v3423_v15  ;;  %v3447_v13 = vld [vmem:[%s4607_s5 + $0x58] sm:$0xff]   ;;  %v3449_v15 = vld [vmem:[%s4607_s5 + $0x50] sm:$0xff]  }
 0x12b   :  { %2354 = vmatpush2.bf16.msra.mxu0 %v3373_v6  ;;  %v3442_v6 = vld [vmem:[%s4607_s5 + $0x30] sm:$0xff]  }
 0x12c   :  { %2355 = vmatprep.subr.bf16.mxu0 %v3378_v10  ;;  %2395 = vmatpush2.bf16.msra.mxu1 %v3421_v18  ;;  %v3444_v10 = vld [vmem:[%s4607_s5 + $0x28] sm:$0xff]   ;;  %v315_v18 = vsub.s32 3, %v4477_v23 }
 0x12d   :  { %2396 = vmatprep.subr.bf16.mxu1 %v3426_v22 }
 0x12e   :  { %v316_v22 = vrot.slane %v4495_v29, %v315_v18 }
 0x12f   :  { %2356 = vmatpush2.bf16.msra.mxu0 %v3376_v12  ;;  %v3446_v12 = vld [vmem:[%s4607_s5 + $0x20] sm:$0xff]  }
 0x130   :  { %2357 = vmatprep.subr.bf16.mxu0 %v3381_v14  ;;  %2397 = vmatpush2.bf16.msra.mxu1 %v3424_v25  ;;  %v3448_v14 = vld [vmem:[%s4607_s5 + $0x18] sm:$0xff]  }
 0x131   :  { %2398 = vmatprep.subr.bf16.mxu1 %v3429_v27 }
 0x133   :  { %2358 = vmatpush2.bf16.msra.mxu0 %v3379_v17  ;;  %v311_v17 = vsub.s32 2, %v4477_v23  ;;  %v2920_v23 = vld [vmem:[%s4609_s6] ss:$0 sm:$0xff] }
 0x134   :  { %2359 = vmatprep.subr.bf16.mxu0 %v3384_v19  ;;  %2399 = vmatpush2.bf16.msra.mxu1 %v3427_v34 }
 0x135   :  { %2400 = vmatprep.subr.bf16.mxu1 %v3432_v37  ;;  %v312_v19 = vrot.slane %v4495_v29, %v311_v17 }
 0x137   :  { %2360 = vmatpush2.bf16.msra.mxu0 %v3382_v24 }
 0x138   :  { %2361 = vmatprep.subr.bf16.mxu0 %v3387_v26  ;;  %2401 = vmatpush2.bf16.msra.mxu1 %v3430_v38 }
 0x139   :  { %2402 = vmatprep.subr.bf16.mxu1 %v3435_v44  ;;  %v3452_v44 = vld [vmem:[%s4607_s5 + $0x8] sm:$0xff]  }
 0x13b   :  { %2362 = vmatpush2.bf16.msra.mxu0 %v3385_v49 }
 0x13c   :  { %2363 = vmatprep.subr.bf16.mxu0 %v3390_v8  ;;  %2403 = vmatpush2.bf16.msra.mxu1 %v3433_v32  ;;  %v3453_v32 = vld [vmem:[%s4607_s5 + $0x40] sm:$0xff]  }
 0x13d   :  { %2404 = vmatprep.subr.bf16.mxu1 %v3438_v54 }
 0x13f   :  { %2364 = vmatpush2.bf16.msra.mxu0 %v3388_v21 }
 0x140   :  { %2405 = vmatpush2.bf16.msra.mxu1 %v3436_v56  ;;  %2937 = vmatprep.subr.bf16.mxu0 %v3439_v3 }
 0x142   :  { %v1717_v39 = vpop.f32.mrf.mxu0 }
 0x143   :  { %v1758_v41 = vpop.f32.mrf.mxu1  ;;  %v1718_v43 = vadd.f32 %v1717_v39, %v1677_v40 }
 0x144   :  { %v1719_v31 = vpop.f32.mrf.mxu0 }
 0x145   :  { %v1760_v52 = vpop.f32.mrf.mxu1  ;;  %v1759_v45 = vadd.f32 %v1758_v41, %v1718_v43  ;;  %v1720_v46 = vadd.f32 %v1719_v31, %v1679_v42 }
 0x146   :  { %v1721_v47 = vpop.f32.mrf.mxu0 }
 0x147   :  { %v1762_v48 = vpop.f32.mrf.mxu1  ;;  %v1761_v50 = vadd.f32 %v1760_v52, %v1720_v46  ;;  %v1929_v33 = vmax.f32 %v1759_v45, 0.0  ;;  %v3451_v52 = vld [vmem:[%s4607_s5 + $0x48] sm:$0xff]   ;;  %v3454_v47 = vld [vmem:[%s4607_s5] sm:$0xff]  }
 0x148   :  { %v1722_v51 = vpop.f32.mrf.mxu0 }
 0x149   :  { %v1763_v53 = vpop.f32.mrf.mxu1  ;;  %v1930_v55 = vmax.f32 %v1761_v50, 0.0  ;;  %v1933_v58 = vpack.c.bf16 %v1929_v33, %v1929_v33  ;;  %v2001_v50 = vld [vmem:[%s4608_s4] sm:$0x3] }
 0x14a   :  { %v2006_v33 = vrot.slane %v2001_v50, %v303_v28  ;;  %v2010_v51 = vrot.slane %v2001_v50, %v307_v30 }
 0x14b   :  { %v1934_v57 = vpack.c.bf16 %v1930_v55, %v1930_v55 }
 0x14d   :  { %2365 = vmatprep.mubr.bf16.mxu0 %v1934_v57 }
 0x14e   :  { %2366 = vmatmul.mubr.bf16.vlgmr.msra.gmra.mxu0 %v1933_v58 }
 0x14f   :  { %2938 = vmatpush3.bf16.msra.mxu0 %v3440_v4 }
 0x150   :  { %2939 = vmatprep.subr.bf16.mxu0 %v3441_v5 }
 0x153   :  { %2940 = vmatpush3.bf16.msra.mxu0 %v3442_v6 }
 0x154   :  { %2941 = vmatprep.subr.bf16.mxu0 %v3443_v7 }
 0x157   :  { %2942 = vmatpush3.bf16.msra.mxu0 %v3444_v10 }
 0x158   :  { %2943 = vmatprep.subr.bf16.mxu0 %v3445_v11 }
 0x15b   :  { %2944 = vmatpush3.bf16.msra.mxu0 %v3446_v12 }
 0x15c   :  { %2945 = vmatprep.subr.bf16.mxu0 %v3447_v13 }
 0x15f   :  { %2946 = vmatpush3.bf16.msra.mxu0 %v3448_v14 }
 0x160   :  { %2947 = vmatprep.subr.bf16.mxu0 %v3449_v15 }
 0x163   :  { %2948 = vmatpush3.bf16.msra.mxu0 %v3450_v16 }
 0x164   :  { %2949 = vmatprep.subr.bf16.mxu0 %v3451_v52 }
 0x167   :  { %2950 = vmatpush3.bf16.msra.mxu0 %v3452_v44 }
 0x168   :  { %2951 = vmatprep.subr.bf16.mxu0 %v3453_v32 }
 0x16b   :  { %2952 = vmatpush3.bf16.msra.mxu0 %v3454_v47 }
 0x182   :  { %v1799_v59 = vpop.f32.mrf.mxu0 }
 0x183   :  { %v1840_v60 = vpop.f32.mrf.mxu1  ;;  %v1800_v24 = vadd.f32 %v1799_v59, %v312_v19 }
 0x184   :  { %v1801_v61 = vpop.f32.mrf.mxu0 }
 0x185   :  { %v1842_v62 = vpop.f32.mrf.mxu1  ;;  %v1802_v25 = vadd.f32 %v1801_v61, %v316_v22  ;;  %v1841_v26 = vadd.f32 %v1840_v60, %v1800_v24 }
 0x186   :  { %v1803_v63 = vpop.f32.mrf.mxu0 }
 0x187   :  { %v1844_v0 = vpop.f32.mrf.mxu1  ;;  %v1843_v34 = vadd.f32 %v1842_v62, %v1802_v25 }
 0x188   :  { %v1804_v1 = vpop.f32.mrf.mxu0 }
 0x189   :  { %v1845_v2 = vpop.f32.mrf.mxu1 }
 0x1c2   :  { %v1881_v27 = vpop.f32.mrf.mxu0 }
 0x1c3   :  { %v1922_v49 = vpop.f32.mrf.mxu1  ;;  %v1882_v8 = vadd.f32 %v1881_v27, %v1841_v26 }
 0x1c4   :  { %v1883_v9 = vpop.f32.mrf.mxu0 }
 0x1c5   :  { %v1924_v20 = vpop.f32.mrf.mxu1  ;;  %v1923_v21 = vadd.f32 %v1922_v49, %v1882_v8  ;;  %v1884_v35 = vadd.f32 %v1883_v9, %v1843_v34 }
 0x1c6   :  { %v1885_v36 = vpop.f32.mrf.mxu0 }
 0x1c7   :  { %v1926_v37 = vpop.f32.mrf.mxu1  ;;  %v1925_v40 = vadd.f32 %v1924_v20, %v1884_v35  ;;  %v1931_v38 = vmax.f32 %v1923_v21, 0.0 }
 0x1c8   :  { %v1886_v39 = vpop.f32.mrf.mxu0 }
 0x1c9   :  { %v1927_v41 = vpop.f32.mrf.mxu1  ;;  %v1932_v42 = vmax.f32 %v1925_v40, 0.0  ;;  %v1935_v29 = vpack.c.bf16 %v1931_v38, %v1931_v38 }
 0x1cb   :  { %v1936_v43 = vpack.c.bf16 %v1932_v42, %v1932_v42 }
 0x1cd   :  { %2406 = vmatprep.mubr.bf16.mxu1 %v1936_v43 }
 0x1ce   :  { %2407 = vmatmul.mubr.bf16.vlgmr.msra.gmra.mxu1 %v1935_v29 }
 0x20e   :  { %v2367_v31 = vpop.f32.mrf.mxu0 }
 0x20f   :  { %v2368_v53 = vadd.f32 %v2367_v31, %v2006_v33 }
 0x210   :  { %v2369_v45 = vpop.f32.mrf.mxu0 }
 0x211   :  { %v2370_v55 = vadd.f32 %v2369_v45, %v2010_v51 }
 0x212   :  { %v2371_v46 = vpop.f32.mrf.mxu0 }
 0x214   :  { %v2372_v48 = vpop.f32.mrf.mxu0 }
 0x28e   :  { %v2408_v54 = vpop.f32.mrf.mxu1 }
 0x28f   :  { %v2409_v56 = vadd.f32 %v2408_v54, %v2368_v53 }
 0x290   :  { %v2410_v57 = vpop.f32.mrf.mxu1 }
 0x291   :  { %v2411_v58 = vadd.f32 %v2410_v57, %v2370_v55  ;;  %v2415_v59 = vmax.f32 %v2409_v56, 0.0 }
 0x292   :  { %v2412_v60 = vpop.f32.mrf.mxu1 }
 0x293   :  { %v2416_v61 = vmax.f32 %v2411_v58, 0.0  ;;  %v2417_v0 = vpack.c.bf16 %v2415_v59, %v2415_v59 }
 0x294   :  { %v2413_v62 = vpop.f32.mrf.mxu1 }
 0x295   :  { %v2418_v63 = vpack.c.bf16 %v2416_v61, %v2416_v61 }
 0x297   :  { %2586 = vmatprep.mubr.bf16.mxu0 %v2418_v63 }
 0x298   :  { %2587 = vmatmul.mubr.bf16.vlgmr.msra.gmra.mxu0 %v2417_v0 }
 0x358   :  { %v2953_v1 = vpop.f32.mrf.mxu0 }
 0x35a   :  { %v2954_v28 = vpop.f32.mrf.mxu0 }
 0x35b   :  { %v2955_v30 = vadd.f32 %v2954_v28, %v2953_v1 }
 0x35c   :  { %v2956_v2 = vpop.f32.mrf.mxu0 }
 0x35d   :  { %v2589_v3 = vadd.f32 %v2955_v30, %v2920_v23 }
 0x35e   :  { %v2957_v4 = vpop.f32.mrf.mxu0 }
 0x35f   :  { %2595 = vst.msk [vmem:[%s4610_s7] sm:$0xff] %vm2594_vm0, %v2589_v3 }

// kernel: pointnet_cls_forward.6
= control target key start
LH: loop header
LB: loop body
LE: loop exit
PB: predicated region body
PF: predicated region fallthrough
CT: control target
= control target key end

     0   :  { %s1446_s24 = smov 0   ;;  %s1448_s25 = smov 0   ;;  %s1728_s0 = inlined_call_operand.vmem [shape: f32[2,16,3], index: 0, kind: input, shape index: {}]   ;;  %s1729_s1 = inlined_call_operand.vmem [shape: f32[2,3,64], index: 1, kind: input, shape index: {}]   ;;  %s1730_s2 = inlined_call_operand.vmem [shape: f32[1,64], index: 2, kind: input, shape index: {}]   ;;  %s1731_s3 = inlined_call_operand.vmem [shape: bf16[64,128], index: 3, kind: input, shape index: {}]   ;;  %s1732_s4 = inlined_call_operand.vmem [shape: f32[1,128], index: 4, kind: input, shape index: {}]   ;;  %s1733_s5 = inlined_call_operand.vmem [shape: bf16[128,1024], index: 5, kind: input, shape index: {}]   ;;  %s1734_s6 = inlined_call_operand.vmem [shape: f32[1,1024], index: 6, kind: input, shape index: {}]   ;;  %s1735_s7 = inlined_call_operand.vmem [shape: f32[2,1,1024], index: 7, kind: output, shape index: {}]  }
   0x1   :  { %s1450_s26 = smov 0  }
   0x2 LB: > { %s29_s27 = sadd.s32 1, %s1394_s25  ;;  %p1241_p0 = scmp.ge.s32.totalorder %s1398_s26, 1  ;;  %s1398_s26 = sphi %s1450_s26, %s17_s26   ;;  %s1394_s25 = sphi %s1448_s25, %s1737_s25   ;;  %s1390_s24 = sphi %s1446_s24, %s1736_s24  }
   0x3   : > { %p31_p1 = scmp.ge.s32.totalorder %s29_s27, 2  ;;  %p265_p2 = scmp.lt.s32.totalorder %s1398_s26, 3 }
   0x5   : > { %s1739_s27 = smov (%p31_p1, %s29_s27), 0  ;;  %p266_p3 = pnand %p1241_p0, %p265_p2 }
   0x6   : > { %p305_p4 = scmp.lt.s32.totalorder (!%p266_p3), %s1390_s24, 1 }
   0x7   : > { %269 = sbr.rel (%p266_p3) target bundleno = 620 (0x26c), region = 48 }
   0xc   : > { %v1400_v0 = vmov 1   ;;  %v1401_v1 = vmov 0   ;;  %s1741_s24 = smov (!%p305_p4, %s1390_s24), 1  ;;  %v1372_v2 = vld [vmem:[%s1731_s3 + $0x18] sm:$0xff]   ;;  %v1402_v4 = vmov 0.0   ;;  %v1373_v6 = vld [vmem:[%s1731_s3 + $0x10] sm:$0xff]   ;;  %v341_v38 = vlaneseq }
   0xd   : > { %1369 = vset.pattern.permute.xlu1 %v1400_v0  ;;  %1368 = vset.pattern.permute.xlu0 %v1401_v1  ;;  %s1319_s28 = sshll.u32 %s1741_s24, 4  ;;  %v1374_v7 = vld [vmem:[%s1731_s3 + $0x8] sm:$0xff]   ;;  %v1403_v8 = vmov 2   ;;  %v1375_v9 = vld [vmem:[%s1731_s3] sm:$0xff]   ;;  %vm1404_vm0 = vmmov 0   ;;  %s1244_s30 = sshll.u32 %s1741_s24, 2 }
   0xe   : > { %894 = vmatprep.mubr.bf16.mxu1 %v1401_v1  ;;  %s312_s8 = scalar_lea.vmem %s1728_s0, %s1319_s28  ;;  %1325 = vmatprep.subr.bf16.mxu0 %v1402_v4  ;;  %v534_v10 = vld [vmem:[%s1733_s5 + $0x1c0] sm:$0xff]  ;;  %v1493_v12 = vld [vmem:[%s1733_s5 + $0x1c8] sm:$0xff]  ;;  %v1535_v39 = vshrl.u32 %v341_v38, 7  ;;  %s317_s10 = scalar_lea.vmem %s1729_s1, %s1244_s30  ;;  %vm430_vm1 = vcmask 523264  }
   0xf   : > { %v328_v3 = vld [vmem:[%s312_s8] sm:$0xff]  ;;  %v329_v5 = vld [vmem:[%s312_s8 + $0x8] sm:$0xff]  ;;  %1326 = vmatpush3.bf16.msra.mxu0 %v1372_v2  ;;  %1333 = vmatprep.mubr.msk.bf16.mxu0 %vm1404_vm0, %v1402_v4  ;;  %s1245_s20 = sshll.u32 %s1741_s24, 3 }
  0x10   : > { %348 = vperm.xlu1 %1369, %v328_v3   ;;  %333 = vperm.xlu0 %1368, %v328_v3   ;;  %v538_v11 = vld [vmem:[%s1733_s5 + $0x1e0] sm:$0xff]  ;;  %v1498_v14 = vld [vmem:[%s1733_s5 + $0x1e8] sm:$0xff]  ;;  %v357_v40 = vsub.s32 1, %v1535_v39  ;;  %v343_v41 = vsub.s32 0, %v1535_v39  ;;  %v373_v45 = vsub.s32 2, %v1535_v39  ;;  %s321_s29 = scalar_lea.vmem %s1735_s7, %s1245_s20 }
  0x11   : > { %1327 = vmatprep.subr.bf16.mxu0 %v1402_v4  ;;  %v1310_v13 = vcombine.high %v534_v10, %v538_v11  ;;  %v1309_v15 = vcombine.low %v534_v10, %v538_v11  ;;  %v526_v16 = vld [vmem:[%s1733_s5 + $0x180] sm:$0xff]  ;;  %v1311_v18 = vcombine.low %v1493_v12, %v1498_v14  ;;  %v1312_v19 = vcombine.high %v1493_v12, %v1498_v14  ;;  %v523_v10 = vld [vmem:[%s1733_s5 + $0x168] sm:$0xff] }
  0x12   : > { %v530_v17 = vld [vmem:[%s1733_s5 + $0x1a0] sm:$0xff]  ;;  %v503_v12 = vld [vmem:[%s1733_s5 + $0xc8] sm:$0xff] }
  0x13   : > { %1328 = vmatpush3.bf16.msra.mxu0 %v1373_v6  ;;  %v1302_v20 = vcombine.high %v526_v16, %v530_v17  ;;  %862 = vmatprep.subr.bf16.mxu1 %v1310_v13  ;;  %v1301_v21 = vcombine.low %v526_v16, %v530_v17  ;;  %v518_v22 = vld [vmem:[%s1733_s5 + $0x140] sm:$0xff]  ;;  %v515_v16 = vld [vmem:[%s1733_s5 + $0x128] sm:$0xff] }
  0x14   : > { %352 = vperm.xlu1 %1369, %v329_v5   ;;  %338 = vperm.xlu0 %1368, %v329_v5   ;;  %v522_v23 = vld [vmem:[%s1733_s5 + $0x160] sm:$0xff]  ;;  %v507_v14 = vld [vmem:[%s1733_s5 + $0xe8] sm:$0xff] }
  0x15   : > { %1329 = vmatprep.subr.bf16.mxu0 %v1402_v4  ;;  %863 = vmatpush1.bf16.msra.mxu1 %v1309_v15  ;;  %v1294_v24 = vcombine.high %v518_v22, %v522_v23  ;;  %v1293_v25 = vcombine.low %v518_v22, %v522_v23  ;;  %v510_v26 = vld [vmem:[%s1733_s5 + $0x100] sm:$0xff]  ;;  %v511_v15 = vld [vmem:[%s1733_s5 + $0x108] sm:$0xff]  ;;  %v1279_v23 = vcombine.low %v503_v12, %v507_v14 }
  0x16   : > { %864 = vmatprep.subr.bf16.mxu1 %v1302_v20  ;;  %v514_v27 = vld [vmem:[%s1733_s5 + $0x120] sm:$0xff]  ;;  %v1280_v20 = vcombine.high %v503_v12, %v507_v14  ;;  %v499_v22 = vld [vmem:[%s1733_s5 + $0xa8] sm:$0xff] }
  0x17   : > { %1330 = vmatpush3.bf16.msra.mxu0 %v1374_v7  ;;  %v1286_v28 = vcombine.high %v510_v26, %v514_v27  ;;  %v1285_v29 = vcombine.low %v510_v26, %v514_v27  ;;  %v502_v30 = vld [vmem:[%s1733_s5 + $0xc0] sm:$0xff]  ;;  %v483_v38 = vld [vmem:[%s1733_s5 + $0x28] sm:$0xff] }
  0x18   : > { %1371 = vset.pattern.permute.xlu1 %v1403_v8  ;;  %1370 = vset.pattern.permute.xlu0 %v1403_v8  ;;  %v506_v31 = vld [vmem:[%s1733_s5 + $0xe0] sm:$0xff] }
  0x19   : > { %368 = vperm.xlu1 %1371, %v329_v5   ;;  %364 = vperm.xlu0 %1370, %v328_v3   ;;  %v1278_v32 = vcombine.high %v502_v30, %v506_v31  ;;  %v1277_v33 = vcombine.low %v502_v30, %v506_v31  ;;  %v494_v34 = vld [vmem:[%s1733_s5 + $0x80] sm:$0xff]  ;;  %v527_v3 = vld [vmem:[%s1733_s5 + $0x188] sm:$0xff] }
  0x1a   : > { %1331 = vmatprep.subr.bf16.mxu0 %v1402_v4  ;;  %865 = vmatpush1.bf16.msra.mxu1 %v1301_v21  ;;  %v498_v35 = vld [vmem:[%s1733_s5 + $0xa0] sm:$0xff]  ;;  %v531_v4 = vld [vmem:[%s1733_s5 + $0x1a8] sm:$0xff] }
  0x1b   : > { %1332 = vmatpush3.bf16.msra.mxu0 %v1375_v9  ;;  %866 = vmatprep.subr.bf16.mxu1 %v1294_v24  ;;  %v1270_v36 = vcombine.high %v494_v34, %v498_v35  ;;  %v1269_v37 = vcombine.low %v494_v34, %v498_v35  ;;  %v330_v42 = vld [vmem:[%s317_s10] sm:$0x7]  ;;  %v1304_v8 = vcombine.high %v527_v3, %v531_v4  ;;  %v519_v9 = vld [vmem:[%s1733_s5 + $0x148] sm:$0xff] }
  0x1c   : > { %905 = vmatprep.subr.bf16.mxu0 %v1312_v19  ;;  %v358_v46 = vrot.slane %v330_v42, %v357_v40  ;;  %v344_v47 = vrot.slane %v330_v42, %v343_v41  ;;  %v374_v50 = vrot.slane %v330_v42, %v373_v45  ;;  %v1246_v61 = vld [vmem:[%s1730_s2] ss:$0 sm:$0xff]  ;;  %v1303_v11 = vcombine.low %v527_v3, %v531_v4  ;;  %v495_v21 = vld [vmem:[%s1733_s5 + $0x88] sm:$0xff]  ;;  %v537_v45 = vld [vmem:[%s1733_s5 + $0x1d8] sm:$0xff] }
  0x1d   : > { %v1296_v13 = vcombine.high %v519_v9, %v523_v10  ;;  %v1295_v17 = vcombine.low %v519_v9, %v523_v10  ;;  %v1288_v19 = vcombine.high %v511_v15, %v515_v16  ;;  %v1272_v24 = vcombine.high %v495_v21, %v499_v22  ;;  %v486_v26 = vld [vmem:[%s1733_s5 + $0x40] sm:$0xff]  ;;  %v491_v30 = vld [vmem:[%s1733_s5 + $0x68] sm:$0xff]  ;;  %v520_v4 = vld [vmem:[%s1733_s5 + $0x150] sm:$0xff] }
  0x1e   : > { %867 = vmatpush1.bf16.msra.mxu1 %v1293_v25  ;;  %v1271_v25 = vcombine.low %v495_v21, %v499_v22  ;;  %v490_v27 = vld [vmem:[%s1733_s5 + $0x60] sm:$0xff]  ;;  %v508_v21 = vld [vmem:[%s1733_s5 + $0xf0] sm:$0xff]  ;;  %v509_v22 = vld [vmem:[%s1733_s5 + $0xf8] sm:$0xff] }
  0x1f   : > { %868 = vmatprep.subr.bf16.mxu1 %v1286_v28  ;;  %v487_v28 = vld [vmem:[%s1733_s5 + $0x48] sm:$0xff]  ;;  %v478_v34 = vld [vmem:[%s1733_s5] sm:$0xff] }
  0x20   : > { %v1263_v31 = vcombine.low %v487_v28, %v491_v30  ;;  %v482_v35 = vld [vmem:[%s1733_s5 + $0x20] sm:$0xff] }
  0x21   : > { %v1253_v42 = vcombine.low %v478_v34, %v482_v35 }
  0x22   : > { %869 = vmatpush1.bf16.msra.mxu1 %v1285_v29  ;;  %v1262_v29 = vcombine.high %v486_v26, %v490_v27 }
  0x23   : > { %870 = vmatprep.subr.bf16.mxu1 %v1278_v32  ;;  %v1264_v32 = vcombine.high %v487_v28, %v491_v30  ;;  %v500_v28 = vld [vmem:[%s1733_s5 + $0xb0] sm:$0xff]  ;;  %v501_v30 = vld [vmem:[%s1733_s5 + $0xb8] sm:$0xff] }
  0x26   : > { %871 = vmatpush1.bf16.msra.mxu1 %v1277_v33  ;;  %v1261_v33 = vcombine.low %v486_v26, %v490_v27  ;;  %v496_v27 = vld [vmem:[%s1733_s5 + $0x90] sm:$0xff] }
  0x27   : > { %872 = vmatprep.subr.bf16.mxu1 %v1270_v36  ;;  %v479_v36 = vld [vmem:[%s1733_s5 + $0x8] sm:$0xff] }
  0x28   : > { %v1255_v40 = vcombine.low %v479_v36, %v483_v38  ;;  %v1256_v41 = vcombine.high %v479_v36, %v483_v38  ;;  %v492_v36 = vld [vmem:[%s1733_s5 + $0x70] sm:$0xff]  ;;  %v493_v38 = vld [vmem:[%s1733_s5 + $0x78] sm:$0xff] }
  0x2a   : > { %873 = vmatpush1.bf16.msra.mxu1 %v1269_v37  ;;  %v1254_v37 = vcombine.high %v478_v34, %v482_v35  ;;  %v488_v35 = vld [vmem:[%s1733_s5 + $0x50] sm:$0xff] }
  0x2b   : > { %874 = vmatprep.subr.bf16.mxu1 %v1262_v29  ;;  %v497_v29 = vld [vmem:[%s1733_s5 + $0x98] sm:$0xff] }
  0x2c   : > { %v1276_v34 = vcombine.high %v497_v29, %v501_v30 }
  0x2e   : > { %875 = vmatpush1.bf16.msra.mxu1 %v1261_v33  ;;  %v1274_v33 = vcombine.high %v496_v27, %v500_v28 }
  0x2f   : > { %876 = vmatprep.subr.bf16.mxu1 %v1254_v37  ;;  %v489_v37 = vld [vmem:[%s1733_s5 + $0x58] sm:$0xff] }
  0x32   : > { %877 = vmatpush1.bf16.msra.mxu1 %v1253_v42  ;;  %v1266_v42 = vcombine.high %v488_v35, %v492_v36 }
  0x8b   : > { %v349_v43 = vpop.permute.xlu1 %348  ;;  %v334_v44 = vpop.permute.xlu0 %333 }
  0x8c   : > { %v359_v51 = vmul.f32 %v358_v46, %v349_v43  ;;  %v345_v52 = vmul.f32 %v344_v47, %v334_v44  ;;  %v536_v43 = vld [vmem:[%s1733_s5 + $0x1d0] sm:$0xff] }
  0x8d   : > { %v540_v44 = vld [vmem:[%s1733_s5 + $0x1f0] sm:$0xff] }
  0x8e   : > { %v361_v57 = vadd.f32 %v359_v51, %v345_v52  ;;  %v1247_v51 = vld [vmem:[%s1732_s4] ss:$0 sm:$0xff] }
  0x8f   : > { %v353_v48 = vpop.permute.xlu1 %352  ;;  %v339_v49 = vpop.permute.xlu0 %338 }
  0x90   : > { %v360_v53 = vmul.f32 %v358_v46, %v353_v48  ;;  %v346_v54 = vmul.f32 %v344_v47, %v339_v49  ;;  %v1314_v46 = vcombine.high %v536_v43, %v540_v44  ;;  %v541_v47 = vld [vmem:[%s1733_s5 + $0x1f8] sm:$0xff]  ;;  %v1313_v48 = vcombine.low %v536_v43, %v540_v44  ;;  %v480_v44 = vld [vmem:[%s1733_s5 + $0x10] sm:$0xff] }
  0x91   : > { %v1315_v49 = vcombine.low %v537_v45, %v541_v47  ;;  %v1268_v43 = vcombine.high %v489_v37, %v493_v38 }
  0x92   : > { %v362_v58 = vadd.f32 %v360_v53, %v346_v54  ;;  %948 = vmatprep.subr.bf16.mxu1 %v1314_v46  ;;  %v481_v46 = vld [vmem:[%s1733_s5 + $0x18] sm:$0xff] }
  0x94   : > { %v369_v55 = vpop.permute.xlu1 %368  ;;  %v365_v56 = vpop.permute.xlu0 %364 }
  0x95   : > { %v376_v59 = vmul.f32 %v374_v50, %v369_v55  ;;  %v375_v60 = vmul.f32 %v374_v50, %v365_v56  ;;  %v1316_v50 = vcombine.high %v537_v45, %v541_v47  ;;  %v484_v45 = vld [vmem:[%s1733_s5 + $0x30] sm:$0xff]  ;;  %v485_v47 = vld [vmem:[%s1733_s5 + $0x38] sm:$0xff] }
  0x97   : > { %v378_v62 = vadd.f32 %v376_v59, %v362_v58  ;;  %v377_v63 = vadd.f32 %v375_v60, %v361_v57  ;;  %v528_v57 = vld [vmem:[%s1733_s5 + $0x190] sm:$0xff]  ;;  %v529_v60 = vld [vmem:[%s1733_s5 + $0x198] sm:$0xff] }
  0x98   : > { %v532_v59 = vld [vmem:[%s1733_s5 + $0x1b0] sm:$0xff] }
  0x99   : > { %v387_v0 = vadd.f32 %v1246_v61, %v378_v62  ;;  %v386_v2 = vadd.f32 %v1246_v61, %v377_v63  ;;  %v533_v61 = vld [vmem:[%s1733_s5 + $0x1b8] sm:$0xff] }
  0x9a   : > { %v1308_v3 = vcombine.high %v529_v60, %v533_v61  ;;  %v1307_v9 = vcombine.low %v529_v60, %v533_v61 }
  0x9b   : > { %v389_v5 = vmax.f32 %v387_v0, 0.0  ;;  %v388_v6 = vmax.f32 %v386_v2, 0.0  ;;  %v1306_v2 = vcombine.high %v528_v57, %v532_v59 }
  0x9d   : > { %v390_v7 = vpack.c.bf16 %v389_v5, %v388_v6  ;;  %v524_v5 = vld [vmem:[%s1733_s5 + $0x170] sm:$0xff]  ;;  %v521_v6 = vld [vmem:[%s1733_s5 + $0x158] sm:$0xff] }
  0x9e   : > { %v1298_v10 = vcombine.high %v520_v4, %v524_v5 }
  0x9f   : > { %1334 = vmatmul.mubr.msk.bf16.vlgmr.msra.gmra.mxu0 %vm430_vm1, %v390_v7  ;;  %v525_v7 = vld [vmem:[%s1733_s5 + $0x178] sm:$0xff] }
  0xa0   : > { %906 = vmatpush1.bf16.msra.mxu0 %v1311_v18  ;;  %937 = vmatprep.mubr.bf16.mxu0 %v1401_v1  ;;  %v1287_v18 = vcombine.low %v511_v15, %v515_v16  ;;  %v516_v15 = vld [vmem:[%s1733_s5 + $0x130] sm:$0xff]  ;;  %v513_v16 = vld [vmem:[%s1733_s5 + $0x118] sm:$0xff]  ;;  %v1299_v12 = vcombine.low %v521_v6, %v525_v7 }
  0xa1   : > { %907 = vmatprep.subr.bf16.mxu0 %v1304_v8  ;;  %v1305_v8 = vcombine.low %v528_v57, %v532_v59 }
  0xa4   : > { %908 = vmatpush1.bf16.msra.mxu0 %v1303_v11  ;;  %v1300_v11 = vcombine.high %v521_v6, %v525_v7 }
  0xa5   : > { %909 = vmatprep.subr.bf16.mxu0 %v1296_v13  ;;  %v512_v13 = vld [vmem:[%s1733_s5 + $0x110] sm:$0xff] }
  0xa6   : > { %v1290_v14 = vcombine.high %v512_v13, %v516_v15 }
  0xa8   : > { %910 = vmatpush1.bf16.msra.mxu0 %v1295_v17  ;;  %v517_v17 = vld [vmem:[%s1733_s5 + $0x138] sm:$0xff] }
  0xa9   : > { %911 = vmatprep.subr.bf16.mxu0 %v1288_v19  ;;  %v1297_v19 = vcombine.low %v520_v4, %v524_v5 }
  0xac   : > { %912 = vmatpush1.bf16.msra.mxu0 %v1287_v18  ;;  %v1292_v18 = vcombine.high %v513_v16, %v517_v17 }
  0xad   : > { %913 = vmatprep.subr.bf16.mxu0 %v1280_v20  ;;  %v504_v20 = vld [vmem:[%s1733_s5 + $0xd0] sm:$0xff] }
  0xb0   : > { %914 = vmatpush1.bf16.msra.mxu0 %v1279_v23  ;;  %v1289_v23 = vcombine.low %v512_v13, %v516_v15 }
  0xb1   : > { %915 = vmatprep.subr.bf16.mxu0 %v1272_v24  ;;  %v1291_v24 = vcombine.low %v513_v16, %v517_v17 }
  0xb4   : > { %916 = vmatpush1.bf16.msra.mxu0 %v1271_v25  ;;  %v1282_v25 = vcombine.high %v504_v20, %v508_v21 }
  0xb5   : > { %917 = vmatprep.subr.bf16.mxu0 %v1264_v32 }
  0xb8   : > { %918 = vmatpush1.bf16.msra.mxu0 %v1263_v31  ;;  %v1281_v31 = vcombine.low %v504_v20, %v508_v21 }
  0xb9   : > { %919 = vmatprep.subr.bf16.mxu0 %v1256_v41  ;;  %v1275_v41 = vcombine.low %v497_v29, %v501_v30 }
  0xbc   : > { %920 = vmatpush1.bf16.msra.mxu0 %v1255_v40  ;;  %v1273_v40 = vcombine.low %v496_v27, %v500_v28 }
  0xbd   : > { %991 = vmatprep.subr.bf16.mxu0 %v1316_v50  ;;  %v1258_v50 = vcombine.high %v480_v44, %v484_v45 }
 0x15f   : > { %v468_v52 = vpop.f32.mrf.mxu0 }
 0x160   : > { %v469_v54 = vadd.f32 %v1247_v51, %v468_v52  ;;  %v1257_v52 = vcombine.low %v480_v44, %v484_v45 }
 0x161   : > { %v1335_v53 = vpop.f32.mrf.mxu0 }
 0x162   : > { %v475_v62 = vmax.f32 %v469_v54, 0.0  ;;  %v1259_v53 = vcombine.low %v481_v46, %v485_v47 }
 0x163   : > { %v471_v55 = vpop.f32.mrf.mxu0 }
 0x164   : > { %v472_v56 = vadd.f32 %v1247_v51, %v471_v55  ;;  %v1260_v51 = vcombine.high %v481_v46, %v485_v47 }
 0x165   : > { %v1336_v58 = vpop.f32.mrf.mxu0 }
 0x166   : > { %v476_v63 = vmax.f32 %v472_v56, 0.0 }
 0x168   : > { %v1631_v0 = vpack.c.bf16 %v476_v63, %v475_v62 }
 0x16a   : > { %895 = vmatmul.mubr.bf16.vlgmr.msra.gmra.mxu1 %v1631_v0  ;;  %938 = vmatmul.mubr.bf16.vlgmr.msra.gmra.mxu0 %v1631_v0 }
 0x16b   : > { %949 = vmatpush1.bf16.msra.mxu1 %v1313_v48  ;;  %992 = vmatpush1.bf16.msra.mxu0 %v1315_v49  ;;  %v1265_v48 = vcombine.low %v488_v35, %v492_v36  ;;  %v1267_v49 = vcombine.low %v489_v37, %v493_v38 }
 0x16c   : > { %950 = vmatprep.subr.bf16.mxu1 %v1306_v2  ;;  %993 = vmatprep.subr.bf16.mxu0 %v1308_v3 }
 0x16d   : > { %980 = vmatprep.mubr.bf16.mxu1 %v1401_v1  ;;  %1023 = vmatprep.mubr.bf16.mxu0 %v1401_v1  ;;  %v505_v1 = vld [vmem:[%s1733_s5 + $0xd8] sm:$0xff] }
 0x16e   : > { %v1284_v26 = vcombine.high %v505_v1, %v509_v22  ;;  %v1283_v32 = vcombine.low %v505_v1, %v509_v22 }
 0x16f   : > { %951 = vmatpush1.bf16.msra.mxu1 %v1305_v8  ;;  %994 = vmatpush1.bf16.msra.mxu0 %v1307_v9 }
 0x170   : > { %952 = vmatprep.subr.bf16.mxu1 %v1298_v10  ;;  %995 = vmatprep.subr.bf16.mxu0 %v1300_v11 }
 0x173   : > { %953 = vmatpush1.bf16.msra.mxu1 %v1297_v19  ;;  %996 = vmatpush1.bf16.msra.mxu0 %v1299_v12 }
 0x174   : > { %954 = vmatprep.subr.bf16.mxu1 %v1290_v14  ;;  %997 = vmatprep.subr.bf16.mxu0 %v1292_v18 }
 0x177   : > { %955 = vmatpush1.bf16.msra.mxu1 %v1289_v23  ;;  %998 = vmatpush1.bf16.msra.mxu0 %v1291_v24 }
 0x178   : > { %956 = vmatprep.subr.bf16.mxu1 %v1282_v25  ;;  %999 = vmatprep.subr.bf16.mxu0 %v1284_v26  ;;  %v1405_v26 = vmov 1966171168  }
 0x179   : > { %v1104_v27 = vunpack.c.l.s4 %v1405_v26 }
 0x17b   : > { %957 = vmatpush1.bf16.msra.mxu1 %v1281_v31  ;;  %1000 = vmatpush1.bf16.msra.mxu0 %v1283_v32 }
 0x17c   : > { %958 = vmatprep.subr.bf16.mxu1 %v1274_v33  ;;  %1001 = vmatprep.subr.bf16.mxu0 %v1276_v34 }
 0x17f   : > { %959 = vmatpush1.bf16.msra.mxu1 %v1273_v40  ;;  %1002 = vmatpush1.bf16.msra.mxu0 %v1275_v41 }
 0x180   : > { %960 = vmatprep.subr.bf16.mxu1 %v1266_v42  ;;  %1003 = vmatprep.subr.bf16.mxu0 %v1268_v43  ;;  %v1105_v43 = vunpack.c.0.s8 %v1104_v27 }
 0x183   : > { %961 = vmatpush1.bf16.msra.mxu1 %v1265_v48  ;;  %1004 = vmatpush1.bf16.msra.mxu0 %v1267_v49 }
 0x184   : > { %962 = vmatprep.subr.bf16.mxu1 %v1258_v50  ;;  %1005 = vmatprep.subr.bf16.mxu0 %v1260_v51 }
 0x187   : > { %963 = vmatpush1.bf16.msra.mxu1 %v1257_v52  ;;  %1006 = vmatpush1.bf16.msra.mxu0 %v1259_v53 }
 0x18a   : > { %981 = vmatmul.mubr.bf16.vlgmr.msra.gmra.mxu1 %v1631_v0  ;;  %1024 = vmatmul.mubr.bf16.vlgmr.msra.gmra.mxu0 %v1631_v0 }
 0x22a   : > { %v896_v54 = vpop.f32.mrf.mxu1  ;;  %v939_v55 = vpop.f32.mrf.mxu0 }
 0x22c   : > { %v898_v56 = vpop.f32.mrf.mxu1  ;;  %v941_v57 = vpop.f32.mrf.mxu0 }
 0x22e   : > { %v900_v58 = vpop.f32.mrf.mxu1  ;;  %v943_v59 = vpop.f32.mrf.mxu0 }
 0x22f   : > { %v1035_v2 = vmax.f32 %v896_v54, %v900_v58  ;;  %v1049_v3 = vmax.f32 %v939_v55, %v943_v59 }
 0x230   : > { %v902_v60 = vpop.f32.mrf.mxu1  ;;  %v945_v61 = vpop.f32.mrf.mxu0 }
 0x231   : > { %v1042_v62 = vmax.f32 %v898_v56, %v902_v60  ;;  %v1056_v63 = vmax.f32 %v941_v57, %v945_v61  ;;  %v1036_v6 = vrot.slane %v1035_v2, 4  ;;  %v1050_v7 = vrot.slane %v1049_v3, 4 }
 0x232   : > { %v1108_v56 = vsub.s32 %v1105_v43, %v1535_v39 }
 0x233   : > { %v1043_v4 = vrot.slane %v1042_v62, 4  ;;  %v1057_v5 = vrot.slane %v1056_v63, 4  ;;  %v1037_v10 = vmax.f32 %v1035_v2, %v1036_v6  ;;  %v1051_v0 = vmax.f32 %v1049_v3, %v1050_v7 }
 0x235   : > { %v1044_v8 = vmax.f32 %v1042_v62, %v1043_v4  ;;  %v1058_v9 = vmax.f32 %v1056_v63, %v1057_v5  ;;  %v1038_v15 = vrot.slane %v1037_v10, 2  ;;  %v1052_v16 = vrot.slane %v1051_v0, 2 }
 0x237   : > { %v1045_v11 = vrot.slane %v1044_v8, 2  ;;  %v1059_v13 = vrot.slane %v1058_v9, 2  ;;  %v1039_v21 = vmax.f32 %v1037_v10, %v1038_v15  ;;  %v1053_v1 = vmax.f32 %v1051_v0, %v1052_v16 }
 0x239   : > { %v1046_v12 = vmax.f32 %v1044_v8, %v1045_v11  ;;  %v1060_v14 = vmax.f32 %v1058_v9, %v1059_v13  ;;  %v1040_v36 = vrot.slane %v1039_v21, 1  ;;  %v1054_v37 = vrot.slane %v1053_v1, 1 }
 0x23b   : > { %v1047_v28 = vrot.slane %v1046_v12, 1  ;;  %v1061_v29 = vrot.slane %v1060_v14, 1  ;;  %v1041_v50 = vmax.f32 %v1039_v21, %v1040_v36  ;;  %v1055_v51 = vmax.f32 %v1053_v1, %v1054_v37 }
 0x23d   : > { %v1048_v44 = vmax.f32 %v1046_v12, %v1047_v28  ;;  %v1062_v45 = vmax.f32 %v1060_v14, %v1061_v29 }
 0x23f   : > { %v1099_v57 = vcombine.low %v1041_v50, %v1048_v44  ;;  %v1100_v58 = vcombine.low %v1055_v51, %v1062_v45 }
 0x241   : > { %v1109_v3 = vrot.slane %v1099_v57, %v1108_v56  ;;  %v1116_v4 = vrot.slane %v1100_v58, %v1108_v56 }
 0x243   : > { %v1131_v0 = vcombine.low %v1109_v3, %v1116_v4 }
 0x245   : > { %v1139_v15 = vrot.slane %v1131_v0, %v1108_v56 }
 0x24a   : > { %v982_v17 = vpop.f32.mrf.mxu1  ;;  %v1025_v19 = vpop.f32.mrf.mxu0 }
 0x24c   : > { %v984_v18 = vpop.f32.mrf.mxu1  ;;  %v1027_v20 = vpop.f32.mrf.mxu0 }
 0x24e   : > { %v986_v22 = vpop.f32.mrf.mxu1  ;;  %v1029_v23 = vpop.f32.mrf.mxu0 }
 0x24f   : > { %v1063_v24 = vmax.f32 %v982_v17, %v986_v22  ;;  %v1077_v25 = vmax.f32 %v1025_v19, %v1029_v23  ;;  %v1155_v19 = vld [vmem:[%s1734_s6] sm:$0xff] }
 0x250   : > { %v988_v30 = vpop.f32.mrf.mxu1  ;;  %v1031_v31 = vpop.f32.mrf.mxu0 }
 0x251   : > { %v1064_v32 = vrot.slane %v1063_v24, 4  ;;  %v1078_v33 = vrot.slane %v1077_v25, 4  ;;  %v1070_v34 = vmax.f32 %v984_v18, %v988_v30  ;;  %v1084_v35 = vmax.f32 %v1027_v20, %v1031_v31 }
 0x253   : > { %v1065_v38 = vmax.f32 %v1063_v24, %v1064_v32  ;;  %v1079_v40 = vmax.f32 %v1077_v25, %v1078_v33  ;;  %v1071_v41 = vrot.slane %v1070_v34, 4  ;;  %v1085_v42 = vrot.slane %v1084_v35, 4 }
 0x255   : > { %v1066_v46 = vrot.slane %v1065_v38, 2  ;;  %v1080_v47 = vrot.slane %v1079_v40, 2  ;;  %v1072_v48 = vmax.f32 %v1070_v34, %v1071_v41  ;;  %v1086_v49 = vmax.f32 %v1084_v35, %v1085_v42 }
 0x257   : > { %v1067_v52 = vmax.f32 %v1065_v38, %v1066_v46  ;;  %v1081_v53 = vmax.f32 %v1079_v40, %v1080_v47  ;;  %v1073_v54 = vrot.slane %v1072_v48, 2  ;;  %v1087_v55 = vrot.slane %v1086_v49, 2 }
 0x259   : > { %v1068_v59 = vrot.slane %v1067_v52, 1  ;;  %v1082_v60 = vrot.slane %v1081_v53, 1  ;;  %v1074_v61 = vmax.f32 %v1072_v48, %v1073_v54  ;;  %v1088_v62 = vmax.f32 %v1086_v49, %v1087_v55 }
 0x25b   : > { %v1075_v63 = vrot.slane %v1074_v61, 1  ;;  %v1089_v2 = vrot.slane %v1088_v62, 1  ;;  %v1069_v5 = vmax.f32 %v1067_v52, %v1068_v59  ;;  %v1083_v6 = vmax.f32 %v1081_v53, %v1082_v60 }
 0x25d   : > { %v1076_v7 = vmax.f32 %v1074_v61, %v1075_v63  ;;  %v1090_v8 = vmax.f32 %v1088_v62, %v1089_v2 }
 0x25f   : > { %v1101_v9 = vcombine.low %v1069_v5, %v1076_v7  ;;  %v1102_v10 = vcombine.low %v1083_v6, %v1090_v8 }
 0x261   : > { %v1123_v11 = vrot.slane %v1101_v9, %v1108_v56  ;;  %v1130_v39 = vrot.slane %v1102_v10, %v1108_v56 }
 0x263   : > { %v1132_v13 = vcombine.low %v1123_v11, %v1130_v39 }
 0x265   : > { %v1146_v16 = vrot.slane %v1132_v13, %v1108_v56 }
 0x267   : > { %v1147_v17 = vcombine.low %v1139_v15, %v1146_v16 }
 0x269   : > { %v1156_v12 = vadd.f32 %v1155_v19, %v1147_v17 }
 0x26b   : > { %1157 = vst [vmem:[%s321_s29] sm:$0xff] %v1156_v12 }
 0x26c PF: > { %s17_s26 = sadd.s32 1, %s1398_s26   ;;  %s1736_s24 = smov %s1394_s25 }
 0x26d   : > { %p14_p5 = scmp.ge.s32.totalorder %s17_s26, 4   ;;  %s1737_s25 = smov %s1739_s27 }
 0x26f   :  { %16 = sbr.rel (!%p14_p5) target bundleno = 2 (0x2), region = 89 }

// kernel: pointnet_cls_forward.7
= control target key start
LH: loop header
LB: loop body
LE: loop exit
PB: predicated region body
PF: predicated region fallthrough
CT: control target
= control target key end

     0   :  { %vm2594_vm0 = vcmask 15360   ;;  %s4622_s1 = inlined_call_operand.vmem [shape: bf16[1024,512], index: 1, kind: input, shape index: {}]   ;;  %s4623_s0 = inlined_call_operand.vmem [shape: f32[8,1024], index: 0, kind: input, shape index: {}]   ;;  %s4624_s3 = inlined_call_operand.vmem [shape: bf16[512,256], index: 3, kind: input, shape index: {}]   ;;  %s4625_s2 = inlined_call_operand.vmem [shape: f32[1,512], index: 2, kind: input, shape index: {}]   ;;  %s4626_s5 = inlined_call_operand.vmem [shape: bf16[256,2], index: 5, kind: input, shape index: {}]   ;;  %s4627_s4 = inlined_call_operand.vmem [shape: f32[1,256], index: 4, kind: input, shape index: {}]   ;;  %s4628_s6 = inlined_call_operand.vmem [shape: f32[1,2], index: 6, kind: input, shape index: {}]   ;;  %s4629_s7 = inlined_call_operand.vmem [shape: f32[8,2], index: 7, kind: output, shape index: {}]  }
   0x1   :  { %v2971_v0 = vld [vmem:[%s4622_s1 + $0xe4] ss:$16 sps:$4 sm:$0xff]   ;;  %v2975_v2 = vld [vmem:[%s4622_s1 + $0xe0] ss:$16 sps:$4 sm:$0xff]   ;;  %v28_v46 = vld [vmem:[%s4623_s0 + $0x8] sm:$0xff] }
   0x2   :  { %v2973_v1 = vld [vmem:[%s4622_s1 + $0x2e4] ss:$16 sps:$4 sm:$0xff]   ;;  %1601 = vmatprep.subr.bf16.mxu0 %v2971_v0  ;;  %v2976_v3 = vld [vmem:[%s4622_s1 + $0x2e0] ss:$16 sps:$4 sm:$0xff]   ;;  %v3658_v49 = vpack.c.bf16 %v28_v46, %v28_v46  ;;  %v30_v50 = vld [vmem:[%s4623_s0 + $0x18] sm:$0xff] }
   0x3   :  { %1642 = vmatprep.subr.bf16.mxu1 %v2973_v1  ;;  %v2977_v4 = vld [vmem:[%s4622_s1 + $0xc4] ss:$16 sps:$4 sm:$0xff]   ;;  %1602 = vmatpush1.bf16.msra.mxu0 %v2975_v2  ;;  %v2981_v6 = vld [vmem:[%s4622_s1 + $0xc0] ss:$16 sps:$4 sm:$0xff]   ;;  %v3666_v52 = vpack.c.bf16 %v30_v50, %v30_v50 }
   0x4   :  { %1643 = vmatpush1.bf16.msra.mxu1 %v2976_v3  ;;  %v2979_v5 = vld [vmem:[%s4622_s1 + $0x2c4] ss:$16 sps:$4 sm:$0xff]   ;;  %1603 = vmatprep.subr.bf16.mxu0 %v2977_v4  ;;  %v2982_v7 = vld [vmem:[%s4622_s1 + $0x2c0] ss:$16 sps:$4 sm:$0xff]  }
   0x5   :  { %1644 = vmatprep.subr.bf16.mxu1 %v2979_v5  ;;  %v2983_v8 = vld [vmem:[%s4622_s1 + $0xa4] ss:$16 sps:$4 sm:$0xff]   ;;  %v2987_v10 = vld [vmem:[%s4622_s1 + $0xa0] ss:$16 sps:$4 sm:$0xff]   ;;  %1633 = vmatprep.mubr.bf16.mxu0 %v3658_v49 }
   0x6   :  { %v2985_v9 = vld [vmem:[%s4622_s1 + $0x2a4] ss:$16 sps:$4 sm:$0xff]   ;;  %v2988_v11 = vld [vmem:[%s4622_s1 + $0x2a0] ss:$16 sps:$4 sm:$0xff]   ;;  %1674 = vmatprep.mubr.bf16.mxu1 %v3666_v52 }
   0x7   :  { %1604 = vmatpush1.bf16.msra.mxu0 %v2981_v6  ;;  %v2989_v12 = vld [vmem:[%s4622_s1 + $0x84] ss:$16 sps:$4 sm:$0xff]   ;;  %v2993_v14 = vld [vmem:[%s4622_s1 + $0x80] ss:$16 sps:$4 sm:$0xff]  }
   0x8   :  { %1645 = vmatpush1.bf16.msra.mxu1 %v2982_v7  ;;  %1605 = vmatprep.subr.bf16.mxu0 %v2983_v8  ;;  %v2991_v13 = vld [vmem:[%s4622_s1 + $0x284] ss:$16 sps:$4 sm:$0xff]   ;;  %v2994_v15 = vld [vmem:[%s4622_s1 + $0x280] ss:$16 sps:$4 sm:$0xff]  }
   0x9   :  { %1646 = vmatprep.subr.bf16.mxu1 %v2985_v9  ;;  %v2995_v16 = vld [vmem:[%s4622_s1 + $0x64] ss:$16 sps:$4 sm:$0xff]   ;;  %v2999_v18 = vld [vmem:[%s4622_s1 + $0x60] ss:$16 sps:$4 sm:$0xff]  }
   0xa   :  { %v2997_v17 = vld [vmem:[%s4622_s1 + $0x264] ss:$16 sps:$4 sm:$0xff]   ;;  %v3000_v19 = vld [vmem:[%s4622_s1 + $0x260] ss:$16 sps:$4 sm:$0xff]  }
   0xb   :  { %1606 = vmatpush1.bf16.msra.mxu0 %v2987_v10  ;;  %v3001_v20 = vld [vmem:[%s4622_s1 + $0x44] ss:$16 sps:$4 sm:$0xff]   ;;  %v3005_v22 = vld [vmem:[%s4622_s1 + $0x40] ss:$16 sps:$4 sm:$0xff]  }
   0xc   :  { %1647 = vmatpush1.bf16.msra.mxu1 %v2988_v11  ;;  %1607 = vmatprep.subr.bf16.mxu0 %v2989_v12  ;;  %v3003_v21 = vld [vmem:[%s4622_s1 + $0x244] ss:$16 sps:$4 sm:$0xff]   ;;  %v3006_v23 = vld [vmem:[%s4622_s1 + $0x240] ss:$16 sps:$4 sm:$0xff]  }
   0xd   :  { %1648 = vmatprep.subr.bf16.mxu1 %v2991_v13  ;;  %v3007_v24 = vld [vmem:[%s4622_s1 + $0x24] ss:$16 sps:$4 sm:$0xff]   ;;  %v3011_v26 = vld [vmem:[%s4622_s1 + $0x20] ss:$16 sps:$4 sm:$0xff]  }
   0xe   :  { %v3009_v25 = vld [vmem:[%s4622_s1 + $0x224] ss:$16 sps:$4 sm:$0xff]   ;;  %v3012_v27 = vld [vmem:[%s4622_s1 + $0x220] ss:$16 sps:$4 sm:$0xff]  }
   0xf   :  { %1608 = vmatpush1.bf16.msra.mxu0 %v2993_v14  ;;  %v3013_v28 = vld [vmem:[%s4622_s1 + $0x4] ss:$16 sps:$4 sm:$0xff]   ;;  %v3017_v30 = vld [vmem:[%s4622_s1] ss:$16 sps:$4 sm:$0xff]  }
  0x10   :  { %1649 = vmatpush1.bf16.msra.mxu1 %v2994_v15  ;;  %1609 = vmatprep.subr.bf16.mxu0 %v2995_v16  ;;  %v3015_v29 = vld [vmem:[%s4622_s1 + $0x204] ss:$16 sps:$4 sm:$0xff]   ;;  %v3018_v31 = vld [vmem:[%s4622_s1 + $0x200] ss:$16 sps:$4 sm:$0xff]  }
  0x11   :  { %1650 = vmatprep.subr.bf16.mxu1 %v2997_v17  ;;  %v3019_v32 = vld [vmem:[%s4622_s1 + $0x1e4] ss:$16 sps:$4 sm:$0xff]   ;;  %v3023_v34 = vld [vmem:[%s4622_s1 + $0x1e0] ss:$16 sps:$4 sm:$0xff]  }
  0x12   :  { %v3021_v33 = vld [vmem:[%s4622_s1 + $0x3e4] ss:$16 sps:$4 sm:$0xff]   ;;  %v3024_v35 = vld [vmem:[%s4622_s1 + $0x3e0] ss:$16 sps:$4 sm:$0xff]  }
  0x13   :  { %1610 = vmatpush1.bf16.msra.mxu0 %v2999_v18  ;;  %v3025_v36 = vld [vmem:[%s4622_s1 + $0x1c4] ss:$16 sps:$4 sm:$0xff]   ;;  %v3029_v38 = vld [vmem:[%s4622_s1 + $0x1c0] ss:$16 sps:$4 sm:$0xff]  }
  0x14   :  { %1651 = vmatpush1.bf16.msra.mxu1 %v3000_v19  ;;  %1611 = vmatprep.subr.bf16.mxu0 %v3001_v20  ;;  %v3027_v37 = vld [vmem:[%s4622_s1 + $0x3c4] ss:$16 sps:$4 sm:$0xff]   ;;  %v3030_v39 = vld [vmem:[%s4622_s1 + $0x3c0] ss:$16 sps:$4 sm:$0xff]  }
  0x15   :  { %1652 = vmatprep.subr.bf16.mxu1 %v3003_v21  ;;  %v3031_v40 = vld [vmem:[%s4622_s1 + $0x1a4] ss:$16 sps:$4 sm:$0xff]   ;;  %v3035_v42 = vld [vmem:[%s4622_s1 + $0x1a0] ss:$16 sps:$4 sm:$0xff]  }
  0x16   :  { %v3033_v41 = vld [vmem:[%s4622_s1 + $0x3a4] ss:$16 sps:$4 sm:$0xff]   ;;  %v3036_v43 = vld [vmem:[%s4622_s1 + $0x3a0] ss:$16 sps:$4 sm:$0xff]  }
  0x17   :  { %1612 = vmatpush1.bf16.msra.mxu0 %v3005_v22  ;;  %v3037_v44 = vld [vmem:[%s4622_s1 + $0x184] ss:$16 sps:$4 sm:$0xff]   ;;  %v3041_v47 = vld [vmem:[%s4622_s1 + $0x180] ss:$16 sps:$4 sm:$0xff]  }
  0x18   :  { %1653 = vmatpush1.bf16.msra.mxu1 %v3006_v23  ;;  %1613 = vmatprep.subr.bf16.mxu0 %v3007_v24  ;;  %v3039_v45 = vld [vmem:[%s4622_s1 + $0x384] ss:$16 sps:$4 sm:$0xff]   ;;  %v3042_v48 = vld [vmem:[%s4622_s1 + $0x380] ss:$16 sps:$4 sm:$0xff]  }
  0x19   :  { %1654 = vmatprep.subr.bf16.mxu1 %v3009_v25  ;;  %v3043_v51 = vld [vmem:[%s4622_s1 + $0x164] ss:$16 sps:$4 sm:$0xff]   ;;  %v3047_v54 = vld [vmem:[%s4622_s1 + $0x160] ss:$16 sps:$4 sm:$0xff]  }
  0x1a   :  { %v3045_v53 = vld [vmem:[%s4622_s1 + $0x364] ss:$16 sps:$4 sm:$0xff]   ;;  %v3048_v55 = vld [vmem:[%s4622_s1 + $0x360] ss:$16 sps:$4 sm:$0xff]  }
  0x1b   :  { %1614 = vmatpush1.bf16.msra.mxu0 %v3011_v26  ;;  %v3049_v56 = vld [vmem:[%s4622_s1 + $0x144] ss:$16 sps:$4 sm:$0xff]   ;;  %v3053_v58 = vld [vmem:[%s4622_s1 + $0x140] ss:$16 sps:$4 sm:$0xff]  }
  0x1c   :  { %1655 = vmatpush1.bf16.msra.mxu1 %v3012_v27  ;;  %1615 = vmatprep.subr.bf16.mxu0 %v3013_v28  ;;  %v3051_v57 = vld [vmem:[%s4622_s1 + $0x344] ss:$16 sps:$4 sm:$0xff]   ;;  %v3054_v59 = vld [vmem:[%s4622_s1 + $0x340] ss:$16 sps:$4 sm:$0xff]  }
  0x1d   :  { %1656 = vmatprep.subr.bf16.mxu1 %v3015_v29  ;;  %v3055_v60 = vld [vmem:[%s4622_s1 + $0x124] ss:$16 sps:$4 sm:$0xff]   ;;  %v3059_v62 = vld [vmem:[%s4622_s1 + $0x120] ss:$16 sps:$4 sm:$0xff]  }
  0x1e   :  { %v3057_v61 = vld [vmem:[%s4622_s1 + $0x324] ss:$16 sps:$4 sm:$0xff]   ;;  %v3060_v63 = vld [vmem:[%s4622_s1 + $0x320] ss:$16 sps:$4 sm:$0xff]  }
  0x1f   :  { %1616 = vmatpush1.bf16.msra.mxu0 %v3017_v30  ;;  %v3061_v0 = vld [vmem:[%s4622_s1 + $0x104] ss:$16 sps:$4 sm:$0xff]   ;;  %v3065_v2 = vld [vmem:[%s4622_s1 + $0x100] ss:$16 sps:$4 sm:$0xff]  }
  0x20   :  { %1657 = vmatpush1.bf16.msra.mxu1 %v3018_v31  ;;  %1617 = vmatprep.subr.bf16.mxu0 %v3019_v32  ;;  %v3063_v1 = vld [vmem:[%s4622_s1 + $0x304] ss:$16 sps:$4 sm:$0xff]   ;;  %v3066_v3 = vld [vmem:[%s4622_s1 + $0x300] ss:$16 sps:$4 sm:$0xff]  }
  0x21   :  { %1658 = vmatprep.subr.bf16.mxu1 %v3021_v33  ;;  %v27_v4 = vld [vmem:[%s4623_s0] sm:$0xff]  ;;  %v29_v5 = vld [vmem:[%s4623_s0 + $0x10] sm:$0xff] }
  0x22   :  { %v3069_v6 = vld [vmem:[%s4622_s1 + $0x4e4] ss:$16 sps:$4 sm:$0xff]   ;;  %v3727_v8 = vpack.c.bf16 %v27_v4, %v27_v4  ;;  %v3729_v9 = vpack.c.bf16 %v29_v5, %v29_v5  ;;  %v3067_v10 = vld [vmem:[%s4622_s1 + $0x4e0] ss:$16 sps:$4 sm:$0xff]  }
  0x23   :  { %1618 = vmatpush2.bf16.msra.mxu0 %v3023_v34  ;;  %v3072_v7 = vld [vmem:[%s4622_s1 + $0x6e4] ss:$16 sps:$4 sm:$0xff]   ;;  %v3070_v11 = vld [vmem:[%s4622_s1 + $0x6e0] ss:$16 sps:$4 sm:$0xff]   ;;  %v32_v34 = vld [vmem:[%s4623_s0 + $0x28] sm:$0xff] }
  0x24   :  { %1659 = vmatpush2.bf16.msra.mxu1 %v3024_v35  ;;  %1619 = vmatprep.subr.bf16.mxu0 %v3025_v36  ;;  %v3075_v12 = vld [vmem:[%s4622_s1 + $0x4c4] ss:$16 sps:$4 sm:$0xff]   ;;  %v3073_v14 = vld [vmem:[%s4622_s1 + $0x4c0] ss:$16 sps:$4 sm:$0xff]  }
  0x25   :  { %1660 = vmatprep.subr.bf16.mxu1 %v3027_v37  ;;  %v3078_v13 = vld [vmem:[%s4622_s1 + $0x6c4] ss:$16 sps:$4 sm:$0xff]   ;;  %v3076_v15 = vld [vmem:[%s4622_s1 + $0x6c0] ss:$16 sps:$4 sm:$0xff]   ;;  %v3814_v37 = vpack.c.bf16 %v32_v34, %v32_v34  ;;  %v3189_v34 = vld [vmem:[%s4622_s1 + $0x6c] ss:$16 sps:$4 sm:$0xff]  }
  0x26   :  { %v3081_v16 = vld [vmem:[%s4622_s1 + $0x4a4] ss:$16 sps:$4 sm:$0xff]   ;;  %v3079_v18 = vld [vmem:[%s4622_s1 + $0x4a0] ss:$16 sps:$4 sm:$0xff]  }
  0x27   :  { %1620 = vmatpush2.bf16.msra.mxu0 %v3029_v38  ;;  %v3084_v17 = vld [vmem:[%s4622_s1 + $0x6a4] ss:$16 sps:$4 sm:$0xff]   ;;  %v3082_v19 = vld [vmem:[%s4622_s1 + $0x6a0] ss:$16 sps:$4 sm:$0xff]   ;;  %v34_v38 = vld [vmem:[%s4623_s0 + $0x38] sm:$0xff] }
  0x28   :  { %1661 = vmatpush2.bf16.msra.mxu1 %v3030_v39  ;;  %1621 = vmatprep.subr.bf16.mxu0 %v3031_v40  ;;  %v3087_v20 = vld [vmem:[%s4622_s1 + $0x484] ss:$16 sps:$4 sm:$0xff]   ;;  %v3085_v22 = vld [vmem:[%s4622_s1 + $0x480] ss:$16 sps:$4 sm:$0xff]   ;;  %v3822_v40 = vpack.c.bf16 %v34_v38, %v34_v38  ;;  %v3190_v38 = vld [vmem:[%s4622_s1 + $0x268] ss:$16 sps:$4 sm:$0xff]  }
  0x29   :  { %1662 = vmatprep.subr.bf16.mxu1 %v3033_v41  ;;  %v3090_v21 = vld [vmem:[%s4622_s1 + $0x684] ss:$16 sps:$4 sm:$0xff]   ;;  %v3088_v23 = vld [vmem:[%s4622_s1 + $0x680] ss:$16 sps:$4 sm:$0xff]  }
  0x2a   :  { %v3093_v24 = vld [vmem:[%s4622_s1 + $0x464] ss:$16 sps:$4 sm:$0xff]   ;;  %v3091_v26 = vld [vmem:[%s4622_s1 + $0x460] ss:$16 sps:$4 sm:$0xff]  }
  0x2b   :  { %1622 = vmatpush2.bf16.msra.mxu0 %v3035_v42  ;;  %v3096_v25 = vld [vmem:[%s4622_s1 + $0x664] ss:$16 sps:$4 sm:$0xff]   ;;  %v3094_v27 = vld [vmem:[%s4622_s1 + $0x660] ss:$16 sps:$4 sm:$0xff]  }
  0x2c   :  { %1663 = vmatpush2.bf16.msra.mxu1 %v3036_v43  ;;  %1623 = vmatprep.subr.bf16.mxu0 %v3037_v44  ;;  %v3099_v28 = vld [vmem:[%s4622_s1 + $0x444] ss:$16 sps:$4 sm:$0xff]   ;;  %v3097_v30 = vld [vmem:[%s4622_s1 + $0x440] ss:$16 sps:$4 sm:$0xff]  }
  0x2d   :  { %1664 = vmatprep.subr.bf16.mxu1 %v3039_v45  ;;  %v3102_v29 = vld [vmem:[%s4622_s1 + $0x644] ss:$16 sps:$4 sm:$0xff]   ;;  %v3100_v31 = vld [vmem:[%s4622_s1 + $0x640] ss:$16 sps:$4 sm:$0xff]  }
  0x2e   :  { %v3105_v32 = vld [vmem:[%s4622_s1 + $0x424] ss:$16 sps:$4 sm:$0xff]   ;;  %v3103_v35 = vld [vmem:[%s4622_s1 + $0x420] ss:$16 sps:$4 sm:$0xff]  }
  0x2f   :  { %1624 = vmatpush2.bf16.msra.mxu0 %v3041_v47  ;;  %v3108_v33 = vld [vmem:[%s4622_s1 + $0x624] ss:$16 sps:$4 sm:$0xff]   ;;  %v3106_v36 = vld [vmem:[%s4622_s1 + $0x620] ss:$16 sps:$4 sm:$0xff]  }
  0x30   :  { %1665 = vmatpush2.bf16.msra.mxu1 %v3042_v48  ;;  %1625 = vmatprep.subr.bf16.mxu0 %v3043_v51  ;;  %v3111_v39 = vld [vmem:[%s4622_s1 + $0x404] ss:$16 sps:$4 sm:$0xff]   ;;  %v3109_v42 = vld [vmem:[%s4622_s1 + $0x400] ss:$16 sps:$4 sm:$0xff]  }
  0x31   :  { %1666 = vmatprep.subr.bf16.mxu1 %v3045_v53  ;;  %v3114_v41 = vld [vmem:[%s4622_s1 + $0x604] ss:$16 sps:$4 sm:$0xff]   ;;  %v3112_v43 = vld [vmem:[%s4622_s1 + $0x600] ss:$16 sps:$4 sm:$0xff]  }
  0x32   :  { %v3117_v44 = vld [vmem:[%s4622_s1 + $0x5e4] ss:$16 sps:$4 sm:$0xff]   ;;  %v3115_v46 = vld [vmem:[%s4622_s1 + $0x5e0] ss:$16 sps:$4 sm:$0xff]  }
  0x33   :  { %1626 = vmatpush2.bf16.msra.mxu0 %v3047_v54  ;;  %v3120_v45 = vld [vmem:[%s4622_s1 + $0x7e4] ss:$16 sps:$4 sm:$0xff]   ;;  %v3118_v47 = vld [vmem:[%s4622_s1 + $0x7e0] ss:$16 sps:$4 sm:$0xff]  }
  0x34   :  { %1667 = vmatpush2.bf16.msra.mxu1 %v3048_v55  ;;  %1627 = vmatprep.subr.bf16.mxu0 %v3049_v56  ;;  %v3123_v48 = vld [vmem:[%s4622_s1 + $0x5c4] ss:$16 sps:$4 sm:$0xff]   ;;  %v3121_v51 = vld [vmem:[%s4622_s1 + $0x5c0] ss:$16 sps:$4 sm:$0xff]  }
  0x35   :  { %1668 = vmatprep.subr.bf16.mxu1 %v3051_v57  ;;  %v3126_v50 = vld [vmem:[%s4622_s1 + $0x7c4] ss:$16 sps:$4 sm:$0xff]   ;;  %v3124_v53 = vld [vmem:[%s4622_s1 + $0x7c0] ss:$16 sps:$4 sm:$0xff]  }
  0x36   :  { %v3129_v54 = vld [vmem:[%s4622_s1 + $0x5a4] ss:$16 sps:$4 sm:$0xff]   ;;  %v3127_v56 = vld [vmem:[%s4622_s1 + $0x5a0] ss:$16 sps:$4 sm:$0xff]  }
  0x37   :  { %1628 = vmatpush2.bf16.msra.mxu0 %v3053_v58  ;;  %v3132_v55 = vld [vmem:[%s4622_s1 + $0x7a4] ss:$16 sps:$4 sm:$0xff]   ;;  %v3130_v57 = vld [vmem:[%s4622_s1 + $0x7a0] ss:$16 sps:$4 sm:$0xff]  }
  0x38   :  { %1669 = vmatpush2.bf16.msra.mxu1 %v3054_v59  ;;  %1629 = vmatprep.subr.bf16.mxu0 %v3055_v60  ;;  %v3135_v58 = vld [vmem:[%s4622_s1 + $0x584] ss:$16 sps:$4 sm:$0xff]   ;;  %v3133_v60 = vld [vmem:[%s4622_s1 + $0x580] ss:$16 sps:$4 sm:$0xff]  }
  0x39   :  { %1670 = vmatprep.subr.bf16.mxu1 %v3057_v61  ;;  %v3138_v59 = vld [vmem:[%s4622_s1 + $0x784] ss:$16 sps:$4 sm:$0xff]   ;;  %v3136_v61 = vld [vmem:[%s4622_s1 + $0x780] ss:$16 sps:$4 sm:$0xff]  }
  0x3a   :  { %v3145_v4 = vld [vmem:[%s4622_s1 + $0x540] ss:$16 sps:$4 sm:$0xff]  }
  0x3b   :  { %1630 = vmatpush2.bf16.msra.mxu0 %v3059_v62  ;;  %v3141_v62 = vld [vmem:[%s4622_s1 + $0x564] ss:$16 sps:$4 sm:$0xff]   ;;  %v3148_v5 = vld [vmem:[%s4622_s1 + $0x740] ss:$16 sps:$4 sm:$0xff]  }
  0x3c   :  { %1671 = vmatpush2.bf16.msra.mxu1 %v3060_v63  ;;  %1631 = vmatprep.subr.bf16.mxu0 %v3061_v0  ;;  %v3144_v63 = vld [vmem:[%s4622_s1 + $0x764] ss:$16 sps:$4 sm:$0xff]   ;;  %v3139_v0 = vld [vmem:[%s4622_s1 + $0x560] ss:$16 sps:$4 sm:$0xff]  }
  0x3d   :  { %1672 = vmatprep.subr.bf16.mxu1 %v3063_v1  ;;  %v3142_v1 = vld [vmem:[%s4622_s1 + $0x760] ss:$16 sps:$4 sm:$0xff]  }
  0x3f   :  { %1632 = vmatpush2.bf16.msra.mxu0 %v3065_v2  ;;  %v3147_v2 = vld [vmem:[%s4622_s1 + $0x544] ss:$16 sps:$4 sm:$0xff]  }
  0x40   :  { %1673 = vmatpush2.bf16.msra.mxu1 %v3066_v3  ;;  %1683 = vmatprep.subr.bf16.mxu0 %v3069_v6  ;;  %v3150_v3 = vld [vmem:[%s4622_s1 + $0x744] ss:$16 sps:$4 sm:$0xff]  }
  0x41   :  { %1724 = vmatprep.subr.bf16.mxu1 %v3072_v7  ;;  %v3153_v6 = vld [vmem:[%s4622_s1 + $0x524] ss:$16 sps:$4 sm:$0xff]  }
  0x42   :  { %1634 = vmatmul.mubr.bf16.vlgmr.msra.gmra.mxu0 %v3727_v8  ;;  %v3156_v7 = vld [vmem:[%s4622_s1 + $0x724] ss:$16 sps:$4 sm:$0xff]  }
  0x43   :  { %1675 = vmatmul.mubr.bf16.vlgmr.msra.gmra.mxu1 %v3729_v9  ;;  %1684 = vmatpush1.bf16.msra.mxu0 %v3067_v10  ;;  %v3151_v10 = vld [vmem:[%s4622_s1 + $0x520] ss:$16 sps:$4 sm:$0xff]  }
  0x44   :  { %1725 = vmatpush1.bf16.msra.mxu1 %v3070_v11  ;;  %1685 = vmatprep.subr.bf16.mxu0 %v3075_v12  ;;  %v3154_v11 = vld [vmem:[%s4622_s1 + $0x720] ss:$16 sps:$4 sm:$0xff]   ;;  %v3159_v12 = vld [vmem:[%s4622_s1 + $0x504] ss:$16 sps:$4 sm:$0xff]  }
  0x45   :  { %1726 = vmatprep.subr.bf16.mxu1 %v3078_v13  ;;  %1715 = vmatprep.mubr.bf16.mxu0 %v3814_v37  ;;  %v3162_v13 = vld [vmem:[%s4622_s1 + $0x704] ss:$16 sps:$4 sm:$0xff]  }
  0x46   :  { %1756 = vmatprep.mubr.bf16.mxu1 %v3822_v40 }
  0x47   :  { %1686 = vmatpush1.bf16.msra.mxu0 %v3073_v14  ;;  %v3157_v14 = vld [vmem:[%s4622_s1 + $0x500] ss:$16 sps:$4 sm:$0xff]  }
  0x48   :  { %1727 = vmatpush1.bf16.msra.mxu1 %v3076_v15  ;;  %1687 = vmatprep.subr.bf16.mxu0 %v3081_v16  ;;  %v3160_v15 = vld [vmem:[%s4622_s1 + $0x700] ss:$16 sps:$4 sm:$0xff]  }
  0x49   :  { %1728 = vmatprep.subr.bf16.mxu1 %v3084_v17  ;;  %v31_v16 = vld [vmem:[%s4623_s0 + $0x20] sm:$0xff]  ;;  %v33_v17 = vld [vmem:[%s4623_s0 + $0x30] sm:$0xff] }
  0x4b   :  { %1688 = vmatpush1.bf16.msra.mxu0 %v3079_v18  ;;  %v3165_v18 = vld [vmem:[%s4622_s1 + $0xec] ss:$16 sps:$4 sm:$0xff]  }
  0x4c   :  { %1729 = vmatpush1.bf16.msra.mxu1 %v3082_v19  ;;  %1689 = vmatprep.subr.bf16.mxu0 %v3087_v20  ;;  %v3168_v19 = vld [vmem:[%s4622_s1 + $0x2ec] ss:$16 sps:$4 sm:$0xff]   ;;  %v3943_v20 = vpack.c.bf16 %v31_v16, %v31_v16 }
  0x4d   :  { %1730 = vmatprep.subr.bf16.mxu1 %v3090_v21  ;;  %v3945_v21 = vpack.c.bf16 %v33_v17, %v33_v17  ;;  %v3249_v16 = vld [vmem:[%s4622_s1 + $0x12c] ss:$16 sps:$4 sm:$0xff]  }
  0x4e   :  { %v3252_v17 = vld [vmem:[%s4622_s1 + $0x32c] ss:$16 sps:$4 sm:$0xff]  }
  0x4f   :  { %1690 = vmatpush1.bf16.msra.mxu0 %v3085_v22  ;;  %v3163_v22 = vld [vmem:[%s4622_s1 + $0xe8] ss:$16 sps:$4 sm:$0xff]  }
  0x50   :  { %1731 = vmatpush1.bf16.msra.mxu1 %v3088_v23  ;;  %1691 = vmatprep.subr.bf16.mxu0 %v3093_v24  ;;  %v3166_v23 = vld [vmem:[%s4622_s1 + $0x2e8] ss:$16 sps:$4 sm:$0xff]   ;;  %v3171_v24 = vld [vmem:[%s4622_s1 + $0xcc] ss:$16 sps:$4 sm:$0xff]  }
  0x51   :  { %1732 = vmatprep.subr.bf16.mxu1 %v3096_v25  ;;  %v3174_v25 = vld [vmem:[%s4622_s1 + $0x2cc] ss:$16 sps:$4 sm:$0xff]  }
  0x53   :  { %1692 = vmatpush1.bf16.msra.mxu0 %v3091_v26  ;;  %v3169_v26 = vld [vmem:[%s4622_s1 + $0xc8] ss:$16 sps:$4 sm:$0xff]  }
  0x54   :  { %1733 = vmatpush1.bf16.msra.mxu1 %v3094_v27  ;;  %1693 = vmatprep.subr.bf16.mxu0 %v3099_v28  ;;  %v3172_v27 = vld [vmem:[%s4622_s1 + $0x2c8] ss:$16 sps:$4 sm:$0xff]   ;;  %v3177_v28 = vld [vmem:[%s4622_s1 + $0xac] ss:$16 sps:$4 sm:$0xff]  }
  0x55   :  { %1734 = vmatprep.subr.bf16.mxu1 %v3102_v29  ;;  %v3180_v29 = vld [vmem:[%s4622_s1 + $0x2ac] ss:$16 sps:$4 sm:$0xff]  }
  0x57   :  { %1694 = vmatpush1.bf16.msra.mxu0 %v3097_v30  ;;  %v3175_v30 = vld [vmem:[%s4622_s1 + $0xa8] ss:$16 sps:$4 sm:$0xff]  }
  0x58   :  { %1735 = vmatpush1.bf16.msra.mxu1 %v3100_v31  ;;  %1695 = vmatprep.subr.bf16.mxu0 %v3105_v32  ;;  %v3178_v31 = vld [vmem:[%s4622_s1 + $0x2a8] ss:$16 sps:$4 sm:$0xff]   ;;  %v3183_v32 = vld [vmem:[%s4622_s1 + $0x8c] ss:$16 sps:$4 sm:$0xff]  }
  0x59   :  { %1736 = vmatprep.subr.bf16.mxu1 %v3108_v33  ;;  %v3184_v33 = vld [vmem:[%s4622_s1 + $0x288] ss:$16 sps:$4 sm:$0xff]  }
  0x5b   :  { %1696 = vmatpush1.bf16.msra.mxu0 %v3103_v35  ;;  %v3192_v35 = vld [vmem:[%s4622_s1 + $0x26c] ss:$16 sps:$4 sm:$0xff]  }
  0x5c   :  { %1737 = vmatpush1.bf16.msra.mxu1 %v3106_v36  ;;  %1697 = vmatprep.subr.bf16.mxu0 %v3111_v39  ;;  %v3187_v36 = vld [vmem:[%s4622_s1 + $0x68] ss:$16 sps:$4 sm:$0xff]   ;;  %v3195_v39 = vld [vmem:[%s4622_s1 + $0x4c] ss:$16 sps:$4 sm:$0xff]  }
  0x5d   :  { %1738 = vmatprep.subr.bf16.mxu1 %v3114_v41  ;;  %v3198_v41 = vld [vmem:[%s4622_s1 + $0x24c] ss:$16 sps:$4 sm:$0xff]  }
  0x5f   :  { %1698 = vmatpush1.bf16.msra.mxu0 %v3109_v42  ;;  %v3193_v42 = vld [vmem:[%s4622_s1 + $0x48] ss:$16 sps:$4 sm:$0xff]  }
  0x60   :  { %1739 = vmatpush1.bf16.msra.mxu1 %v3112_v43  ;;  %1699 = vmatprep.subr.bf16.mxu0 %v3117_v44  ;;  %v3196_v43 = vld [vmem:[%s4622_s1 + $0x248] ss:$16 sps:$4 sm:$0xff]   ;;  %v3201_v44 = vld [vmem:[%s4622_s1 + $0x2c] ss:$16 sps:$4 sm:$0xff]  }
  0x61   :  { %1740 = vmatprep.subr.bf16.mxu1 %v3120_v45  ;;  %v3204_v45 = vld [vmem:[%s4622_s1 + $0x22c] ss:$16 sps:$4 sm:$0xff]  }
  0x63   :  { %1700 = vmatpush2.bf16.msra.mxu0 %v3115_v46  ;;  %v3199_v46 = vld [vmem:[%s4622_s1 + $0x28] ss:$16 sps:$4 sm:$0xff]  }
  0x64   :  { %1741 = vmatpush2.bf16.msra.mxu1 %v3118_v47  ;;  %1701 = vmatprep.subr.bf16.mxu0 %v3123_v48  ;;  %v3202_v47 = vld [vmem:[%s4622_s1 + $0x228] ss:$16 sps:$4 sm:$0xff]   ;;  %v3207_v48 = vld [vmem:[%s4622_s1 + $0xc] ss:$16 sps:$4 sm:$0xff]  }
  0x65   :  { %1742 = vmatprep.subr.bf16.mxu1 %v3126_v50  ;;  %v3210_v50 = vld [vmem:[%s4622_s1 + $0x20c] ss:$16 sps:$4 sm:$0xff]  }
  0x67   :  { %1702 = vmatpush2.bf16.msra.mxu0 %v3121_v51  ;;  %v3205_v51 = vld [vmem:[%s4622_s1 + $0x8] ss:$16 sps:$4 sm:$0xff]  }
  0x68   :  { %1743 = vmatpush2.bf16.msra.mxu1 %v3124_v53  ;;  %1703 = vmatprep.subr.bf16.mxu0 %v3129_v54  ;;  %v3208_v53 = vld [vmem:[%s4622_s1 + $0x208] ss:$16 sps:$4 sm:$0xff]   ;;  %v3213_v54 = vld [vmem:[%s4622_s1 + $0x1ec] ss:$16 sps:$4 sm:$0xff]  }
  0x69   :  { %1744 = vmatprep.subr.bf16.mxu1 %v3132_v55  ;;  %v3216_v55 = vld [vmem:[%s4622_s1 + $0x3ec] ss:$16 sps:$4 sm:$0xff]  }
  0x6b   :  { %1704 = vmatpush2.bf16.msra.mxu0 %v3127_v56  ;;  %v3211_v56 = vld [vmem:[%s4622_s1 + $0x1e8] ss:$16 sps:$4 sm:$0xff]  }
  0x6c   :  { %1745 = vmatpush2.bf16.msra.mxu1 %v3130_v57  ;;  %1705 = vmatprep.subr.bf16.mxu0 %v3135_v58  ;;  %v3214_v57 = vld [vmem:[%s4622_s1 + $0x3e8] ss:$16 sps:$4 sm:$0xff]   ;;  %v3219_v58 = vld [vmem:[%s4622_s1 + $0x1cc] ss:$16 sps:$4 sm:$0xff]  }
  0x6d   :  { %1746 = vmatprep.subr.bf16.mxu1 %v3138_v59  ;;  %v3222_v59 = vld [vmem:[%s4622_s1 + $0x3cc] ss:$16 sps:$4 sm:$0xff]  }
  0x6f   :  { %1706 = vmatpush2.bf16.msra.mxu0 %v3133_v60  ;;  %v3217_v60 = vld [vmem:[%s4622_s1 + $0x1c8] ss:$16 sps:$4 sm:$0xff]  }
  0x70   :  { %1747 = vmatpush2.bf16.msra.mxu1 %v3136_v61  ;;  %1707 = vmatprep.subr.bf16.mxu0 %v3141_v62  ;;  %v3220_v61 = vld [vmem:[%s4622_s1 + $0x3c8] ss:$16 sps:$4 sm:$0xff]   ;;  %v3225_v62 = vld [vmem:[%s4622_s1 + $0x1ac] ss:$16 sps:$4 sm:$0xff]  }
  0x71   :  { %1748 = vmatprep.subr.bf16.mxu1 %v3144_v63  ;;  %v3228_v63 = vld [vmem:[%s4622_s1 + $0x3ac] ss:$16 sps:$4 sm:$0xff]  }
  0x73   :  { %1708 = vmatpush2.bf16.msra.mxu0 %v3139_v0  ;;  %v3223_v0 = vld [vmem:[%s4622_s1 + $0x1a8] ss:$16 sps:$4 sm:$0xff]  }
  0x74   :  { %1749 = vmatpush2.bf16.msra.mxu1 %v3142_v1  ;;  %1709 = vmatprep.subr.bf16.mxu0 %v3147_v2  ;;  %v3226_v1 = vld [vmem:[%s4622_s1 + $0x3a8] ss:$16 sps:$4 sm:$0xff]   ;;  %v3231_v2 = vld [vmem:[%s4622_s1 + $0x18c] ss:$16 sps:$4 sm:$0xff]  }
  0x75   :  { %1750 = vmatprep.subr.bf16.mxu1 %v3150_v3  ;;  %v3234_v3 = vld [vmem:[%s4622_s1 + $0x38c] ss:$16 sps:$4 sm:$0xff]  }
  0x77   :  { %1710 = vmatpush2.bf16.msra.mxu0 %v3145_v4  ;;  %v3229_v4 = vld [vmem:[%s4622_s1 + $0x188] ss:$16 sps:$4 sm:$0xff]  }
  0x78   :  { %1751 = vmatpush2.bf16.msra.mxu1 %v3148_v5  ;;  %1711 = vmatprep.subr.bf16.mxu0 %v3153_v6  ;;  %v3232_v5 = vld [vmem:[%s4622_s1 + $0x388] ss:$16 sps:$4 sm:$0xff]   ;;  %v3237_v6 = vld [vmem:[%s4622_s1 + $0x16c] ss:$16 sps:$4 sm:$0xff]  }
  0x79   :  { %1752 = vmatprep.subr.bf16.mxu1 %v3156_v7  ;;  %v3240_v7 = vld [vmem:[%s4622_s1 + $0x36c] ss:$16 sps:$4 sm:$0xff]  }
  0x7b   :  { %1712 = vmatpush2.bf16.msra.mxu0 %v3151_v10  ;;  %v3235_v10 = vld [vmem:[%s4622_s1 + $0x168] ss:$16 sps:$4 sm:$0xff]  }
  0x7c   :  { %1753 = vmatpush2.bf16.msra.mxu1 %v3154_v11  ;;  %1713 = vmatprep.subr.bf16.mxu0 %v3159_v12  ;;  %v3238_v11 = vld [vmem:[%s4622_s1 + $0x368] ss:$16 sps:$4 sm:$0xff]   ;;  %v3243_v12 = vld [vmem:[%s4622_s1 + $0x14c] ss:$16 sps:$4 sm:$0xff]  }
  0x7d   :  { %1754 = vmatprep.subr.bf16.mxu1 %v3162_v13  ;;  %v3246_v13 = vld [vmem:[%s4622_s1 + $0x34c] ss:$16 sps:$4 sm:$0xff]  }
  0x7f   :  { %1714 = vmatpush2.bf16.msra.mxu0 %v3157_v14  ;;  %v3241_v14 = vld [vmem:[%s4622_s1 + $0x148] ss:$16 sps:$4 sm:$0xff]  }
  0x80   :  { %1755 = vmatpush2.bf16.msra.mxu1 %v3160_v15  ;;  %1765 = vmatprep.subr.bf16.mxu0 %v3165_v18  ;;  %v3244_v15 = vld [vmem:[%s4622_s1 + $0x348] ss:$16 sps:$4 sm:$0xff]  }
  0x81   :  { %1806 = vmatprep.subr.bf16.mxu1 %v3168_v19  ;;  %v3247_v18 = vld [vmem:[%s4622_s1 + $0x128] ss:$16 sps:$4 sm:$0xff]  }
  0x82   :  { %1716 = vmatmul.mubr.bf16.vlgmr.msra.gmra.mxu0 %v3943_v20  ;;  %v3250_v19 = vld [vmem:[%s4622_s1 + $0x328] ss:$16 sps:$4 sm:$0xff]  }
  0x83   :  { %1757 = vmatmul.mubr.bf16.vlgmr.msra.gmra.mxu1 %v3945_v21  ;;  %1766 = vmatpush1.bf16.msra.mxu0 %v3163_v22  ;;  %v3255_v22 = vld [vmem:[%s4622_s1 + $0x10c] ss:$16 sps:$4 sm:$0xff]  }
  0x84   :  { %1807 = vmatpush1.bf16.msra.mxu1 %v3166_v23  ;;  %1767 = vmatprep.subr.bf16.mxu0 %v3171_v24  ;;  %v3258_v23 = vld [vmem:[%s4622_s1 + $0x30c] ss:$16 sps:$4 sm:$0xff]   ;;  %v3253_v24 = vld [vmem:[%s4622_s1 + $0x108] ss:$16 sps:$4 sm:$0xff]  }
  0x85   :  { %1808 = vmatprep.subr.bf16.mxu1 %v3174_v25  ;;  %1797 = vmatprep.mubr.bf16.mxu0 %v3658_v49  ;;  %v3186_v49 = vld [vmem:[%s4622_s1 + $0x28c] ss:$16 sps:$4 sm:$0xff]   ;;  %v3256_v25 = vld [vmem:[%s4622_s1 + $0x308] ss:$16 sps:$4 sm:$0xff]  }
  0x86   :  { %1838 = vmatprep.mubr.bf16.mxu1 %v3666_v52  ;;  %v3181_v52 = vld [vmem:[%s4622_s1 + $0x88] ss:$16 sps:$4 sm:$0xff]  }
  0x87   :  { %1768 = vmatpush1.bf16.msra.mxu0 %v3169_v26  ;;  %v3261_v26 = vld [vmem:[%s4622_s1 + $0x4ec] ss:$16 sps:$4 sm:$0xff]  }
  0x88   :  { %1809 = vmatpush1.bf16.msra.mxu1 %v3172_v27  ;;  %1769 = vmatprep.subr.bf16.mxu0 %v3177_v28  ;;  %v3264_v27 = vld [vmem:[%s4622_s1 + $0x6ec] ss:$16 sps:$4 sm:$0xff]   ;;  %v3259_v28 = vld [vmem:[%s4622_s1 + $0x4e8] ss:$16 sps:$4 sm:$0xff]  }
  0x89   :  { %1810 = vmatprep.subr.bf16.mxu1 %v3180_v29  ;;  %v3262_v29 = vld [vmem:[%s4622_s1 + $0x6e8] ss:$16 sps:$4 sm:$0xff]  }
  0x8b   :  { %1770 = vmatpush1.bf16.msra.mxu0 %v3175_v30  ;;  %v3267_v30 = vld [vmem:[%s4622_s1 + $0x4cc] ss:$16 sps:$4 sm:$0xff]  }
  0x8c   :  { %1811 = vmatpush1.bf16.msra.mxu1 %v3178_v31  ;;  %1771 = vmatprep.subr.bf16.mxu0 %v3183_v32  ;;  %v3270_v31 = vld [vmem:[%s4622_s1 + $0x6cc] ss:$16 sps:$4 sm:$0xff]   ;;  %v3265_v32 = vld [vmem:[%s4622_s1 + $0x4c8] ss:$16 sps:$4 sm:$0xff]  }
  0x8d   :  { %1812 = vmatprep.subr.bf16.mxu1 %v3186_v49  ;;  %v3268_v49 = vld [vmem:[%s4622_s1 + $0x6c8] ss:$16 sps:$4 sm:$0xff]  }
  0x8f   :  { %1772 = vmatpush1.bf16.msra.mxu0 %v3181_v52  ;;  %v3273_v52 = vld [vmem:[%s4622_s1 + $0x4ac] ss:$16 sps:$4 sm:$0xff]  }
  0x90   :  { %1813 = vmatpush1.bf16.msra.mxu1 %v3184_v33  ;;  %1773 = vmatprep.subr.bf16.mxu0 %v3189_v34  ;;  %v3276_v33 = vld [vmem:[%s4622_s1 + $0x6ac] ss:$16 sps:$4 sm:$0xff]   ;;  %v3271_v34 = vld [vmem:[%s4622_s1 + $0x4a8] ss:$16 sps:$4 sm:$0xff]  }
  0x91   :  { %1814 = vmatprep.subr.bf16.mxu1 %v3192_v35  ;;  %v3282_v35 = vld [vmem:[%s4622_s1 + $0x68c] ss:$16 sps:$4 sm:$0xff]  }
  0x93   :  { %1774 = vmatpush1.bf16.msra.mxu0 %v3187_v36  ;;  %v3277_v36 = vld [vmem:[%s4622_s1 + $0x488] ss:$16 sps:$4 sm:$0xff]  }
  0x94   :  { %1815 = vmatpush1.bf16.msra.mxu1 %v3190_v38  ;;  %1775 = vmatprep.subr.bf16.mxu0 %v3195_v39  ;;  %v3288_v38 = vld [vmem:[%s4622_s1 + $0x66c] ss:$16 sps:$4 sm:$0xff]   ;;  %v3283_v39 = vld [vmem:[%s4622_s1 + $0x468] ss:$16 sps:$4 sm:$0xff]  }
  0x95   :  { %1816 = vmatprep.subr.bf16.mxu1 %v3198_v41  ;;  %v3286_v41 = vld [vmem:[%s4622_s1 + $0x668] ss:$16 sps:$4 sm:$0xff]  }
  0x97   :  { %1776 = vmatpush1.bf16.msra.mxu0 %v3193_v42  ;;  %v3291_v42 = vld [vmem:[%s4622_s1 + $0x44c] ss:$16 sps:$4 sm:$0xff]  }
  0x98   :  { %1817 = vmatpush1.bf16.msra.mxu1 %v3196_v43  ;;  %1777 = vmatprep.subr.bf16.mxu0 %v3201_v44  ;;  %v3294_v43 = vld [vmem:[%s4622_s1 + $0x64c] ss:$16 sps:$4 sm:$0xff]   ;;  %v3289_v44 = vld [vmem:[%s4622_s1 + $0x448] ss:$16 sps:$4 sm:$0xff]  }
  0x99   :  { %1818 = vmatprep.subr.bf16.mxu1 %v3204_v45  ;;  %v3292_v45 = vld [vmem:[%s4622_s1 + $0x648] ss:$16 sps:$4 sm:$0xff]  }
  0x9b   :  { %1778 = vmatpush1.bf16.msra.mxu0 %v3199_v46  ;;  %v3297_v46 = vld [vmem:[%s4622_s1 + $0x42c] ss:$16 sps:$4 sm:$0xff]  }
  0x9c   :  { %1819 = vmatpush1.bf16.msra.mxu1 %v3202_v47  ;;  %1779 = vmatprep.subr.bf16.mxu0 %v3207_v48  ;;  %v3300_v47 = vld [vmem:[%s4622_s1 + $0x62c] ss:$16 sps:$4 sm:$0xff]   ;;  %v3295_v48 = vld [vmem:[%s4622_s1 + $0x428] ss:$16 sps:$4 sm:$0xff]  }
  0x9d   :  { %1820 = vmatprep.subr.bf16.mxu1 %v3210_v50  ;;  %v3298_v50 = vld [vmem:[%s4622_s1 + $0x628] ss:$16 sps:$4 sm:$0xff]  }
  0x9f   :  { %1780 = vmatpush1.bf16.msra.mxu0 %v3205_v51  ;;  %v3303_v51 = vld [vmem:[%s4622_s1 + $0x40c] ss:$16 sps:$4 sm:$0xff]  }
  0xa0   :  { %1821 = vmatpush1.bf16.msra.mxu1 %v3208_v53  ;;  %1781 = vmatprep.subr.bf16.mxu0 %v3213_v54  ;;  %v3306_v53 = vld [vmem:[%s4622_s1 + $0x60c] ss:$16 sps:$4 sm:$0xff]   ;;  %v3301_v54 = vld [vmem:[%s4622_s1 + $0x408] ss:$16 sps:$4 sm:$0xff]  }
  0xa1   :  { %1822 = vmatprep.subr.bf16.mxu1 %v3216_v55  ;;  %v3304_v55 = vld [vmem:[%s4622_s1 + $0x608] ss:$16 sps:$4 sm:$0xff]  }
  0xa3   :  { %1782 = vmatpush2.bf16.msra.mxu0 %v3211_v56  ;;  %v3309_v56 = vld [vmem:[%s4622_s1 + $0x5ec] ss:$16 sps:$4 sm:$0xff]  }
  0xa4   :  { %1823 = vmatpush2.bf16.msra.mxu1 %v3214_v57  ;;  %1783 = vmatprep.subr.bf16.mxu0 %v3219_v58  ;;  %v3312_v57 = vld [vmem:[%s4622_s1 + $0x7ec] ss:$16 sps:$4 sm:$0xff]   ;;  %v3307_v58 = vld [vmem:[%s4622_s1 + $0x5e8] ss:$16 sps:$4 sm:$0xff]  }
  0xa5   :  { %1824 = vmatprep.subr.bf16.mxu1 %v3222_v59  ;;  %v3310_v59 = vld [vmem:[%s4622_s1 + $0x7e8] ss:$16 sps:$4 sm:$0xff]  }
  0xa7   :  { %1784 = vmatpush2.bf16.msra.mxu0 %v3217_v60  ;;  %v3315_v60 = vld [vmem:[%s4622_s1 + $0x5cc] ss:$16 sps:$4 sm:$0xff]  }
  0xa8   :  { %1825 = vmatpush2.bf16.msra.mxu1 %v3220_v61  ;;  %1785 = vmatprep.subr.bf16.mxu0 %v3225_v62  ;;  %v3318_v61 = vld [vmem:[%s4622_s1 + $0x7cc] ss:$16 sps:$4 sm:$0xff]   ;;  %v3313_v62 = vld [vmem:[%s4622_s1 + $0x5c8] ss:$16 sps:$4 sm:$0xff]  }
  0xa9   :  { %1826 = vmatprep.subr.bf16.mxu1 %v3228_v63  ;;  %v3316_v63 = vld [vmem:[%s4622_s1 + $0x7c8] ss:$16 sps:$4 sm:$0xff]  }
  0xab   :  { %1786 = vmatpush2.bf16.msra.mxu0 %v3223_v0  ;;  %v3321_v0 = vld [vmem:[%s4622_s1 + $0x5ac] ss:$16 sps:$4 sm:$0xff]  }
  0xac   :  { %1827 = vmatpush2.bf16.msra.mxu1 %v3226_v1  ;;  %1787 = vmatprep.subr.bf16.mxu0 %v3231_v2  ;;  %v3324_v1 = vld [vmem:[%s4622_s1 + $0x7ac] ss:$16 sps:$4 sm:$0xff]   ;;  %v3319_v2 = vld [vmem:[%s4622_s1 + $0x5a8] ss:$16 sps:$4 sm:$0xff]  }
  0xad   :  { %1828 = vmatprep.subr.bf16.mxu1 %v3234_v3  ;;  %v3322_v3 = vld [vmem:[%s4622_s1 + $0x7a8] ss:$16 sps:$4 sm:$0xff]  }
  0xaf   :  { %1788 = vmatpush2.bf16.msra.mxu0 %v3229_v4  ;;  %v3327_v4 = vld [vmem:[%s4622_s1 + $0x58c] ss:$16 sps:$4 sm:$0xff]  }
  0xb0   :  { %1829 = vmatpush2.bf16.msra.mxu1 %v3232_v5  ;;  %1789 = vmatprep.subr.bf16.mxu0 %v3237_v6  ;;  %v3330_v5 = vld [vmem:[%s4622_s1 + $0x78c] ss:$16 sps:$4 sm:$0xff]   ;;  %v3325_v6 = vld [vmem:[%s4622_s1 + $0x588] ss:$16 sps:$4 sm:$0xff]  }
  0xb1   :  { %1830 = vmatprep.subr.bf16.mxu1 %v3240_v7  ;;  %v3328_v7 = vld [vmem:[%s4622_s1 + $0x788] ss:$16 sps:$4 sm:$0xff]  }
  0xb3   :  { %1790 = vmatpush2.bf16.msra.mxu0 %v3235_v10  ;;  %v3333_v10 = vld [vmem:[%s4622_s1 + $0x56c] ss:$16 sps:$4 sm:$0xff]  }
  0xb4   :  { %1831 = vmatpush2.bf16.msra.mxu1 %v3238_v11  ;;  %1791 = vmatprep.subr.bf16.mxu0 %v3243_v12  ;;  %v3336_v11 = vld [vmem:[%s4622_s1 + $0x76c] ss:$16 sps:$4 sm:$0xff]   ;;  %v3331_v12 = vld [vmem:[%s4622_s1 + $0x568] ss:$16 sps:$4 sm:$0xff]  }
  0xb5   :  { %1832 = vmatprep.subr.bf16.mxu1 %v3246_v13  ;;  %v3334_v13 = vld [vmem:[%s4622_s1 + $0x768] ss:$16 sps:$4 sm:$0xff]  }
  0xb7   :  { %1792 = vmatpush2.bf16.msra.mxu0 %v3241_v14  ;;  %v3339_v14 = vld [vmem:[%s4622_s1 + $0x54c] ss:$16 sps:$4 sm:$0xff]  }
  0xb8   :  { %1833 = vmatpush2.bf16.msra.mxu1 %v3244_v15  ;;  %1793 = vmatprep.subr.bf16.mxu0 %v3249_v16  ;;  %v3342_v15 = vld [vmem:[%s4622_s1 + $0x74c] ss:$16 sps:$4 sm:$0xff]   ;;  %v3337_v16 = vld [vmem:[%s4622_s1 + $0x548] ss:$16 sps:$4 sm:$0xff]  }
  0xb9   :  { %1834 = vmatprep.subr.bf16.mxu1 %v3252_v17  ;;  %v3340_v17 = vld [vmem:[%s4622_s1 + $0x748] ss:$16 sps:$4 sm:$0xff]  }
  0xbb   :  { %1794 = vmatpush2.bf16.msra.mxu0 %v3247_v18  ;;  %v3345_v18 = vld [vmem:[%s4622_s1 + $0x52c] ss:$16 sps:$4 sm:$0xff]  }
  0xbc   :  { %1835 = vmatpush2.bf16.msra.mxu1 %v3250_v19  ;;  %1795 = vmatprep.subr.bf16.mxu0 %v3255_v22  ;;  %v3348_v19 = vld [vmem:[%s4622_s1 + $0x72c] ss:$16 sps:$4 sm:$0xff]   ;;  %v3343_v22 = vld [vmem:[%s4622_s1 + $0x528] ss:$16 sps:$4 sm:$0xff]  }
  0xbd   :  { %1836 = vmatprep.subr.bf16.mxu1 %v3258_v23  ;;  %v3346_v23 = vld [vmem:[%s4622_s1 + $0x728] ss:$16 sps:$4 sm:$0xff]  }
  0xbf   :  { %1796 = vmatpush2.bf16.msra.mxu0 %v3253_v24  ;;  %v3351_v24 = vld [vmem:[%s4622_s1 + $0x50c] ss:$16 sps:$4 sm:$0xff]  }
  0xc0   :  { %1837 = vmatpush2.bf16.msra.mxu1 %v3256_v25  ;;  %1847 = vmatprep.subr.bf16.mxu0 %v3261_v26  ;;  %v3354_v25 = vld [vmem:[%s4622_s1 + $0x70c] ss:$16 sps:$4 sm:$0xff]   ;;  %v3349_v26 = vld [vmem:[%s4622_s1 + $0x508] ss:$16 sps:$4 sm:$0xff]  }
  0xc1   :  { %1888 = vmatprep.subr.bf16.mxu1 %v3264_v27  ;;  %v3352_v27 = vld [vmem:[%s4622_s1 + $0x708] ss:$16 sps:$4 sm:$0xff]  }
  0xc2   :  { %1798 = vmatmul.mubr.bf16.vlgmr.msra.gmra.mxu0 %v3727_v8  ;;  %v3274_v8 = vld [vmem:[%s4622_s1 + $0x6a8] ss:$16 sps:$4 sm:$0xff]  }
  0xc3   :  { %1839 = vmatmul.mubr.bf16.vlgmr.msra.gmra.mxu1 %v3729_v9  ;;  %1848 = vmatpush1.bf16.msra.mxu0 %v3259_v28  ;;  %v3279_v9 = vld [vmem:[%s4622_s1 + $0x48c] ss:$16 sps:$4 sm:$0xff]  }
  0xc4   :  { %1889 = vmatpush1.bf16.msra.mxu1 %v3262_v29  ;;  %1849 = vmatprep.subr.bf16.mxu0 %v3267_v30  ;;  %v3357_v28 = vld [vmem:[%s4624_s3 + $0x74] ss:$8 sps:$4 sm:$0xff]   ;;  %v3355_v29 = vld [vmem:[%s4624_s3 + $0x70] ss:$8 sps:$4 sm:$0xff]   ;;  %v3360_v30 = vld [vmem:[%s4624_s3 + $0x64] ss:$8 sps:$4 sm:$0xff]  }
  0xc5   :  { %1890 = vmatprep.subr.bf16.mxu1 %v3270_v31  ;;  %1879 = vmatprep.mubr.bf16.mxu0 %v3814_v37  ;;  %v3280_v37 = vld [vmem:[%s4622_s1 + $0x688] ss:$16 sps:$4 sm:$0xff]  }
  0xc6   :  { %1920 = vmatprep.mubr.bf16.mxu1 %v3822_v40  ;;  %v3285_v40 = vld [vmem:[%s4622_s1 + $0x46c] ss:$16 sps:$4 sm:$0xff]  }
  0xc7   :  { %1850 = vmatpush1.bf16.msra.mxu0 %v3265_v32 }
  0xc8   :  { %1891 = vmatpush1.bf16.msra.mxu1 %v3268_v49  ;;  %1851 = vmatprep.subr.bf16.mxu0 %v3273_v52  ;;  %v3358_v49 = vld [vmem:[%s4624_s3 + $0x60] ss:$8 sps:$4 sm:$0xff]  }
  0xc9   :  { %1892 = vmatprep.subr.bf16.mxu1 %v3276_v33 }
  0xcb   :  { %1852 = vmatpush1.bf16.msra.mxu0 %v3271_v34  ;;  %v3363_v34 = vld [vmem:[%s4624_s3 + $0x54] ss:$8 sps:$4 sm:$0xff]  }
  0xcc   :  { %1893 = vmatpush1.bf16.msra.mxu1 %v3274_v8  ;;  %1853 = vmatprep.subr.bf16.mxu0 %v3279_v9 }
  0xcd   :  { %1894 = vmatprep.subr.bf16.mxu1 %v3282_v35 }
  0xcf   :  { %1854 = vmatpush1.bf16.msra.mxu0 %v3277_v36  ;;  %v3366_v36 = vld [vmem:[%s4624_s3 + $0x44] ss:$8 sps:$4 sm:$0xff]  }
  0xd0   :  { %1895 = vmatpush1.bf16.msra.mxu1 %v3280_v37  ;;  %1855 = vmatprep.subr.bf16.mxu0 %v3285_v40  ;;  %v3403_v37 = vld [vmem:[%s4624_s3 + $0x170] ss:$8 sps:$4 sm:$0xff]   ;;  %v3405_v40 = vld [vmem:[%s4624_s3 + $0x174] ss:$8 sps:$4 sm:$0xff]  }
  0xd1   :  { %1896 = vmatprep.subr.bf16.mxu1 %v3288_v38  ;;  %v3408_v38 = vld [vmem:[%s4624_s3 + $0x164] ss:$8 sps:$4 sm:$0xff]  }
  0xd3   :  { %1856 = vmatpush1.bf16.msra.mxu0 %v3283_v39  ;;  %v3364_v39 = vld [vmem:[%s4624_s3 + $0x40] ss:$8 sps:$4 sm:$0xff]  }
  0xd4   :  { %1897 = vmatpush1.bf16.msra.mxu1 %v3286_v41  ;;  %1857 = vmatprep.subr.bf16.mxu0 %v3291_v42  ;;  %v3406_v41 = vld [vmem:[%s4624_s3 + $0x160] ss:$8 sps:$4 sm:$0xff]   ;;  %v3369_v42 = vld [vmem:[%s4624_s3 + $0x34] ss:$8 sps:$4 sm:$0xff]  }
  0xd5   :  { %1898 = vmatprep.subr.bf16.mxu1 %v3294_v43  ;;  %v3411_v43 = vld [vmem:[%s4624_s3 + $0x154] ss:$8 sps:$4 sm:$0xff]  }
  0xd7   :  { %1858 = vmatpush1.bf16.msra.mxu0 %v3289_v44  ;;  %v3367_v44 = vld [vmem:[%s4624_s3 + $0x30] ss:$8 sps:$4 sm:$0xff]  }
  0xd8   :  { %1899 = vmatpush1.bf16.msra.mxu1 %v3292_v45  ;;  %1859 = vmatprep.subr.bf16.mxu0 %v3297_v46  ;;  %v3409_v45 = vld [vmem:[%s4624_s3 + $0x150] ss:$8 sps:$4 sm:$0xff]   ;;  %v3372_v46 = vld [vmem:[%s4624_s3 + $0x24] ss:$8 sps:$4 sm:$0xff]  }
  0xd9   :  { %1900 = vmatprep.subr.bf16.mxu1 %v3300_v47  ;;  %v3414_v47 = vld [vmem:[%s4624_s3 + $0x144] ss:$8 sps:$4 sm:$0xff]  }
  0xdb   :  { %1860 = vmatpush1.bf16.msra.mxu0 %v3295_v48  ;;  %v3370_v48 = vld [vmem:[%s4624_s3 + $0x20] ss:$8 sps:$4 sm:$0xff]  }
  0xdc   :  { %1901 = vmatpush1.bf16.msra.mxu1 %v3298_v50  ;;  %1861 = vmatprep.subr.bf16.mxu0 %v3303_v51  ;;  %v3412_v50 = vld [vmem:[%s4624_s3 + $0x140] ss:$8 sps:$4 sm:$0xff]   ;;  %v3375_v51 = vld [vmem:[%s4624_s3 + $0x14] ss:$8 sps:$4 sm:$0xff]  }
  0xdd   :  { %1902 = vmatprep.subr.bf16.mxu1 %v3306_v53  ;;  %v3417_v53 = vld [vmem:[%s4624_s3 + $0x134] ss:$8 sps:$4 sm:$0xff]  }
  0xdf   :  { %1862 = vmatpush1.bf16.msra.mxu0 %v3301_v54  ;;  %v3373_v54 = vld [vmem:[%s4624_s3 + $0x10] ss:$8 sps:$4 sm:$0xff]  }
  0xe0   :  { %1903 = vmatpush1.bf16.msra.mxu1 %v3304_v55  ;;  %1863 = vmatprep.subr.bf16.mxu0 %v3309_v56  ;;  %v3415_v55 = vld [vmem:[%s4624_s3 + $0x130] ss:$8 sps:$4 sm:$0xff]   ;;  %v3378_v56 = vld [vmem:[%s4624_s3 + $0x4] ss:$8 sps:$4 sm:$0xff]  }
  0xe1   :  { %1904 = vmatprep.subr.bf16.mxu1 %v3312_v57  ;;  %v3420_v57 = vld [vmem:[%s4624_s3 + $0x124] ss:$8 sps:$4 sm:$0xff]  }
  0xe3   :  { %1864 = vmatpush2.bf16.msra.mxu0 %v3307_v58  ;;  %v3376_v58 = vld [vmem:[%s4624_s3] ss:$8 sps:$4 sm:$0xff]  }
  0xe4   :  { %1905 = vmatpush2.bf16.msra.mxu1 %v3310_v59  ;;  %1865 = vmatprep.subr.bf16.mxu0 %v3315_v60  ;;  %v3418_v59 = vld [vmem:[%s4624_s3 + $0x120] ss:$8 sps:$4 sm:$0xff]   ;;  %v3381_v60 = vld [vmem:[%s4624_s3 + $0xf4] ss:$8 sps:$4 sm:$0xff]  }
  0xe5   :  { %1906 = vmatprep.subr.bf16.mxu1 %v3318_v61  ;;  %v3423_v61 = vld [vmem:[%s4624_s3 + $0x114] ss:$8 sps:$4 sm:$0xff]  }
  0xe7   :  { %1866 = vmatpush2.bf16.msra.mxu0 %v3313_v62  ;;  %v3379_v62 = vld [vmem:[%s4624_s3 + $0xf0] ss:$8 sps:$4 sm:$0xff]  }
  0xe8   :  { %1907 = vmatpush2.bf16.msra.mxu1 %v3316_v63  ;;  %1867 = vmatprep.subr.bf16.mxu0 %v3321_v0  ;;  %v3421_v63 = vld [vmem:[%s4624_s3 + $0x110] ss:$8 sps:$4 sm:$0xff]   ;;  %v3384_v0 = vld [vmem:[%s4624_s3 + $0xe4] ss:$8 sps:$4 sm:$0xff]  }
  0xe9   :  { %1908 = vmatprep.subr.bf16.mxu1 %v3324_v1  ;;  %v3426_v1 = vld [vmem:[%s4624_s3 + $0x104] ss:$8 sps:$4 sm:$0xff]  }
  0xeb   :  { %1868 = vmatpush2.bf16.msra.mxu0 %v3319_v2  ;;  %v3382_v2 = vld [vmem:[%s4624_s3 + $0xe0] ss:$8 sps:$4 sm:$0xff]  }
  0xec   :  { %1909 = vmatpush2.bf16.msra.mxu1 %v3322_v3  ;;  %1869 = vmatprep.subr.bf16.mxu0 %v3327_v4  ;;  %v3424_v3 = vld [vmem:[%s4624_s3 + $0x100] ss:$8 sps:$4 sm:$0xff]   ;;  %v3387_v4 = vld [vmem:[%s4624_s3 + $0xd4] ss:$8 sps:$4 sm:$0xff]  }
  0xed   :  { %1910 = vmatprep.subr.bf16.mxu1 %v3330_v5  ;;  %v3429_v5 = vld [vmem:[%s4624_s3 + $0x1f4] ss:$8 sps:$4 sm:$0xff]  }
  0xef   :  { %1870 = vmatpush2.bf16.msra.mxu0 %v3325_v6  ;;  %v3385_v6 = vld [vmem:[%s4624_s3 + $0xd0] ss:$8 sps:$4 sm:$0xff]  }
  0xf0   :  { %1911 = vmatpush2.bf16.msra.mxu1 %v3328_v7  ;;  %1871 = vmatprep.subr.bf16.mxu0 %v3333_v10  ;;  %v3427_v7 = vld [vmem:[%s4624_s3 + $0x1f0] ss:$8 sps:$4 sm:$0xff]   ;;  %v3390_v10 = vld [vmem:[%s4624_s3 + $0xc4] ss:$8 sps:$4 sm:$0xff]  }
  0xf1   :  { %1912 = vmatprep.subr.bf16.mxu1 %v3336_v11  ;;  %v3432_v11 = vld [vmem:[%s4624_s3 + $0x1e4] ss:$8 sps:$4 sm:$0xff]  }
  0xf3   :  { %1872 = vmatpush2.bf16.msra.mxu0 %v3331_v12  ;;  %v3388_v12 = vld [vmem:[%s4624_s3 + $0xc0] ss:$8 sps:$4 sm:$0xff]  }
  0xf4   :  { %1913 = vmatpush2.bf16.msra.mxu1 %v3334_v13  ;;  %1873 = vmatprep.subr.bf16.mxu0 %v3339_v14  ;;  %v3430_v13 = vld [vmem:[%s4624_s3 + $0x1e0] ss:$8 sps:$4 sm:$0xff]   ;;  %v3393_v14 = vld [vmem:[%s4624_s3 + $0xb4] ss:$8 sps:$4 sm:$0xff]  }
  0xf5   :  { %1914 = vmatprep.subr.bf16.mxu1 %v3342_v15  ;;  %v3435_v15 = vld [vmem:[%s4624_s3 + $0x1d4] ss:$8 sps:$4 sm:$0xff]  }
  0xf7   :  { %1874 = vmatpush2.bf16.msra.mxu0 %v3337_v16  ;;  %v301_v16 = vlaneseq }
  0xf8   :  { %1915 = vmatpush2.bf16.msra.mxu1 %v3340_v17  ;;  %1875 = vmatprep.subr.bf16.mxu0 %v3345_v18  ;;  %v3391_v17 = vld [vmem:[%s4624_s3 + $0xb0] ss:$8 sps:$4 sm:$0xff]  }
  0xf9   :  { %1916 = vmatprep.subr.bf16.mxu1 %v3348_v19  ;;  %v3433_v18 = vld [vmem:[%s4624_s3 + $0x1d0] ss:$8 sps:$4 sm:$0xff]   ;;  %v3396_v19 = vld [vmem:[%s4624_s3 + $0xa4] ss:$8 sps:$4 sm:$0xff]  }
  0xfb   :  { %1876 = vmatpush2.bf16.msra.mxu0 %v3343_v22  ;;  %v3438_v22 = vld [vmem:[%s4624_s3 + $0x1c4] ss:$8 sps:$4 sm:$0xff]  }
  0xfc   :  { %1917 = vmatpush2.bf16.msra.mxu1 %v3346_v23  ;;  %1877 = vmatprep.subr.bf16.mxu0 %v3351_v24  ;;  %v4493_v23 = vshrl.u32 %v301_v16, 7  ;;  %v3394_v24 = vld [vmem:[%s4624_s3 + $0xa0] ss:$8 sps:$4 sm:$0xff]   ;;  %v3462_v16 = vld [vmem:[%s4626_s5 + $0x10] sm:$0xff]  }
  0xfd   :  { %1918 = vmatprep.subr.bf16.mxu1 %v3354_v25  ;;  %v3436_v25 = vld [vmem:[%s4624_s3 + $0x1c0] ss:$8 sps:$4 sm:$0xff]  }
  0xff   :  { %1878 = vmatpush2.bf16.msra.mxu0 %v3349_v26  ;;  %v3399_v26 = vld [vmem:[%s4624_s3 + $0x94] ss:$8 sps:$4 sm:$0xff]  }
 0x100   :  { %1919 = vmatpush2.bf16.msra.mxu1 %v3352_v27  ;;  %2333 = vmatprep.subr.bf16.mxu0 %v3357_v28  ;;  %v3441_v27 = vld [vmem:[%s4624_s3 + $0x1b4] ss:$8 sps:$4 sm:$0xff]   ;;  %v303_v28 = vsub.s32 0, %v4493_v23 }
 0x101   :  { %2374 = vmatprep.subr.bf16.mxu1 %v3405_v40 }
 0x102   :  { %v4342_v31 = vpop.f32.mrf.mxu0  ;;  %1880 = vmatmul.mubr.bf16.vlgmr.msra.gmra.mxu0 %v3943_v20  ;;  %v3361_v20 = vld [vmem:[%s4624_s3 + $0x50] ss:$8 sps:$4 sm:$0xff]  }
 0x103   :  { %v4344_v32 = vpop.f32.mrf.mxu1  ;;  %1921 = vmatmul.mubr.bf16.vlgmr.msra.gmra.mxu1 %v3945_v21  ;;  %2334 = vmatpush1.bf16.msra.mxu0 %v3355_v29  ;;  %v4511_v29 = vld [vmem:[%s4625_s2] sm:$0xf] }
 0x104   :  { %v4351_v52 = vpop.f32.mrf.mxu0  ;;  %2335 = vmatprep.subr.bf16.mxu0 %v3360_v30  ;;  %2375 = vmatpush1.bf16.msra.mxu1 %v3403_v37  ;;  %v307_v30 = vsub.s32 1, %v4493_v23  ;;  %v3444_v37 = vld [vmem:[%s4624_s3 + $0x1a4] ss:$8 sps:$4 sm:$0xff]  }
 0x105   :  { %v4353_v33 = vpop.f32.mrf.mxu1  ;;  %2376 = vmatprep.subr.bf16.mxu1 %v3408_v38  ;;  %v3442_v38 = vld [vmem:[%s4624_s3 + $0x1a0] ss:$8 sps:$4 sm:$0xff]  }
 0x106   :  { %v1639_v8 = vpop.f32.mrf.mxu0 }
 0x107   :  { %v1680_v9 = vpop.f32.mrf.mxu1  ;;  %2336 = vmatpush1.bf16.msra.mxu0 %v3358_v49  ;;  %v3397_v49 = vld [vmem:[%s4624_s3 + $0x90] ss:$8 sps:$4 sm:$0xff]   ;;  %v3402_v8 = vld [vmem:[%s4624_s3 + $0x84] ss:$8 sps:$4 sm:$0xff]  }
 0x108   :  { %v1640_v21 = vpop.f32.mrf.mxu0  ;;  %2337 = vmatprep.subr.bf16.mxu0 %v3363_v34  ;;  %2377 = vmatpush1.bf16.msra.mxu1 %v3406_v41  ;;  %v3439_v34 = vld [vmem:[%s4624_s3 + $0x1b0] ss:$8 sps:$4 sm:$0xff]   ;;  %v304_v9 = vrot.slane %v4511_v29, %v303_v28 }
 0x109   :  { %v1681_v35 = vpop.f32.mrf.mxu1  ;;  %2378 = vmatprep.subr.bf16.mxu1 %v3411_v43  ;;  %v3400_v21 = vld [vmem:[%s4624_s3 + $0x80] ss:$8 sps:$4 sm:$0xff]  }
 0x10a   :  { %v1636_v35 = vadd.f32 %v4342_v31, %v304_v9 }
 0x10b   :  { %2338 = vmatpush1.bf16.msra.mxu0 %v3361_v20  ;;  %v308_v20 = vrot.slane %v4511_v29, %v307_v30 }
 0x10c   :  { %2339 = vmatprep.subr.bf16.mxu0 %v3366_v36  ;;  %2379 = vmatpush1.bf16.msra.mxu1 %v3409_v45  ;;  %v1677_v40 = vadd.f32 %v4344_v32, %v1636_v35  ;;  %v3445_v32 = vld [vmem:[%s4624_s3 + $0x190] ss:$8 sps:$4 sm:$0xff]  }
 0x10d   :  { %2380 = vmatprep.subr.bf16.mxu1 %v3414_v47  ;;  %v1638_v36 = vadd.f32 %v4351_v52, %v308_v20 }
 0x10f   :  { %2340 = vmatpush1.bf16.msra.mxu0 %v3364_v39 }
 0x110   :  { %2341 = vmatprep.subr.bf16.mxu0 %v3369_v42  ;;  %2381 = vmatpush1.bf16.msra.mxu1 %v3412_v50  ;;  %v1679_v42 = vadd.f32 %v4353_v33, %v1638_v36 }
 0x111   :  { %2382 = vmatprep.subr.bf16.mxu1 %v3417_v53 }
 0x113   :  { %2342 = vmatpush1.bf16.msra.mxu0 %v3367_v44  ;;  %v3447_v44 = vld [vmem:[%s4624_s3 + $0x194] ss:$8 sps:$4 sm:$0xff]  }
 0x114   :  { %2343 = vmatprep.subr.bf16.mxu0 %v3372_v46  ;;  %2383 = vmatpush1.bf16.msra.mxu1 %v3415_v55 }
 0x115   :  { %2384 = vmatprep.subr.bf16.mxu1 %v3420_v57 }
 0x117   :  { %2344 = vmatpush1.bf16.msra.mxu0 %v3370_v48 }
 0x118   :  { %2345 = vmatprep.subr.bf16.mxu0 %v3375_v51  ;;  %2385 = vmatpush1.bf16.msra.mxu1 %v3418_v59 }
 0x119   :  { %2386 = vmatprep.subr.bf16.mxu1 %v3423_v61 }
 0x11b   :  { %2346 = vmatpush1.bf16.msra.mxu0 %v3373_v54  ;;  %v3450_v54 = vld [vmem:[%s4624_s3 + $0x184] ss:$8 sps:$4 sm:$0xff]  }
 0x11c   :  { %2347 = vmatprep.subr.bf16.mxu0 %v3378_v56  ;;  %2387 = vmatpush1.bf16.msra.mxu1 %v3421_v63  ;;  %v3448_v56 = vld [vmem:[%s4624_s3 + $0x180] ss:$8 sps:$4 sm:$0xff]  }
 0x11d   :  { %2388 = vmatprep.subr.bf16.mxu1 %v3426_v1 }
 0x11f   :  { %2348 = vmatpush1.bf16.msra.mxu0 %v3376_v58 }
 0x120   :  { %2349 = vmatprep.subr.bf16.mxu0 %v3381_v60  ;;  %2389 = vmatpush1.bf16.msra.mxu1 %v3424_v3  ;;  %v3451_v3 = vld [vmem:[%s4626_s5 + $0x78] sm:$0xff]  }
 0x121   :  { %2390 = vmatprep.subr.bf16.mxu1 %v3429_v5  ;;  %v3453_v5 = vld [vmem:[%s4626_s5 + $0x70] sm:$0xff]  }
 0x123   :  { %2350 = vmatpush2.bf16.msra.mxu0 %v3379_v62 }
 0x124   :  { %2351 = vmatprep.subr.bf16.mxu0 %v3384_v0  ;;  %2391 = vmatpush2.bf16.msra.mxu1 %v3427_v7  ;;  %v3455_v7 = vld [vmem:[%s4626_s5 + $0x68] sm:$0xff]  }
 0x125   :  { %2392 = vmatprep.subr.bf16.mxu1 %v3432_v11  ;;  %v3457_v11 = vld [vmem:[%s4626_s5 + $0x60] sm:$0xff]  }
 0x127   :  { %2352 = vmatpush2.bf16.msra.mxu0 %v3382_v2 }
 0x128   :  { %2353 = vmatprep.subr.bf16.mxu0 %v3387_v4  ;;  %2393 = vmatpush2.bf16.msra.mxu1 %v3430_v13  ;;  %v3452_v4 = vld [vmem:[%s4626_s5 + $0x38] sm:$0xff]  }
 0x129   :  { %2394 = vmatprep.subr.bf16.mxu1 %v3435_v15  ;;  %v3459_v13 = vld [vmem:[%s4626_s5 + $0x58] sm:$0xff]   ;;  %v3461_v15 = vld [vmem:[%s4626_s5 + $0x50] sm:$0xff]  }
 0x12b   :  { %2354 = vmatpush2.bf16.msra.mxu0 %v3385_v6  ;;  %v3454_v6 = vld [vmem:[%s4626_s5 + $0x30] sm:$0xff]  }
 0x12c   :  { %2355 = vmatprep.subr.bf16.mxu0 %v3390_v10  ;;  %2395 = vmatpush2.bf16.msra.mxu1 %v3433_v18  ;;  %v3456_v10 = vld [vmem:[%s4626_s5 + $0x28] sm:$0xff]   ;;  %v315_v18 = vsub.s32 3, %v4493_v23 }
 0x12d   :  { %2396 = vmatprep.subr.bf16.mxu1 %v3438_v22 }
 0x12e   :  { %v316_v22 = vrot.slane %v4511_v29, %v315_v18 }
 0x12f   :  { %2356 = vmatpush2.bf16.msra.mxu0 %v3388_v12  ;;  %v3458_v12 = vld [vmem:[%s4626_s5 + $0x20] sm:$0xff]  }
 0x130   :  { %2357 = vmatprep.subr.bf16.mxu0 %v3393_v14  ;;  %2397 = vmatpush2.bf16.msra.mxu1 %v3436_v25  ;;  %v3460_v14 = vld [vmem:[%s4626_s5 + $0x18] sm:$0xff]  }
 0x131   :  { %2398 = vmatprep.subr.bf16.mxu1 %v3441_v27 }
 0x133   :  { %2358 = vmatpush2.bf16.msra.mxu0 %v3391_v17  ;;  %v311_v17 = vsub.s32 2, %v4493_v23  ;;  %v2932_v23 = vld [vmem:[%s4628_s6] ss:$0 sm:$0xff] }
 0x134   :  { %2359 = vmatprep.subr.bf16.mxu0 %v3396_v19  ;;  %2399 = vmatpush2.bf16.msra.mxu1 %v3439_v34 }
 0x135   :  { %2400 = vmatprep.subr.bf16.mxu1 %v3444_v37  ;;  %v312_v19 = vrot.slane %v4511_v29, %v311_v17 }
 0x137   :  { %2360 = vmatpush2.bf16.msra.mxu0 %v3394_v24 }
 0x138   :  { %2361 = vmatprep.subr.bf16.mxu0 %v3399_v26  ;;  %2401 = vmatpush2.bf16.msra.mxu1 %v3442_v38 }
 0x139   :  { %2402 = vmatprep.subr.bf16.mxu1 %v3447_v44  ;;  %v3464_v44 = vld [vmem:[%s4626_s5 + $0x8] sm:$0xff]  }
 0x13b   :  { %2362 = vmatpush2.bf16.msra.mxu0 %v3397_v49 }
 0x13c   :  { %2363 = vmatprep.subr.bf16.mxu0 %v3402_v8  ;;  %2403 = vmatpush2.bf16.msra.mxu1 %v3445_v32  ;;  %v3465_v32 = vld [vmem:[%s4626_s5 + $0x40] sm:$0xff]  }
 0x13d   :  { %2404 = vmatprep.subr.bf16.mxu1 %v3450_v54 }
 0x13f   :  { %2364 = vmatpush2.bf16.msra.mxu0 %v3400_v21 }
 0x140   :  { %2405 = vmatpush2.bf16.msra.mxu1 %v3448_v56  ;;  %2949 = vmatprep.subr.bf16.mxu0 %v3451_v3 }
 0x142   :  { %v1717_v39 = vpop.f32.mrf.mxu0 }
 0x143   :  { %v1758_v41 = vpop.f32.mrf.mxu1  ;;  %v1718_v43 = vadd.f32 %v1717_v39, %v1677_v40 }
 0x144   :  { %v1719_v31 = vpop.f32.mrf.mxu0 }
 0x145   :  { %v1760_v52 = vpop.f32.mrf.mxu1  ;;  %v1759_v45 = vadd.f32 %v1758_v41, %v1718_v43  ;;  %v1720_v46 = vadd.f32 %v1719_v31, %v1679_v42 }
 0x146   :  { %v1721_v47 = vpop.f32.mrf.mxu0 }
 0x147   :  { %v1762_v48 = vpop.f32.mrf.mxu1  ;;  %v1761_v50 = vadd.f32 %v1760_v52, %v1720_v46  ;;  %v1929_v33 = vmax.f32 %v1759_v45, 0.0  ;;  %v3463_v52 = vld [vmem:[%s4626_s5 + $0x48] sm:$0xff]   ;;  %v3466_v47 = vld [vmem:[%s4626_s5] sm:$0xff]  }
 0x148   :  { %v1722_v51 = vpop.f32.mrf.mxu0 }
 0x149   :  { %v1763_v53 = vpop.f32.mrf.mxu1  ;;  %v1930_v55 = vmax.f32 %v1761_v50, 0.0  ;;  %v1933_v58 = vpack.c.bf16 %v1929_v33, %v1929_v33  ;;  %v2001_v50 = vld [vmem:[%s4627_s4] sm:$0x3] }
 0x14a   :  { %v2006_v33 = vrot.slane %v2001_v50, %v303_v28  ;;  %v2010_v51 = vrot.slane %v2001_v50, %v307_v30 }
 0x14b   :  { %v1934_v57 = vpack.c.bf16 %v1930_v55, %v1930_v55 }
 0x14d   :  { %2365 = vmatprep.mubr.bf16.mxu0 %v1934_v57 }
 0x14e   :  { %2366 = vmatmul.mubr.bf16.vlgmr.msra.gmra.mxu0 %v1933_v58 }
 0x14f   :  { %2950 = vmatpush3.bf16.msra.mxu0 %v3452_v4 }
 0x150   :  { %2951 = vmatprep.subr.bf16.mxu0 %v3453_v5 }
 0x153   :  { %2952 = vmatpush3.bf16.msra.mxu0 %v3454_v6 }
 0x154   :  { %2953 = vmatprep.subr.bf16.mxu0 %v3455_v7 }
 0x157   :  { %2954 = vmatpush3.bf16.msra.mxu0 %v3456_v10 }
 0x158   :  { %2955 = vmatprep.subr.bf16.mxu0 %v3457_v11 }
 0x15b   :  { %2956 = vmatpush3.bf16.msra.mxu0 %v3458_v12 }
 0x15c   :  { %2957 = vmatprep.subr.bf16.mxu0 %v3459_v13 }
 0x15f   :  { %2958 = vmatpush3.bf16.msra.mxu0 %v3460_v14 }
 0x160   :  { %2959 = vmatprep.subr.bf16.mxu0 %v3461_v15 }
 0x163   :  { %2960 = vmatpush3.bf16.msra.mxu0 %v3462_v16 }
 0x164   :  { %2961 = vmatprep.subr.bf16.mxu0 %v3463_v52 }
 0x167   :  { %2962 = vmatpush3.bf16.msra.mxu0 %v3464_v44 }
 0x168   :  { %2963 = vmatprep.subr.bf16.mxu0 %v3465_v32 }
 0x16b   :  { %2964 = vmatpush3.bf16.msra.mxu0 %v3466_v47 }
 0x182   :  { %v1799_v59 = vpop.f32.mrf.mxu0 }
 0x183   :  { %v1840_v60 = vpop.f32.mrf.mxu1  ;;  %v1800_v24 = vadd.f32 %v1799_v59, %v312_v19 }
 0x184   :  { %v1801_v61 = vpop.f32.mrf.mxu0 }
 0x185   :  { %v1842_v62 = vpop.f32.mrf.mxu1  ;;  %v1802_v25 = vadd.f32 %v1801_v61, %v316_v22  ;;  %v1841_v26 = vadd.f32 %v1840_v60, %v1800_v24 }
 0x186   :  { %v1803_v63 = vpop.f32.mrf.mxu0 }
 0x187   :  { %v1844_v0 = vpop.f32.mrf.mxu1  ;;  %v1843_v34 = vadd.f32 %v1842_v62, %v1802_v25 }
 0x188   :  { %v1804_v1 = vpop.f32.mrf.mxu0 }
 0x189   :  { %v1845_v2 = vpop.f32.mrf.mxu1 }
 0x1c2   :  { %v1881_v27 = vpop.f32.mrf.mxu0 }
 0x1c3   :  { %v1922_v49 = vpop.f32.mrf.mxu1  ;;  %v1882_v8 = vadd.f32 %v1881_v27, %v1841_v26 }
 0x1c4   :  { %v1883_v9 = vpop.f32.mrf.mxu0 }
 0x1c5   :  { %v1924_v20 = vpop.f32.mrf.mxu1  ;;  %v1923_v21 = vadd.f32 %v1922_v49, %v1882_v8  ;;  %v1884_v35 = vadd.f32 %v1883_v9, %v1843_v34 }
 0x1c6   :  { %v1885_v36 = vpop.f32.mrf.mxu0 }
 0x1c7   :  { %v1926_v37 = vpop.f32.mrf.mxu1  ;;  %v1925_v40 = vadd.f32 %v1924_v20, %v1884_v35  ;;  %v1931_v38 = vmax.f32 %v1923_v21, 0.0 }
 0x1c8   :  { %v1886_v39 = vpop.f32.mrf.mxu0 }
 0x1c9   :  { %v1927_v41 = vpop.f32.mrf.mxu1  ;;  %v1932_v42 = vmax.f32 %v1925_v40, 0.0  ;;  %v1935_v29 = vpack.c.bf16 %v1931_v38, %v1931_v38 }
 0x1cb   :  { %v1936_v43 = vpack.c.bf16 %v1932_v42, %v1932_v42 }
 0x1cd   :  { %2406 = vmatprep.mubr.bf16.mxu1 %v1936_v43 }
 0x1ce   :  { %2407 = vmatmul.mubr.bf16.vlgmr.msra.gmra.mxu1 %v1935_v29 }
 0x20e   :  { %v2367_v31 = vpop.f32.mrf.mxu0 }
 0x20f   :  { %v2368_v53 = vadd.f32 %v2367_v31, %v2006_v33 }
 0x210   :  { %v2369_v45 = vpop.f32.mrf.mxu0 }
 0x211   :  { %v2370_v55 = vadd.f32 %v2369_v45, %v2010_v51 }
 0x212   :  { %v2371_v46 = vpop.f32.mrf.mxu0 }
 0x214   :  { %v2372_v48 = vpop.f32.mrf.mxu0 }
 0x28e   :  { %v2408_v54 = vpop.f32.mrf.mxu1 }
 0x28f   :  { %v2409_v56 = vadd.f32 %v2408_v54, %v2368_v53 }
 0x290   :  { %v2410_v57 = vpop.f32.mrf.mxu1 }
 0x291   :  { %v2411_v58 = vadd.f32 %v2410_v57, %v2370_v55  ;;  %v2415_v59 = vmax.f32 %v2409_v56, 0.0 }
 0x292   :  { %v2412_v60 = vpop.f32.mrf.mxu1 }
 0x293   :  { %v2416_v61 = vmax.f32 %v2411_v58, 0.0  ;;  %v2417_v0 = vpack.c.bf16 %v2415_v59, %v2415_v59 }
 0x294   :  { %v2413_v62 = vpop.f32.mrf.mxu1 }
 0x295   :  { %v2418_v63 = vpack.c.bf16 %v2416_v61, %v2416_v61 }
 0x297   :  { %2586 = vmatprep.mubr.bf16.mxu0 %v2418_v63 }
 0x298   :  { %2587 = vmatmul.mubr.bf16.vlgmr.msra.gmra.mxu0 %v2417_v0 }
 0x358   :  { %v2965_v1 = vpop.f32.mrf.mxu0 }
 0x35a   :  { %v2966_v2 = vpop.f32.mrf.mxu0 }
 0x35b   :  { %v2967_v28 = vadd.f32 %v2966_v2, %v2965_v1 }
 0x35c   :  { %v2968_v30 = vpop.f32.mrf.mxu0 }
 0x35d   :  { %v2589_v3 = vadd.f32 %v2967_v28, %v2932_v23 }
 0x35e   :  { %v2969_v4 = vpop.f32.mrf.mxu0 }
 0x35f   :  { %v2595_v5 = vsel %vm2594_vm0, %v2589_v3, -inf }
 0x360   :  { %2596 = vmax.xlane.f32.xlu0 %v2595_v5 }
 0x3e9   :  { %v2597_v6 = vpop.xlane.xlu0 %2596 }
 0x3ea   :  { %v2598_v7 = vsub.f32 %v2589_v3, %v2597_v6 }
 0x3ec   :  { %v2599_v10 = vmul.f32 1.442695, %v2598_v7 }
 0x3ee   :  { %3467 = vpow2.f32 %v2599_v10 }
 0x3fb   :  { %v3468_v11 = vpop.eup %3467 }
 0x3fc   :  { %v2601_v12 = vsel %vm2594_vm0, %v3468_v11, 0.0 }
 0x3fd   :  { %2602 = vadd.xlane.f32.xlu0 %v2601_v12 }
 0x486   :  { %v2603_v13 = vpop.xlane.xlu0 %2602 }
 0x487   :  { %3469 = vlog2.f32 %v2603_v13 }
 0x494   :  { %v3470_v14 = vpop.eup %3469 }
 0x495   :  { %v2605_v15 = vmul.f32 0.6931472, %v3470_v14 }
 0x497   :  { %v2606_v16 = vsub.f32 %v2598_v7, %v2605_v15 }
 0x499   :  { %2607 = vst.msk [vmem:[%s4629_s7] sm:$0xff] %vm2594_vm0, %v2606_v16 }

</bundles_post_ra>
